<compile_context>
chip_gen: v5e
topology: v5e:2x2
jax: 0.10.0
libtpu: 0.0.40
codegen_flags: <defaults>
</compile_context>

<pallas_src>
import math
import functools

import jax
import jax.numpy as jnp
from jax.experimental import pallas as pl
from jax.experimental.pallas import tpu as pltpu

LN_EPS = 1e-12
_GELU_C = math.sqrt(2.0 / math.pi)
# Raised scoped-VMEM limit: above v5e/v6e defaults (16/32 MiB), below v7x's
# 64 MiB physical VMEM per TensorCore.
_VMEM_LIMIT = 40 << 20


def _round_up(x, m):
    return ((x + m - 1) // m) * m


# ----------------------------------------------------------------------------
# In-kernel helpers
# ----------------------------------------------------------------------------
def _gelu(x):
    # tanh-approx gelu: transcendental goes to the (otherwise idle) EUP slot
    # instead of ~12 VALU ops for an erf polynomial. |err| vs exact erf gelu
    # is ~1e-3, well inside the bf16 tolerance used here.
    # TODO(synk): switch back to exact erf gelu if a tighter tolerance is needed.
    return 0.5 * x * (1.0 + jnp.tanh(_GELU_C * (x + 0.044715 * x * x * x)))


def _layernorm(y, gamma, beta):
    mu = jnp.mean(y, axis=-1, keepdims=True)
    yc = y - mu
    var = jnp.mean(yc * yc, axis=-1, keepdims=True)
    return (yc * jax.lax.rsqrt(var + LN_EPS)) * gamma + beta


# ----------------------------------------------------------------------------
# Kernel 1: fused BertAttention + BertAttOutput
#   (Q/K/V proj + softmax attention + head merge + dense + residual + LN)
# ----------------------------------------------------------------------------
def _att_block_kernel(h_ref, c_ref, mask_ref,
                      wq_ref, bq_ref, wk_ref, bk_ref, wv_ref, bv_ref,
                      wo_ref, bo_ref, g_ref, beta_ref,
                      out_ref, kT_scr, v_scr, *, num_heads, head_dim):
    qi = pl.program_id(1)
    sk = v_scr.shape[0]

    # K / V projections are query-tile invariant: compute once per batch row
    # (first query tile) into VMEM scratch and reuse for all query tiles.
    @pl.when(qi == 0)
    def _():
        c = c_ref[0].astype(jnp.bfloat16)                          # (Sk, H)
        k = jnp.dot(c, wk_ref[...], preferred_element_type=jnp.float32) + bk_ref[...]
        v = jnp.dot(c, wv_ref[...], preferred_element_type=jnp.float32) + bv_ref[...]
        # One shared transpose of K for all heads (single XLU transpose instead
        # of num_heads implicit transposes inside per-head dot_general).
        kT_scr[...] = k.T.astype(jnp.bfloat16)                     # (H, Sk)
        v_scr[...] = v.astype(jnp.bfloat16)                        # (Sk, H)

    h = h_ref[0]                                                   # (bq, H) f32; residual
    # Q projection (1/sqrt(head_dim) already folded into Wq/bq); cast to bf16 once.
    q = (jnp.dot(h.astype(jnp.bfloat16), wq_ref[...],
                 preferred_element_type=jnp.float32) + bq_ref[...]).astype(jnp.bfloat16)
    kT = kT_scr[...]                                               # (H, Sk) bf16
    v = v_scr[...]                                                 # (Sk, H) bf16
    # Hoist the mask broadcast out of the unrolled head loop.
    mask = jnp.broadcast_to(mask_ref[0], (q.shape[0], sk))         # (bq, Sk) f32

    # Per-head attention via static column slices; per-head contexts are
    # concatenated so the epilogue matmul and the final store are full H width
    # (lane-dense) instead of 64-lane masked column stores.
    ctxs = []
    for hh in range(num_heads):
        sl = slice(hh * head_dim, (hh + 1) * head_dim)
        s = jnp.dot(q[:, sl], kT[sl, :], preferred_element_type=jnp.float32)  # (bq, Sk)
        s = s + mask
        m = jnp.max(s, axis=-1, keepdims=True)
        e = jnp.exp(s - m)
        pr = (e * pl.reciprocal(jnp.sum(e, axis=-1, keepdims=True),
                                approx=True)).astype(jnp.bfloat16)
        ctxs.append(jnp.dot(pr, v[:, sl], preferred_element_type=jnp.float32))
    ctx = jnp.concatenate(ctxs, axis=-1).astype(jnp.bfloat16)      # (bq, H)

    # Fused BertAttOutput: dense + residual + LayerNorm (no HBM round trip).
    y = jnp.dot(ctx, wo_ref[...], preferred_element_type=jnp.float32) + bo_ref[...]
    y = y + h
    out_ref[0] = _layernorm(y, g_ref[...], beta_ref[...]).astype(out_ref.dtype)


def bert_att_block(hidden_states, context, attention_mask, p_att, p_out, *, num_heads):
    """Fused attention + output: hidden (B,Sq,H), context (B,Sk,H), mask (B,Sk)."""
    B, Sq, H = hidden_states.shape
    _, Sk, _ = context.shape
    head_dim = H // num_heads

    # Query-row blocking: pad Sq so every block is sublane-aligned; never fall
    # back to a single un-tiled giant block for large non-divisible Sq.
    if Sq <= 256:
        block_q = _round_up(Sq, 8)
        Sq_pad = block_q
    else:
        block_q = 128
        Sq_pad = _round_up(Sq, block_q)
    n_q = Sq_pad // block_q

    h_in = hidden_states
    if Sq_pad != Sq:
        h_in = jnp.pad(hidden_states, ((0, 0), (0, Sq_pad - Sq), (0, 0)))

    inv = 1.0 / math.sqrt(head_dim)
    wq = (p_att["wq"] * inv).astype(jnp.bfloat16)   # fold score scale into Wq / bq
    bq = (p_att["bq"] * inv).reshape(1, H).astype(jnp.float32)
    wk = p_att["wk"].astype(jnp.bfloat16)
    bk = p_att["bk"].reshape(1, H)
    wv = p_att["wv"].astype(jnp.bfloat16)
    bv = p_att["bv"].reshape(1, H)
    wo = p_out["w"].astype(jnp.bfloat16)
    bo = p_out["b"].reshape(1, H)
    gamma = p_out["gamma"].reshape(1, H)
    beta = p_out["beta"].reshape(1, H)
    mask3 = attention_mask.reshape(B, 1, Sk).astype(jnp.float32)

    kernel = functools.partial(_att_block_kernel,
                               num_heads=num_heads, head_dim=head_dim)

    flops = int(2 * B * H * H * (2 * Sq_pad + 2 * Sk)   # Q + output dense + K + V
                + 4 * B * Sq_pad * Sk * H                # QK^T + PV
                + 10 * B * Sq_pad * H)                   # LN etc.
    transcendentals = int(B * num_heads * Sq_pad * Sk + B * Sq_pad)
    bytes_accessed = int(4 * (2 * B * Sq_pad * H + B * Sk * H + B * Sk)
                         + 2 * 4 * H * H + 4 * 6 * H)

    q_map = lambda b, qi: (b, qi, 0)
    kv_map = lambda b, qi: (b, 0, 0)
    full2 = lambda b, qi: (0, 0)

    out = pl.pallas_call(
        kernel,
        out_shape=jax.ShapeDtypeStruct((B, Sq_pad, H), hidden_states.dtype),
        grid_spec=pltpu.PrefetchScalarGridSpec(
            num_scalar_prefetch=0,
            grid=(B, n_q),
            in_specs=[
                pl.BlockSpec((1, block_q, H), q_map),    # queries / residual rows
                pl.BlockSpec((1, Sk, H), kv_map),        # keys / values source
                pl.BlockSpec((1, 1, Sk), kv_map),        # additive key mask
                pl.BlockSpec((H, H), full2),             # Wq (scaled, bf16)
                pl.BlockSpec((1, H), full2),             # bq (scaled)
                pl.BlockSpec((H, H), full2),             # Wk
                pl.BlockSpec((1, H), full2),             # bk
                pl.BlockSpec((H, H), full2),             # Wv
                pl.BlockSpec((1, H), full2),             # bv
                pl.BlockSpec((H, H), full2),             # Wo (output dense, bf16)
                pl.BlockSpec((1, H), full2),             # bo
                pl.BlockSpec((1, H), full2),             # gamma
                pl.BlockSpec((1, H), full2),             # beta
            ],
            out_specs=pl.BlockSpec((1, block_q, H), q_map),
            scratch_shapes=[
                pltpu.VMEM((H, Sk), jnp.bfloat16),       # K^T, shared across q tiles
                pltpu.VMEM((Sk, H), jnp.bfloat16),       # V,   shared across q tiles
            ],
        ),
        compiler_params=pltpu.CompilerParams(
            dimension_semantics=("parallel", "arbitrary"),
            vmem_limit_bytes=_VMEM_LIMIT),
        cost_estimate=pl.CostEstimate(flops=flops,
                                      transcendentals=transcendentals,
                                      bytes_accessed=bytes_accessed),
    )(h_in, context, mask3, wq, bq, wk, bk, wv, bv, wo, bo, gamma, beta)

    if Sq_pad != Sq:
        out = out[:, :Sq, :]
    return out


# ----------------------------------------------------------------------------
# Kernel 2: BertIntermediate + BertOutput (dense + gelu + dense + res + LN)
# ----------------------------------------------------------------------------
def _ffn_kernel(x_ref, wi_ref, bi_ref, wo_ref, bo_ref, g_ref, beta_ref, out_ref):
    x = x_ref[...]                                              # (br, H) f32 (residual)
    h1 = jnp.dot(x.astype(jnp.bfloat16), wi_ref[...],
                 preferred_element_type=jnp.float32) + bi_ref[...]
    a = _gelu(h1)
    y = jnp.dot(a.astype(jnp.bfloat16), wo_ref[...],
                preferred_element_type=jnp.float32) + bo_ref[...]
    y = y + x
    out_ref[...] = _layernorm(y, g_ref[...], beta_ref[...]).astype(out_ref.dtype)


def _ffn_row_block(H, Di):
    # Largest row block whose estimated footprint (double-buffered bf16 weights
    # + double-buffered f32 activation blocks + f32 gelu intermediate) fits a
    # ~24 MiB budget — safe under _VMEM_LIMIT on v5e/v6e/v7x.
    budget = 24 << 20
    weights = 2 * 2 * 2 * H * Di                 # wi + wo, bf16, double-buffered
    best = 8
    for cand in (8, 16, 32, 64, 128, 256, 512):
        acts = 2 * 2 * 2 * cand * H * 4          # in + out blocks, f32, double-buffered
        inter = 2 * cand * Di * 4                # gelu intermediate (+ headroom)
        if weights + acts + inter <= budget:
            best = cand
    return best


def bert_ffn(x, p):
    B, S, H = x.shape
    Di = p["wi"].shape[1]
    R = B * S
    br = min(_ffn_row_block(H, Di), _round_up(R, 8))
    R_pad = _round_up(R, br)

    x2 = x.reshape(R, H)
    if R_pad != R:
        x2 = jnp.pad(x2, ((0, R_pad - R), (0, 0)))

    wi = p["wi"].astype(jnp.bfloat16)
    bi = p["bi"].reshape(1, Di)
    wo = p["wo"].astype(jnp.bfloat16)
    bo = p["bo"].reshape(1, H)
    g = p["gamma"].reshape(1, H)
    beta = p["beta"].reshape(1, H)

    row_map = lambda i: (i, 0)
    full2 = lambda i: (0, 0)

    out = pl.pallas_call(
        _ffn_kernel,
        out_shape=jax.ShapeDtypeStruct((R_pad, H), x.dtype),
        grid_spec=pltpu.PrefetchScalarGridSpec(
            num_scalar_prefetch=0,
            grid=(R_pad // br,),
            in_specs=[
                pl.BlockSpec((br, H), row_map),      # input (and residual)
                pl.BlockSpec((H, Di), full2),        # Wi (bf16)
                pl.BlockSpec((1, Di), full2),        # bi
                pl.BlockSpec((Di, H), full2),        # Wo (bf16)
                pl.BlockSpec((1, H), full2),         # bo
                pl.BlockSpec((1, H), full2),         # gamma
                pl.BlockSpec((1, H), full2),         # beta
            ],
            out_specs=pl.BlockSpec((br, H), row_map),
        ),
        compiler_params=pltpu.CompilerParams(
            dimension_semantics=("parallel",),
            vmem_limit_bytes=_VMEM_LIMIT),
        cost_estimate=pl.CostEstimate(
            flops=int(4 * R_pad * H * Di + 20 * R_pad * (H + Di)),
            transcendentals=int(R_pad * Di),
            bytes_accessed=int(8 * R_pad * H + 4 * H * Di + 4 * (Di + 3 * H))),
    )(x2, wi, bi, wo, bo, g, beta)

    if R_pad != R:
        out = out[:R]
    return out.reshape(B, S, H)


# ----------------------------------------------------------------------------
# LXRTXLayer forward (composition of the Pallas kernels)
# ----------------------------------------------------------------------------
def lxrt_x_layer(lang_feats, lang_mask, visn_feats, visn_mask, params, *, num_heads):
    ca, co = params["cross_att"], params["cross_out"]
    # Cross attention: the SAME module (weights) is used in both directions,
    # exactly as self.visual_attention is reused in the PyTorch code.
    lang_att = bert_att_block(lang_feats, visn_feats, visn_mask, ca, co,
                              num_heads=num_heads)
    visn_att = bert_att_block(visn_feats, lang_feats, lang_mask, ca, co,
                              num_heads=num_heads)

    # Self attention (separate weights per stream), fused with its output stage.
    lang_att = bert_att_block(lang_att, lang_att, lang_mask,
                              params["lang_self"], params["lang_self_out"],
                              num_heads=num_heads)
    visn_att = bert_att_block(visn_att, visn_att, visn_mask,
                              params["visn_self"], params["visn_self_out"],
                              num_heads=num_heads)

    # FFN (intermediate + output) per stream.
    lang_out = bert_ffn(lang_att, params["lang_ffn"])
    visn_out = bert_ffn(visn_att, params["visn_ffn"])
    return lang_out, visn_out


# ----------------------------------------------------------------------------
# Pure-JAX f32 reference (mirrors the PyTorch module, eval mode)
# ----------------------------------------------------------------------------
def _ref_attention(h, c, key_mask, p, num_heads):
    B, Sq, H = h.shape
    Sk = c.shape[1]
    hd = H // num_heads

    def split(x, s):
        return x.reshape(B, s, num_heads, hd).transpose(0, 2, 1, 3)

    q = split(h @ p["wq"] + p["bq"], Sq)
    k = split(c @ p["wk"] + p["bk"], Sk)
    v = split(c @ p["wv"] + p["bv"], Sk)
    s = jnp.einsum("bhqd,bhkd->bhqk", q, k) / math.sqrt(hd)
    s = s + key_mask[:, None, None, :]
    pr = jax.nn.softmax(s, axis=-1)
    ctx = jnp.einsum("bhqk,bhkd->bhqd", pr, v)
    return ctx.transpose(0, 2, 1, 3).reshape(B, Sq, H)


def _ref_layernorm(x, g, b):
    mu = x.mean(-1, keepdims=True)
    var = jnp.mean((x - mu) ** 2, axis=-1, keepdims=True)
    return (x - mu) / jnp.sqrt(var + LN_EPS) * g + b


def _ref_att_output(x, res, p):
    return _ref_layernorm(x @ p["w"] + p["b"] + res, p["gamma"], p["beta"])


def _ref_gelu(x):
    return x * 0.5 * (1.0 + jax.scipy.special.erf(x / math.sqrt(2.0)))


def _ref_ffn(x, p):
    a = _ref_gelu(x @ p["wi"] + p["bi"])
    return _ref_layernorm(a @ p["wo"] + p["bo"] + x, p["gamma"], p["beta"])


def _ref_lxrt(lang, lang_mask, visn, visn_mask, params, *, num_heads):
    ca, co = params["cross_att"], params["cross_out"]
    lang_att = _ref_att_output(_ref_attention(lang, visn, visn_mask, ca, num_heads), lang, co)
    visn_att = _ref_att_output(_ref_attention(visn, lang, lang_mask, ca, num_heads), visn, co)
    ls, lso = params["lang_self"], params["lang_self_out"]
    lang_att = _ref_att_output(_ref_attention(lang_att, lang_att, lang_mask, ls, num_heads),
                               lang_att, lso)
    vs, vso = params["visn_self"], params["visn_self_out"]
    visn_att = _ref_att_output(_ref_attention(visn_att, visn_att, visn_mask, vs, num_heads),
                               visn_att, vso)
    return _ref_ffn(lang_att, params["lang_ffn"]), _ref_ffn(visn_att, params["visn_ffn"])


# ----------------------------------------------------------------------------
# Parameter init
# ----------------------------------------------------------------------------
def _init_attn(key, H):
    k = jax.random.split(key, 6)
    n = lambda kk, shp: 0.02 * jax.random.normal(kk, shp, jnp.float32)
    return dict(wq=n(k[0], (H, H)), bq=n(k[1], (H,)),
                wk=n(k[2], (H, H)), bk=n(k[3], (H,)),
                wv=n(k[4], (H, H)), bv=n(k[5], (H,)))


def _init_att_out(key, H):
    k = jax.random.split(key, 4)
    n = lambda kk, shp: 0.02 * jax.random.normal(kk, shp, jnp.float32)
    return dict(w=n(k[0], (H, H)), b=n(k[1], (H,)),
                gamma=1.0 + n(k[2], (H,)), beta=n(k[3], (H,)))


def _init_ffn(key, H, Di):
    k = jax.random.split(key, 6)
    n = lambda kk, shp: 0.02 * jax.random.normal(kk, shp, jnp.float32)
    return dict(wi=n(k[0], (H, Di)), bi=n(k[1], (Di,)),
                wo=n(k[2], (Di, H)), bo=n(k[3], (H,)),
                gamma=1.0 + n(k[4], (H,)), beta=n(k[5], (H,)))


if __name__ == "__main__":
    # Small config: hidden=32, heads=4 (head_dim=8), intermediate=64,
    # batch=2, lang seq=8, visn seq=16.
    B, S_L, S_V, H, NH, DI = 2, 8, 16, 32, 4, 64

    key = jax.random.PRNGKey(0)
    ks = jax.random.split(key, 12)

    lang_feats = jax.random.normal(ks[0], (B, S_L, H), jnp.float32)
    visn_feats = jax.random.normal(ks[1], (B, S_V, H), jnp.float32)

    # BERT-style additive key masks (0 keep, -10000 masked).
    lang_keep = (jax.random.uniform(ks[2], (B, S_L)) > 0.2).astype(jnp.float32)
    visn_keep = (jax.random.uniform(ks[3], (B, S_V)) > 0.2).astype(jnp.float32)
    lang_mask = (1.0 - lang_keep) * -10000.0
    visn_mask = (1.0 - visn_keep) * -10000.0

    params = dict(
        cross_att=_init_attn(ks[4], H),
        cross_out=_init_att_out(ks[5], H),
        lang_self=_init_attn(ks[6], H),
        lang_self_out=_init_att_out(ks[7], H),
        visn_self=_init_attn(ks[8], H),
        visn_self_out=_init_att_out(ks[9], H),
        lang_ffn=_init_ffn(ks[10], H, DI),
        visn_ffn=_init_ffn(ks[11], H, DI),
    )

    fwd = jax.jit(functools.partial(lxrt_x_layer, num_heads=NH))
    lang_out, visn_out = fwd(lang_feats, lang_mask, visn_feats, visn_mask, params)
    lang_out = jax.block_until_ready(lang_out)
    visn_out = jax.block_until_ready(visn_out)

    ref_l, ref_v = _ref_lxrt(lang_feats, lang_mask, visn_feats, visn_mask,
                             params, num_heads=NH)

    assert lang_out.shape == (B, S_L, H) and visn_out.shape == (B, S_V, H)
    err_l = float(jnp.max(jnp.abs(lang_out - ref_l)))
    err_v = float(jnp.max(jnp.abs(visn_out - ref_v)))
    # bf16 matmul inputs + approx reciprocal + tanh-approx gelu -> loosened
    # tolerance vs. a pure-f32 reference.
    assert err_l < 2.5e-2 and err_v < 2.5e-2, f"max err lang={err_l} visn={err_v}"
    print("KERNEL_OK")
</pallas_src>

<mosaic_0001>
module attributes {stable_mosaic.version = 11 : i64} {
  func.func @_att_block_kernel(%arg0: i32, %arg1: i32, %arg2: memref<1x8x32xf32, #tpu.memory_space<vmem>>, %arg3: memref<1x16x32xf32, #tpu.memory_space<vmem>>, %arg4: memref<1x1x16xf32, #tpu.memory_space<vmem>>, %arg5: memref<32x32xbf16, #tpu.memory_space<vmem>>, %arg6: memref<1x32xf32, #tpu.memory_space<vmem>>, %arg7: memref<32x32xbf16, #tpu.memory_space<vmem>>, %arg8: memref<1x32xf32, #tpu.memory_space<vmem>>, %arg9: memref<32x32xbf16, #tpu.memory_space<vmem>>, %arg10: memref<1x32xf32, #tpu.memory_space<vmem>>, %arg11: memref<32x32xbf16, #tpu.memory_space<vmem>>, %arg12: memref<1x32xf32, #tpu.memory_space<vmem>>, %arg13: memref<1x32xf32, #tpu.memory_space<vmem>>, %arg14: memref<1x32xf32, #tpu.memory_space<vmem>>, %arg15: memref<1x8x32xf32, #tpu.memory_space<vmem>>, %arg16: memref<32x16xbf16, #tpu.memory_space<vmem>>, %arg17: memref<16x32xbf16, #tpu.memory_space<vmem>>) attributes {dimension_semantics = [#tpu.dimension_semantics<parallel>, #tpu.dimension_semantics<arbitrary>], iteration_bounds = array<i64: 2, 1>, scalar_prefetch = 0 : i64, scratch_operands = 2 : i64, tpu.core_type = #tpu.core_type<tc>, window_params = [{transform_indices = @transform_0, window_bounds = array<i64: 1, 8, 32>}, {transform_indices = @transform_1, window_bounds = array<i64: 1, 16, 32>}, {transform_indices = @transform_2, window_bounds = array<i64: 1, 1, 16>}, {pipeline_mode = #tpu.pipeline_mode<synchronous>, transform_indices = @transform_3, window_bounds = array<i64: 32, 32>}, {pipeline_mode = #tpu.pipeline_mode<synchronous>, transform_indices = @transform_4, window_bounds = array<i64: 1, 32>}, {pipeline_mode = #tpu.pipeline_mode<synchronous>, transform_indices = @transform_5, window_bounds = array<i64: 32, 32>}, {pipeline_mode = #tpu.pipeline_mode<synchronous>, transform_indices = @transform_6, window_bounds = array<i64: 1, 32>}, {pipeline_mode = #tpu.pipeline_mode<synchronous>, transform_indices = @transform_7, window_bounds = array<i64: 32, 32>}, {pipeline_mode = #tpu.pipeline_mode<synchronous>, transform_indices = @transform_8, window_bounds = array<i64: 1, 32>}, {pipeline_mode = #tpu.pipeline_mode<synchronous>, transform_indices = @transform_9, window_bounds = array<i64: 32, 32>}, {pipeline_mode = #tpu.pipeline_mode<synchronous>, transform_indices = @transform_10, window_bounds = array<i64: 1, 32>}, {pipeline_mode = #tpu.pipeline_mode<synchronous>, transform_indices = @transform_11, window_bounds = array<i64: 1, 32>}, {pipeline_mode = #tpu.pipeline_mode<synchronous>, transform_indices = @transform_12, window_bounds = array<i64: 1, 32>}, {transform_indices = @transform_13, window_bounds = array<i64: 1, 8, 32>}]} {
    %c0_i32 = arith.constant 0 : i32
    %0 = arith.cmpi eq, %arg1, %c0_i32 : i32
    %1 = arith.extui %0 : i1 to i32
    %c0_i32_0 = arith.constant 0 : i32
    %2 = arith.cmpi ne, %1, %c0_i32_0 : i32
    scf.if %2 {
      %c0_47 = arith.constant 0 : index
      %c0_48 = arith.constant 0 : index
      %c0_49 = arith.constant 0 : index
      %119 = vector.load %arg3[%c0_47, %c0_48, %c0_49] : memref<1x16x32xf32, #tpu.memory_space<vmem>>, vector<1x16x32xf32>
      %120 = vector.shape_cast %119 : vector<1x16x32xf32> to vector<16x32xf32>
      %121 = arith.truncf %120 : vector<16x32xf32> to vector<16x32xbf16>
      %c0_50 = arith.constant 0 : index
      %c0_51 = arith.constant 0 : index
      %122 = vector.load %arg7[%c0_50, %c0_51] : memref<32x32xbf16, #tpu.memory_space<vmem>>, vector<32x32xbf16>
      %cst_52 = arith.constant dense<0.000000e+00> : vector<16x32xf32>
      %123 = tpu.matmul %121, %122, %cst_52 {dimension_numbers = #tpu.dot_dimension_numbers<[1], [0], [0], [1], [0, 0, 1, 1], [], []>} : vector<16x32xbf16>, vector<32x32xbf16>, vector<16x32xf32> -> vector<16x32xf32>
      %c0_53 = arith.constant 0 : index
      %c0_54 = arith.constant 0 : index
      %124 = vector.load %arg8[%c0_53, %c0_54] : memref<1x32xf32, #tpu.memory_space<vmem>>, vector<1x32xf32>
      %125 = vector.broadcast %124 : vector<1x32xf32> to vector<16x32xf32>
      %126 = arith.addf %123, %125 : vector<16x32xf32>
      %c0_55 = arith.constant 0 : index
      %c0_56 = arith.constant 0 : index
      %127 = vector.load %arg9[%c0_55, %c0_56] : memref<32x32xbf16, #tpu.memory_space<vmem>>, vector<32x32xbf16>
      %cst_57 = arith.constant dense<0.000000e+00> : vector<16x32xf32>
      %128 = tpu.matmul %121, %127, %cst_57 {dimension_numbers = #tpu.dot_dimension_numbers<[1], [0], [0], [1], [0, 0, 1, 1], [], []>} : vector<16x32xbf16>, vector<32x32xbf16>, vector<16x32xf32> -> vector<16x32xf32>
      %c0_58 = arith.constant 0 : index
      %c0_59 = arith.constant 0 : index
      %129 = vector.load %arg10[%c0_58, %c0_59] : memref<1x32xf32, #tpu.memory_space<vmem>>, vector<1x32xf32>
      %130 = vector.broadcast %129 : vector<1x32xf32> to vector<16x32xf32>
      %131 = arith.addf %128, %130 : vector<16x32xf32>
      %132 = tpu.transpose %126, [1, 0] : vector<16x32xf32> -> vector<32x16xf32>
      %133 = arith.truncf %132 : vector<32x16xf32> to vector<32x16xbf16>
      %c0_60 = arith.constant 0 : index
      %c0_61 = arith.constant 0 : index
      %134 = vector.load %arg16[%c0_60, %c0_61] : memref<32x16xbf16, #tpu.memory_space<vmem>>, vector<32x16xbf16>
      tpu.vector_store %arg16[%c0_60, %c0_61], %133 {strides = array<i32>} : memref<32x16xbf16, #tpu.memory_space<vmem>>, vector<32x16xbf16>,
      %135 = arith.truncf %131 : vector<16x32xf32> to vector<16x32xbf16>
      %c0_62 = arith.constant 0 : index
      %c0_63 = arith.constant 0 : index
      %136 = vector.load %arg17[%c0_62, %c0_63] : memref<16x32xbf16, #tpu.memory_space<vmem>>, vector<16x32xbf16>
      tpu.vector_store %arg17[%c0_62, %c0_63], %135 {strides = array<i32>} : memref<16x32xbf16, #tpu.memory_space<vmem>>, vector<16x32xbf16>,
    } else {
    }
    %c0 = arith.constant 0 : index
    %c0_1 = arith.constant 0 : index
    %c0_2 = arith.constant 0 : index
    %3 = vector.load %arg2[%c0, %c0_1, %c0_2] : memref<1x8x32xf32, #tpu.memory_space<vmem>>, vector<1x8x32xf32>
    %4 = vector.shape_cast %3 : vector<1x8x32xf32> to vector<8x32xf32>
    %5 = arith.truncf %4 : vector<8x32xf32> to vector<8x32xbf16>
    %c0_3 = arith.constant 0 : index
    %c0_4 = arith.constant 0 : index
    %6 = vector.load %arg5[%c0_3, %c0_4] : memref<32x32xbf16, #tpu.memory_space<vmem>>, vector<32x32xbf16>
    %cst = arith.constant dense<0.000000e+00> : vector<8x32xf32>
    %7 = tpu.matmul %5, %6, %cst {dimension_numbers = #tpu.dot_dimension_numbers<[1], [0], [0], [1], [0, 0, 1, 1], [], []>} : vector<8x32xbf16>, vector<32x32xbf16>, vector<8x32xf32> -> vector<8x32xf32>
    %c0_5 = arith.constant 0 : index
    %c0_6 = arith.constant 0 : index
    %8 = vector.load %arg6[%c0_5, %c0_6] : memref<1x32xf32, #tpu.memory_space<vmem>>, vector<1x32xf32>
    %9 = vector.broadcast %8 : vector<1x32xf32> to vector<8x32xf32>
    %10 = arith.addf %7, %9 : vector<8x32xf32>
    %11 = arith.truncf %10 : vector<8x32xf32> to vector<8x32xbf16>
    %c0_7 = arith.constant 0 : index
    %c0_8 = arith.constant 0 : index
    %12 = vector.load %arg16[%c0_7, %c0_8] : memref<32x16xbf16, #tpu.memory_space<vmem>>, vector<32x16xbf16>
    %c0_9 = arith.constant 0 : index
    %c0_10 = arith.constant 0 : index
    %13 = vector.load %arg17[%c0_9, %c0_10] : memref<16x32xbf16, #tpu.memory_space<vmem>>, vector<16x32xbf16>
    %c0_11 = arith.constant 0 : index
    %c0_12 = arith.constant 0 : index
    %c0_13 = arith.constant 0 : index
    %14 = vector.load %arg4[%c0_11, %c0_12, %c0_13] : memref<1x1x16xf32, #tpu.memory_space<vmem>>, vector<1x1x16xf32>
    %15 = vector.shape_cast %14 : vector<1x1x16xf32> to vector<1x16xf32>
    %16 = vector.shape_cast %15 : vector<1x16xf32> to vector<1x16xf32>
    %17 = vector.broadcast %16 : vector<1x16xf32> to vector<8x16xf32>
    %18 = vector.extract_strided_slice %11 {offsets = [0, 0], sizes = [8, 8], strides = [1, 1]} : vector<8x32xbf16> to vector<8x8xbf16>
    %19 = vector.extract_strided_slice %12 {offsets = [0, 0], sizes = [8, 16], strides = [1, 1]} : vector<32x16xbf16> to vector<8x16xbf16>
    %cst_14 = arith.constant dense<0.000000e+00> : vector<8x16xf32>
    %20 = tpu.matmul %18, %19, %cst_14 {dimension_numbers = #tpu.dot_dimension_numbers<[1], [0], [0], [1], [0, 0, 1, 1], [], []>} : vector<8x8xbf16>, vector<8x16xbf16>, vector<8x16xf32> -> vector<8x16xf32>
    %21 = arith.addf %20, %17 : vector<8x16xf32>
    %cst_15 = arith.constant dense<0xFF800000> : vector<8xf32>
    %22 = vector.multi_reduction <maximumf>, %21, %cst_15 [1] : vector<8x16xf32> to vector<8xf32>
    %23 = vector.shape_cast %22 : vector<8xf32> to vector<8x1xf32>
    %24 = vector.broadcast %23 : vector<8x1xf32> to vector<8x16xf32>
    %25 = arith.subf %21, %24 : vector<8x16xf32>
    %26 = math.exp %25 : vector<8x16xf32>
    %cst_16 = arith.constant dense<0.000000e+00> : vector<8xf32>
    %27 = vector.multi_reduction <add>, %26, %cst_16 [1] : vector<8x16xf32> to vector<8xf32>
    %28 = vector.shape_cast %27 : vector<8xf32> to vector<8x1xf32>
    %29 = tpu.reciprocal %28 {approx = true} : vector<8x1xf32> -> vector<8x1xf32>
    %30 = vector.broadcast %29 : vector<8x1xf32> to vector<8x16xf32>
    %31 = arith.mulf %26, %30 : vector<8x16xf32>
    %32 = arith.truncf %31 : vector<8x16xf32> to vector<8x16xbf16>
    %33 = vector.extract_strided_slice %13 {offsets = [0, 0], sizes = [16, 8], strides = [1, 1]} : vector<16x32xbf16> to vector<16x8xbf16>
    %cst_17 = arith.constant dense<0.000000e+00> : vector<8x8xf32>
    %34 = tpu.matmul %32, %33, %cst_17 {dimension_numbers = #tpu.dot_dimension_numbers<[1], [0], [0], [1], [0, 0, 1, 1], [], []>} : vector<8x16xbf16>, vector<16x8xbf16>, vector<8x8xf32> -> vector<8x8xf32>
    %35 = vector.extract_strided_slice %11 {offsets = [0, 8], sizes = [8, 8], strides = [1, 1]} : vector<8x32xbf16> to vector<8x8xbf16>
    %36 = vector.extract_strided_slice %12 {offsets = [8, 0], sizes = [8, 16], strides = [1, 1]} : vector<32x16xbf16> to vector<8x16xbf16>
    %cst_18 = arith.constant dense<0.000000e+00> : vector<8x16xf32>
    %37 = tpu.matmul %35, %36, %cst_18 {dimension_numbers = #tpu.dot_dimension_numbers<[1], [0], [0], [1], [0, 0, 1, 1], [], []>} : vector<8x8xbf16>, vector<8x16xbf16>, vector<8x16xf32> -> vector<8x16xf32>
    %38 = arith.addf %37, %17 : vector<8x16xf32>
    %cst_19 = arith.constant dense<0xFF800000> : vector<8xf32>
    %39 = vector.multi_reduction <maximumf>, %38, %cst_19 [1] : vector<8x16xf32> to vector<8xf32>
    %40 = vector.shape_cast %39 : vector<8xf32> to vector<8x1xf32>
    %41 = vector.broadcast %40 : vector<8x1xf32> to vector<8x16xf32>
    %42 = arith.subf %38, %41 : vector<8x16xf32>
    %43 = math.exp %42 : vector<8x16xf32>
    %cst_20 = arith.constant dense<0.000000e+00> : vector<8xf32>
    %44 = vector.multi_reduction <add>, %43, %cst_20 [1] : vector<8x16xf32> to vector<8xf32>
    %45 = vector.shape_cast %44 : vector<8xf32> to vector<8x1xf32>
    %46 = tpu.reciprocal %45 {approx = true} : vector<8x1xf32> -> vector<8x1xf32>
    %47 = vector.broadcast %46 : vector<8x1xf32> to vector<8x16xf32>
    %48 = arith.mulf %43, %47 : vector<8x16xf32>
    %49 = arith.truncf %48 : vector<8x16xf32> to vector<8x16xbf16>
    %50 = vector.extract_strided_slice %13 {offsets = [0, 8], sizes = [16, 8], strides = [1, 1]} : vector<16x32xbf16> to vector<16x8xbf16>
    %cst_21 = arith.constant dense<0.000000e+00> : vector<8x8xf32>
    %51 = tpu.matmul %49, %50, %cst_21 {dimension_numbers = #tpu.dot_dimension_numbers<[1], [0], [0], [1], [0, 0, 1, 1], [], []>} : vector<8x16xbf16>, vector<16x8xbf16>, vector<8x8xf32> -> vector<8x8xf32>
    %52 = vector.extract_strided_slice %11 {offsets = [0, 16], sizes = [8, 8], strides = [1, 1]} : vector<8x32xbf16> to vector<8x8xbf16>
    %53 = vector.extract_strided_slice %12 {offsets = [16, 0], sizes = [8, 16], strides = [1, 1]} : vector<32x16xbf16> to vector<8x16xbf16>
    %cst_22 = arith.constant dense<0.000000e+00> : vector<8x16xf32>
    %54 = tpu.matmul %52, %53, %cst_22 {dimension_numbers = #tpu.dot_dimension_numbers<[1], [0], [0], [1], [0, 0, 1, 1], [], []>} : vector<8x8xbf16>, vector<8x16xbf16>, vector<8x16xf32> -> vector<8x16xf32>
    %55 = arith.addf %54, %17 : vector<8x16xf32>
    %cst_23 = arith.constant dense<0xFF800000> : vector<8xf32>
    %56 = vector.multi_reduction <maximumf>, %55, %cst_23 [1] : vector<8x16xf32> to vector<8xf32>
    %57 = vector.shape_cast %56 : vector<8xf32> to vector<8x1xf32>
    %58 = vector.broadcast %57 : vector<8x1xf32> to vector<8x16xf32>
    %59 = arith.subf %55, %58 : vector<8x16xf32>
    %60 = math.exp %59 : vector<8x16xf32>
    %cst_24 = arith.constant dense<0.000000e+00> : vector<8xf32>
    %61 = vector.multi_reduction <add>, %60, %cst_24 [1] : vector<8x16xf32> to vector<8xf32>
    %62 = vector.shape_cast %61 : vector<8xf32> to vector<8x1xf32>
    %63 = tpu.reciprocal %62 {approx = true} : vector<8x1xf32> -> vector<8x1xf32>
    %64 = vector.broadcast %63 : vector<8x1xf32> to vector<8x16xf32>
    %65 = arith.mulf %60, %64 : vector<8x16xf32>
    %66 = arith.truncf %65 : vector<8x16xf32> to vector<8x16xbf16>
    %67 = vector.extract_strided_slice %13 {offsets = [0, 16], sizes = [16, 8], strides = [1, 1]} : vector<16x32xbf16> to vector<16x8xbf16>
    %cst_25 = arith.constant dense<0.000000e+00> : vector<8x8xf32>
    %68 = tpu.matmul %66, %67, %cst_25 {dimension_numbers = #tpu.dot_dimension_numbers<[1], [0], [0], [1], [0, 0, 1, 1], [], []>} : vector<8x16xbf16>, vector<16x8xbf16>, vector<8x8xf32> -> vector<8x8xf32>
    %69 = vector.extract_strided_slice %11 {offsets = [0, 24], sizes = [8, 8], strides = [1, 1]} : vector<8x32xbf16> to vector<8x8xbf16>
    %70 = vector.extract_strided_slice %12 {offsets = [24, 0], sizes = [8, 16], strides = [1, 1]} : vector<32x16xbf16> to vector<8x16xbf16>
    %cst_26 = arith.constant dense<0.000000e+00> : vector<8x16xf32>
    %71 = tpu.matmul %69, %70, %cst_26 {dimension_numbers = #tpu.dot_dimension_numbers<[1], [0], [0], [1], [0, 0, 1, 1], [], []>} : vector<8x8xbf16>, vector<8x16xbf16>, vector<8x16xf32> -> vector<8x16xf32>
    %72 = arith.addf %71, %17 : vector<8x16xf32>
    %cst_27 = arith.constant dense<0xFF800000> : vector<8xf32>
    %73 = vector.multi_reduction <maximumf>, %72, %cst_27 [1] : vector<8x16xf32> to vector<8xf32>
    %74 = vector.shape_cast %73 : vector<8xf32> to vector<8x1xf32>
    %75 = vector.broadcast %74 : vector<8x1xf32> to vector<8x16xf32>
    %76 = arith.subf %72, %75 : vector<8x16xf32>
    %77 = math.exp %76 : vector<8x16xf32>
    %cst_28 = arith.constant dense<0.000000e+00> : vector<8xf32>
    %78 = vector.multi_reduction <add>, %77, %cst_28 [1] : vector<8x16xf32> to vector<8xf32>
    %79 = vector.shape_cast %78 : vector<8xf32> to vector<8x1xf32>
    %80 = tpu.reciprocal %79 {approx = true} : vector<8x1xf32> -> vector<8x1xf32>
    %81 = vector.broadcast %80 : vector<8x1xf32> to vector<8x16xf32>
    %82 = arith.mulf %77, %81 : vector<8x16xf32>
    %83 = arith.truncf %82 : vector<8x16xf32> to vector<8x16xbf16>
    %84 = vector.extract_strided_slice %13 {offsets = [0, 24], sizes = [16, 8], strides = [1, 1]} : vector<16x32xbf16> to vector<16x8xbf16>
    %cst_29 = arith.constant dense<0.000000e+00> : vector<8x8xf32>
    %85 = tpu.matmul %83, %84, %cst_29 {dimension_numbers = #tpu.dot_dimension_numbers<[1], [0], [0], [1], [0, 0, 1, 1], [], []>} : vector<8x16xbf16>, vector<16x8xbf16>, vector<8x8xf32> -> vector<8x8xf32>
    %86 = tpu.concatenate %34, %51, %68, %85 in 1 : vector<8x8xf32>, vector<8x8xf32>, vector<8x8xf32>, vector<8x8xf32> -> vector<8x32xf32>
    %87 = arith.truncf %86 : vector<8x32xf32> to vector<8x32xbf16>
    %c0_30 = arith.constant 0 : index
    %c0_31 = arith.constant 0 : index
    %88 = vector.load %arg11[%c0_30, %c0_31] : memref<32x32xbf16, #tpu.memory_space<vmem>>, vector<32x32xbf16>
    %cst_32 = arith.constant dense<0.000000e+00> : vector<8x32xf32>
    %89 = tpu.matmul %87, %88, %cst_32 {dimension_numbers = #tpu.dot_dimension_numbers<[1], [0], [0], [1], [0, 0, 1, 1], [], []>} : vector<8x32xbf16>, vector<32x32xbf16>, vector<8x32xf32> -> vector<8x32xf32>
    %c0_33 = arith.constant 0 : index
    %c0_34 = arith.constant 0 : index
    %90 = vector.load %arg12[%c0_33, %c0_34] : memref<1x32xf32, #tpu.memory_space<vmem>>, vector<1x32xf32>
    %91 = vector.broadcast %90 : vector<1x32xf32> to vector<8x32xf32>
    %92 = arith.addf %89, %91 : vector<8x32xf32>
    %93 = arith.addf %92, %4 : vector<8x32xf32>
    %c0_35 = arith.constant 0 : index
    %c0_36 = arith.constant 0 : index
    %94 = vector.load %arg13[%c0_35, %c0_36] : memref<1x32xf32, #tpu.memory_space<vmem>>, vector<1x32xf32>
    %c0_37 = arith.constant 0 : index
    %c0_38 = arith.constant 0 : index
    %95 = vector.load %arg14[%c0_37, %c0_38] : memref<1x32xf32, #tpu.memory_space<vmem>>, vector<1x32xf32>
    %cst_39 = arith.constant dense<0.000000e+00> : vector<8xf32>
    %96 = vector.multi_reduction <add>, %93, %cst_39 [1] : vector<8x32xf32> to vector<8xf32>
    %97 = vector.shape_cast %96 : vector<8xf32> to vector<8x1xf32>
    %cst_40 = arith.constant 3.200000e+01 : f32
    %98 = vector.broadcast %cst_40 : f32 to vector<8x1xf32>
    %99 = arith.divf %97, %98 : vector<8x1xf32>
    %100 = vector.broadcast %99 : vector<8x1xf32> to vector<8x32xf32>
    %101 = arith.subf %93, %100 : vector<8x32xf32>
    %102 = arith.mulf %101, %101 : vector<8x32xf32>
    %cst_41 = arith.constant dense<0.000000e+00> : vector<8xf32>
    %103 = vector.multi_reduction <add>, %102, %cst_41 [1] : vector<8x32xf32> to vector<8xf32>
    %104 = vector.shape_cast %103 : vector<8xf32> to vector<8x1xf32>
    %cst_42 = arith.constant 3.200000e+01 : f32
    %105 = vector.broadcast %cst_42 : f32 to vector<8x1xf32>
    %106 = arith.divf %104, %105 : vector<8x1xf32>
    %cst_43 = arith.constant 9.99999996E-13 : f32
    %107 = vector.broadcast %cst_43 : f32 to vector<8x1xf32>
    %108 = arith.addf %106, %107 : vector<8x1xf32>
    %109 = math.rsqrt %108 : vector<8x1xf32>
    %110 = vector.broadcast %109 : vector<8x1xf32> to vector<8x32xf32>
    %111 = arith.mulf %101, %110 : vector<8x32xf32>
    %112 = vector.broadcast %94 : vector<1x32xf32> to vector<8x32xf32>
    %113 = arith.mulf %111, %112 : vector<8x32xf32>
    %114 = vector.broadcast %95 : vector<1x32xf32> to vector<8x32xf32>
    %115 = arith.addf %113, %114 : vector<8x32xf32>
    %c0_44 = arith.constant 0 : index
    %c0_45 = arith.constant 0 : index
    %c0_46 = arith.constant 0 : index
    %116 = vector.load %arg15[%c0_44, %c0_45, %c0_46] : memref<1x8x32xf32, #tpu.memory_space<vmem>>, vector<1x8x32xf32>
    %117 = vector.shape_cast %116 : vector<1x8x32xf32> to vector<8x32xf32>
    %118 = vector.shape_cast %115 : vector<8x32xf32> to vector<1x8x32xf32>
    tpu.vector_store %arg15[%c0_44, %c0_45, %c0_46], %118 {strides = array<i32>} : memref<1x8x32xf32, #tpu.memory_space<vmem>>, vector<1x8x32xf32>,
    return
  }
  func.func @transform_0(%arg0: i32, %arg1: i32) -> (i32, i32, i32) {
    %c0_i32 = arith.constant 0 : i32
    %c0_i32_0 = arith.constant 0 : i32
    return %arg0, %arg1, %c0_i32 : i32, i32, i32
  }
  func.func @transform_1(%arg0: i32, %arg1: i32) -> (i32, i32, i32) {
    %c0_i32 = arith.constant 0 : i32
    %c0_i32_0 = arith.constant 0 : i32
    %c0_i32_1 = arith.constant 0 : i32
    return %arg0, %c0_i32, %c0_i32_0 : i32, i32, i32
  }
  func.func @transform_2(%arg0: i32, %arg1: i32) -> (i32, i32, i32) {
    %c0_i32 = arith.constant 0 : i32
    %c0_i32_0 = arith.constant 0 : i32
    %c0_i32_1 = arith.constant 0 : i32
    return %arg0, %c0_i32, %c0_i32_0 : i32, i32, i32
  }
  func.func @transform_3(%arg0: i32, %arg1: i32) -> (i32, i32) {
    %c0_i32 = arith.constant 0 : i32
    %c0_i32_0 = arith.constant 0 : i32
    %c0_i32_1 = arith.constant 0 : i32
    return %c0_i32, %c0_i32_0 : i32, i32
  }
  func.func @transform_4(%arg0: i32, %arg1: i32) -> (i32, i32) {
    %c0_i32 = arith.constant 0 : i32
    %c0_i32_0 = arith.constant 0 : i32
    %c0_i32_1 = arith.constant 0 : i32
    return %c0_i32, %c0_i32_0 : i32, i32
  }
  func.func @transform_5(%arg0: i32, %arg1: i32) -> (i32, i32) {
    %c0_i32 = arith.constant 0 : i32
    %c0_i32_0 = arith.constant 0 : i32
    %c0_i32_1 = arith.constant 0 : i32
    return %c0_i32, %c0_i32_0 : i32, i32
  }
  func.func @transform_6(%arg0: i32, %arg1: i32) -> (i32, i32) {
    %c0_i32 = arith.constant 0 : i32
    %c0_i32_0 = arith.constant 0 : i32
    %c0_i32_1 = arith.constant 0 : i32
    return %c0_i32, %c0_i32_0 : i32, i32
  }
  func.func @transform_7(%arg0: i32, %arg1: i32) -> (i32, i32) {
    %c0_i32 = arith.constant 0 : i32
    %c0_i32_0 = arith.constant 0 : i32
    %c0_i32_1 = arith.constant 0 : i32
    return %c0_i32, %c0_i32_0 : i32, i32
  }
  func.func @transform_8(%arg0: i32, %arg1: i32) -> (i32, i32) {
    %c0_i32 = arith.constant 0 : i32
    %c0_i32_0 = arith.constant 0 : i32
    %c0_i32_1 = arith.constant 0 : i32
    return %c0_i32, %c0_i32_0 : i32, i32
  }
  func.func @transform_9(%arg0: i32, %arg1: i32) -> (i32, i32) {
    %c0_i32 = arith.constant 0 : i32
    %c0_i32_0 = arith.constant 0 : i32
    %c0_i32_1 = arith.constant 0 : i32
    return %c0_i32, %c0_i32_0 : i32, i32
  }
  func.func @transform_10(%arg0: i32, %arg1: i32) -> (i32, i32) {
    %c0_i32 = arith.constant 0 : i32
    %c0_i32_0 = arith.constant 0 : i32
    %c0_i32_1 = arith.constant 0 : i32
    return %c0_i32, %c0_i32_0 : i32, i32
  }
  func.func @transform_11(%arg0: i32, %arg1: i32) -> (i32, i32) {
    %c0_i32 = arith.constant 0 : i32
    %c0_i32_0 = arith.constant 0 : i32
    %c0_i32_1 = arith.constant 0 : i32
    return %c0_i32, %c0_i32_0 : i32, i32
  }
  func.func @transform_12(%arg0: i32, %arg1: i32) -> (i32, i32) {
    %c0_i32 = arith.constant 0 : i32
    %c0_i32_0 = arith.constant 0 : i32
    %c0_i32_1 = arith.constant 0 : i32
    return %c0_i32, %c0_i32_0 : i32, i32
  }
  func.func @transform_13(%arg0: i32, %arg1: i32) -> (i32, i32, i32) {
    %c0_i32 = arith.constant 0 : i32
    %c0_i32_0 = arith.constant 0 : i32
    return %arg0, %arg1, %c0_i32 : i32, i32, i32
  }
}

module attributes {stable_mosaic.version = 11 : i64} {
  func.func @_att_block_kernel(%arg0: i32, %arg1: i32, %arg2: memref<1x8x32xf32, #tpu.memory_space<vmem>>, %arg3: memref<1x8x32xf32, #tpu.memory_space<vmem>>, %arg4: memref<1x1x8xf32, #tpu.memory_space<vmem>>, %arg5: memref<32x32xbf16, #tpu.memory_space<vmem>>, %arg6: memref<1x32xf32, #tpu.memory_space<vmem>>, %arg7: memref<32x32xbf16, #tpu.memory_space<vmem>>, %arg8: memref<1x32xf32, #tpu.memory_space<vmem>>, %arg9: memref<32x32xbf16, #tpu.memory_space<vmem>>, %arg10: memref<1x32xf32, #tpu.memory_space<vmem>>, %arg11: memref<32x32xbf16, #tpu.memory_space<vmem>>, %arg12: memref<1x32xf32, #tpu.memory_space<vmem>>, %arg13: memref<1x32xf32, #tpu.memory_space<vmem>>, %arg14: memref<1x32xf32, #tpu.memory_space<vmem>>, %arg15: memref<1x8x32xf32, #tpu.memory_space<vmem>>, %arg16: memref<32x8xbf16, #tpu.memory_space<vmem>>, %arg17: memref<8x32xbf16, #tpu.memory_space<vmem>>) attributes {dimension_semantics = [#tpu.dimension_semantics<parallel>, #tpu.dimension_semantics<arbitrary>], iteration_bounds = array<i64: 2, 1>, scalar_prefetch = 0 : i64, scratch_operands = 2 : i64, tpu.core_type = #tpu.core_type<tc>, window_params = [{transform_indices = @transform_0, window_bounds = array<i64: 1, 8, 32>}, {transform_indices = @transform_1, window_bounds = array<i64: 1, 8, 32>}, {transform_indices = @transform_2, window_bounds = array<i64: 1, 1, 8>}, {pipeline_mode = #tpu.pipeline_mode<synchronous>, transform_indices = @transform_3, window_bounds = array<i64: 32, 32>}, {pipeline_mode = #tpu.pipeline_mode<synchronous>, transform_indices = @transform_4, window_bounds = array<i64: 1, 32>}, {pipeline_mode = #tpu.pipeline_mode<synchronous>, transform_indices = @transform_5, window_bounds = array<i64: 32, 32>}, {pipeline_mode = #tpu.pipeline_mode<synchronous>, transform_indices = @transform_6, window_bounds = array<i64: 1, 32>}, {pipeline_mode = #tpu.pipeline_mode<synchronous>, transform_indices = @transform_7, window_bounds = array<i64: 32, 32>}, {pipeline_mode = #tpu.pipeline_mode<synchronous>, transform_indices = @transform_8, window_bounds = array<i64: 1, 32>}, {pipeline_mode = #tpu.pipeline_mode<synchronous>, transform_indices = @transform_9, window_bounds = array<i64: 32, 32>}, {pipeline_mode = #tpu.pipeline_mode<synchronous>, transform_indices = @transform_10, window_bounds = array<i64: 1, 32>}, {pipeline_mode = #tpu.pipeline_mode<synchronous>, transform_indices = @transform_11, window_bounds = array<i64: 1, 32>}, {pipeline_mode = #tpu.pipeline_mode<synchronous>, transform_indices = @transform_12, window_bounds = array<i64: 1, 32>}, {transform_indices = @transform_13, window_bounds = array<i64: 1, 8, 32>}]} {
    %c0_i32 = arith.constant 0 : i32
    %0 = arith.cmpi eq, %arg1, %c0_i32 : i32
    %1 = arith.extui %0 : i1 to i32
    %c0_i32_0 = arith.constant 0 : i32
    %2 = arith.cmpi ne, %1, %c0_i32_0 : i32
    scf.if %2 {
      %c0_47 = arith.constant 0 : index
      %c0_48 = arith.constant 0 : index
      %c0_49 = arith.constant 0 : index
      %119 = vector.load %arg3[%c0_47, %c0_48, %c0_49] : memref<1x8x32xf32, #tpu.memory_space<vmem>>, vector<1x8x32xf32>
      %120 = vector.shape_cast %119 : vector<1x8x32xf32> to vector<8x32xf32>
      %121 = arith.truncf %120 : vector<8x32xf32> to vector<8x32xbf16>
      %c0_50 = arith.constant 0 : index
      %c0_51 = arith.constant 0 : index
      %122 = vector.load %arg7[%c0_50, %c0_51] : memref<32x32xbf16, #tpu.memory_space<vmem>>, vector<32x32xbf16>
      %cst_52 = arith.constant dense<0.000000e+00> : vector<8x32xf32>
      %123 = tpu.matmul %121, %122, %cst_52 {dimension_numbers = #tpu.dot_dimension_numbers<[1], [0], [0], [1], [0, 0, 1, 1], [], []>} : vector<8x32xbf16>, vector<32x32xbf16>, vector<8x32xf32> -> vector<8x32xf32>
      %c0_53 = arith.constant 0 : index
      %c0_54 = arith.constant 0 : index
      %124 = vector.load %arg8[%c0_53, %c0_54] : memref<1x32xf32, #tpu.memory_space<vmem>>, vector<1x32xf32>
      %125 = vector.broadcast %124 : vector<1x32xf32> to vector<8x32xf32>
      %126 = arith.addf %123, %125 : vector<8x32xf32>
      %c0_55 = arith.constant 0 : index
      %c0_56 = arith.constant 0 : index
      %127 = vector.load %arg9[%c0_55, %c0_56] : memref<32x32xbf16, #tpu.memory_space<vmem>>, vector<32x32xbf16>
      %cst_57 = arith.constant dense<0.000000e+00> : vector<8x32xf32>
      %128 = tpu.matmul %121, %127, %cst_57 {dimension_numbers = #tpu.dot_dimension_numbers<[1], [0], [0], [1], [0, 0, 1, 1], [], []>} : vector<8x32xbf16>, vector<32x32xbf16>, vector<8x32xf32> -> vector<8x32xf32>
      %c0_58 = arith.constant 0 : index
      %c0_59 = arith.constant 0 : index
      %129 = vector.load %arg10[%c0_58, %c0_59] : memref<1x32xf32, #tpu.memory_space<vmem>>, vector<1x32xf32>
      %130 = vector.broadcast %129 : vector<1x32xf32> to vector<8x32xf32>
      %131 = arith.addf %128, %130 : vector<8x32xf32>
      %132 = tpu.transpose %126, [1, 0] : vector<8x32xf32> -> vector<32x8xf32>
      %133 = arith.truncf %132 : vector<32x8xf32> to vector<32x8xbf16>
      %c0_60 = arith.constant 0 : index
      %c0_61 = arith.constant 0 : index
      %134 = vector.load %arg16[%c0_60, %c0_61] : memref<32x8xbf16, #tpu.memory_space<vmem>>, vector<32x8xbf16>
      tpu.vector_store %arg16[%c0_60, %c0_61], %133 {strides = array<i32>} : memref<32x8xbf16, #tpu.memory_space<vmem>>, vector<32x8xbf16>,
      %135 = arith.truncf %131 : vector<8x32xf32> to vector<8x32xbf16>
      %c0_62 = arith.constant 0 : index
      %c0_63 = arith.constant 0 : index
      %136 = vector.load %arg17[%c0_62, %c0_63] : memref<8x32xbf16, #tpu.memory_space<vmem>>, vector<8x32xbf16>
      tpu.vector_store %arg17[%c0_62, %c0_63], %135 {strides = array<i32>} : memref<8x32xbf16, #tpu.memory_space<vmem>>, vector<8x32xbf16>,
    } else {
    }
    %c0 = arith.constant 0 : index
    %c0_1 = arith.constant 0 : index
    %c0_2 = arith.constant 0 : index
    %3 = vector.load %arg2[%c0, %c0_1, %c0_2] : memref<1x8x32xf32, #tpu.memory_space<vmem>>, vector<1x8x32xf32>
    %4 = vector.shape_cast %3 : vector<1x8x32xf32> to vector<8x32xf32>
    %5 = arith.truncf %4 : vector<8x32xf32> to vector<8x32xbf16>
    %c0_3 = arith.constant 0 : index
    %c0_4 = arith.constant 0 : index
    %6 = vector.load %arg5[%c0_3, %c0_4] : memref<32x32xbf16, #tpu.memory_space<vmem>>, vector<32x32xbf16>
    %cst = arith.constant dense<0.000000e+00> : vector<8x32xf32>
    %7 = tpu.matmul %5, %6, %cst {dimension_numbers = #tpu.dot_dimension_numbers<[1], [0], [0], [1], [0, 0, 1, 1], [], []>} : vector<8x32xbf16>, vector<32x32xbf16>, vector<8x32xf32> -> vector<8x32xf32>
    %c0_5 = arith.constant 0 : index
    %c0_6 = arith.constant 0 : index
    %8 = vector.load %arg6[%c0_5, %c0_6] : memref<1x32xf32, #tpu.memory_space<vmem>>, vector<1x32xf32>
    %9 = vector.broadcast %8 : vector<1x32xf32> to vector<8x32xf32>
    %10 = arith.addf %7, %9 : vector<8x32xf32>
    %11 = arith.truncf %10 : vector<8x32xf32> to vector<8x32xbf16>
    %c0_7 = arith.constant 0 : index
    %c0_8 = arith.constant 0 : index
    %12 = vector.load %arg16[%c0_7, %c0_8] : memref<32x8xbf16, #tpu.memory_space<vmem>>, vector<32x8xbf16>
    %c0_9 = arith.constant 0 : index
    %c0_10 = arith.constant 0 : index
    %13 = vector.load %arg17[%c0_9, %c0_10] : memref<8x32xbf16, #tpu.memory_space<vmem>>, vector<8x32xbf16>
    %c0_11 = arith.constant 0 : index
    %c0_12 = arith.constant 0 : index
    %c0_13 = arith.constant 0 : index
    %14 = vector.load %arg4[%c0_11, %c0_12, %c0_13] : memref<1x1x8xf32, #tpu.memory_space<vmem>>, vector<1x1x8xf32>
    %15 = vector.shape_cast %14 : vector<1x1x8xf32> to vector<1x8xf32>
    %16 = vector.shape_cast %15 : vector<1x8xf32> to vector<1x8xf32>
    %17 = vector.broadcast %16 : vector<1x8xf32> to vector<8x8xf32>
    %18 = vector.extract_strided_slice %11 {offsets = [0, 0], sizes = [8, 8], strides = [1, 1]} : vector<8x32xbf16> to vector<8x8xbf16>
    %19 = vector.extract_strided_slice %12 {offsets = [0, 0], sizes = [8, 8], strides = [1, 1]} : vector<32x8xbf16> to vector<8x8xbf16>
    %cst_14 = arith.constant dense<0.000000e+00> : vector<8x8xf32>
    %20 = tpu.matmul %18, %19, %cst_14 {dimension_numbers = #tpu.dot_dimension_numbers<[1], [0], [0], [1], [0, 0, 1, 1], [], []>} : vector<8x8xbf16>, vector<8x8xbf16>, vector<8x8xf32> -> vector<8x8xf32>
    %21 = arith.addf %20, %17 : vector<8x8xf32>
    %cst_15 = arith.constant dense<0xFF800000> : vector<8xf32>
    %22 = vector.multi_reduction <maximumf>, %21, %cst_15 [1] : vector<8x8xf32> to vector<8xf32>
    %23 = vector.shape_cast %22 : vector<8xf32> to vector<8x1xf32>
    %24 = vector.broadcast %23 : vector<8x1xf32> to vector<8x8xf32>
    %25 = arith.subf %21, %24 : vector<8x8xf32>
    %26 = math.exp %25 : vector<8x8xf32>
    %cst_16 = arith.constant dense<0.000000e+00> : vector<8xf32>
    %27 = vector.multi_reduction <add>, %26, %cst_16 [1] : vector<8x8xf32> to vector<8xf32>
    %28 = vector.shape_cast %27 : vector<8xf32> to vector<8x1xf32>
    %29 = tpu.reciprocal %28 {approx = true} : vector<8x1xf32> -> vector<8x1xf32>
    %30 = vector.broadcast %29 : vector<8x1xf32> to vector<8x8xf32>
    %31 = arith.mulf %26, %30 : vector<8x8xf32>
    %32 = arith.truncf %31 : vector<8x8xf32> to vector<8x8xbf16>
    %33 = vector.extract_strided_slice %13 {offsets = [0, 0], sizes = [8, 8], strides = [1, 1]} : vector<8x32xbf16> to vector<8x8xbf16>
    %cst_17 = arith.constant dense<0.000000e+00> : vector<8x8xf32>
    %34 = tpu.matmul %32, %33, %cst_17 {dimension_numbers = #tpu.dot_dimension_numbers<[1], [0], [0], [1], [0, 0, 1, 1], [], []>} : vector<8x8xbf16>, vector<8x8xbf16>, vector<8x8xf32> -> vector<8x8xf32>
    %35 = vector.extract_strided_slice %11 {offsets = [0, 8], sizes = [8, 8], strides = [1, 1]} : vector<8x32xbf16> to vector<8x8xbf16>
    %36 = vector.extract_strided_slice %12 {offsets = [8, 0], sizes = [8, 8], strides = [1, 1]} : vector<32x8xbf16> to vector<8x8xbf16>
    %cst_18 = arith.constant dense<0.000000e+00> : vector<8x8xf32>
    %37 = tpu.matmul %35, %36, %cst_18 {dimension_numbers = #tpu.dot_dimension_numbers<[1], [0], [0], [1], [0, 0, 1, 1], [], []>} : vector<8x8xbf16>, vector<8x8xbf16>, vector<8x8xf32> -> vector<8x8xf32>
    %38 = arith.addf %37, %17 : vector<8x8xf32>
    %cst_19 = arith.constant dense<0xFF800000> : vector<8xf32>
    %39 = vector.multi_reduction <maximumf>, %38, %cst_19 [1] : vector<8x8xf32> to vector<8xf32>
    %40 = vector.shape_cast %39 : vector<8xf32> to vector<8x1xf32>
    %41 = vector.broadcast %40 : vector<8x1xf32> to vector<8x8xf32>
    %42 = arith.subf %38, %41 : vector<8x8xf32>
    %43 = math.exp %42 : vector<8x8xf32>
    %cst_20 = arith.constant dense<0.000000e+00> : vector<8xf32>
    %44 = vector.multi_reduction <add>, %43, %cst_20 [1] : vector<8x8xf32> to vector<8xf32>
    %45 = vector.shape_cast %44 : vector<8xf32> to vector<8x1xf32>
    %46 = tpu.reciprocal %45 {approx = true} : vector<8x1xf32> -> vector<8x1xf32>
    %47 = vector.broadcast %46 : vector<8x1xf32> to vector<8x8xf32>
    %48 = arith.mulf %43, %47 : vector<8x8xf32>
    %49 = arith.truncf %48 : vector<8x8xf32> to vector<8x8xbf16>
    %50 = vector.extract_strided_slice %13 {offsets = [0, 8], sizes = [8, 8], strides = [1, 1]} : vector<8x32xbf16> to vector<8x8xbf16>
    %cst_21 = arith.constant dense<0.000000e+00> : vector<8x8xf32>
    %51 = tpu.matmul %49, %50, %cst_21 {dimension_numbers = #tpu.dot_dimension_numbers<[1], [0], [0], [1], [0, 0, 1, 1], [], []>} : vector<8x8xbf16>, vector<8x8xbf16>, vector<8x8xf32> -> vector<8x8xf32>
    %52 = vector.extract_strided_slice %11 {offsets = [0, 16], sizes = [8, 8], strides = [1, 1]} : vector<8x32xbf16> to vector<8x8xbf16>
    %53 = vector.extract_strided_slice %12 {offsets = [16, 0], sizes = [8, 8], strides = [1, 1]} : vector<32x8xbf16> to vector<8x8xbf16>
    %cst_22 = arith.constant dense<0.000000e+00> : vector<8x8xf32>
    %54 = tpu.matmul %52, %53, %cst_22 {dimension_numbers = #tpu.dot_dimension_numbers<[1], [0], [0], [1], [0, 0, 1, 1], [], []>} : vector<8x8xbf16>, vector<8x8xbf16>, vector<8x8xf32> -> vector<8x8xf32>
    %55 = arith.addf %54, %17 : vector<8x8xf32>
    %cst_23 = arith.constant dense<0xFF800000> : vector<8xf32>
    %56 = vector.multi_reduction <maximumf>, %55, %cst_23 [1] : vector<8x8xf32> to vector<8xf32>
    %57 = vector.shape_cast %56 : vector<8xf32> to vector<8x1xf32>
    %58 = vector.broadcast %57 : vector<8x1xf32> to vector<8x8xf32>
    %59 = arith.subf %55, %58 : vector<8x8xf32>
    %60 = math.exp %59 : vector<8x8xf32>
    %cst_24 = arith.constant dense<0.000000e+00> : vector<8xf32>
    %61 = vector.multi_reduction <add>, %60, %cst_24 [1] : vector<8x8xf32> to vector<8xf32>
    %62 = vector.shape_cast %61 : vector<8xf32> to vector<8x1xf32>
    %63 = tpu.reciprocal %62 {approx = true} : vector<8x1xf32> -> vector<8x1xf32>
    %64 = vector.broadcast %63 : vector<8x1xf32> to vector<8x8xf32>
    %65 = arith.mulf %60, %64 : vector<8x8xf32>
    %66 = arith.truncf %65 : vector<8x8xf32> to vector<8x8xbf16>
    %67 = vector.extract_strided_slice %13 {offsets = [0, 16], sizes = [8, 8], strides = [1, 1]} : vector<8x32xbf16> to vector<8x8xbf16>
    %cst_25 = arith.constant dense<0.000000e+00> : vector<8x8xf32>
    %68 = tpu.matmul %66, %67, %cst_25 {dimension_numbers = #tpu.dot_dimension_numbers<[1], [0], [0], [1], [0, 0, 1, 1], [], []>} : vector<8x8xbf16>, vector<8x8xbf16>, vector<8x8xf32> -> vector<8x8xf32>
    %69 = vector.extract_strided_slice %11 {offsets = [0, 24], sizes = [8, 8], strides = [1, 1]} : vector<8x32xbf16> to vector<8x8xbf16>
    %70 = vector.extract_strided_slice %12 {offsets = [24, 0], sizes = [8, 8], strides = [1, 1]} : vector<32x8xbf16> to vector<8x8xbf16>
    %cst_26 = arith.constant dense<0.000000e+00> : vector<8x8xf32>
    %71 = tpu.matmul %69, %70, %cst_26 {dimension_numbers = #tpu.dot_dimension_numbers<[1], [0], [0], [1], [0, 0, 1, 1], [], []>} : vector<8x8xbf16>, vector<8x8xbf16>, vector<8x8xf32> -> vector<8x8xf32>
    %72 = arith.addf %71, %17 : vector<8x8xf32>
    %cst_27 = arith.constant dense<0xFF800000> : vector<8xf32>
    %73 = vector.multi_reduction <maximumf>, %72, %cst_27 [1] : vector<8x8xf32> to vector<8xf32>
    %74 = vector.shape_cast %73 : vector<8xf32> to vector<8x1xf32>
    %75 = vector.broadcast %74 : vector<8x1xf32> to vector<8x8xf32>
    %76 = arith.subf %72, %75 : vector<8x8xf32>
    %77 = math.exp %76 : vector<8x8xf32>
    %cst_28 = arith.constant dense<0.000000e+00> : vector<8xf32>
    %78 = vector.multi_reduction <add>, %77, %cst_28 [1] : vector<8x8xf32> to vector<8xf32>
    %79 = vector.shape_cast %78 : vector<8xf32> to vector<8x1xf32>
    %80 = tpu.reciprocal %79 {approx = true} : vector<8x1xf32> -> vector<8x1xf32>
    %81 = vector.broadcast %80 : vector<8x1xf32> to vector<8x8xf32>
    %82 = arith.mulf %77, %81 : vector<8x8xf32>
    %83 = arith.truncf %82 : vector<8x8xf32> to vector<8x8xbf16>
    %84 = vector.extract_strided_slice %13 {offsets = [0, 24], sizes = [8, 8], strides = [1, 1]} : vector<8x32xbf16> to vector<8x8xbf16>
    %cst_29 = arith.constant dense<0.000000e+00> : vector<8x8xf32>
    %85 = tpu.matmul %83, %84, %cst_29 {dimension_numbers = #tpu.dot_dimension_numbers<[1], [0], [0], [1], [0, 0, 1, 1], [], []>} : vector<8x8xbf16>, vector<8x8xbf16>, vector<8x8xf32> -> vector<8x8xf32>
    %86 = tpu.concatenate %34, %51, %68, %85 in 1 : vector<8x8xf32>, vector<8x8xf32>, vector<8x8xf32>, vector<8x8xf32> -> vector<8x32xf32>
    %87 = arith.truncf %86 : vector<8x32xf32> to vector<8x32xbf16>
    %c0_30 = arith.constant 0 : index
    %c0_31 = arith.constant 0 : index
    %88 = vector.load %arg11[%c0_30, %c0_31] : memref<32x32xbf16, #tpu.memory_space<vmem>>, vector<32x32xbf16>
    %cst_32 = arith.constant dense<0.000000e+00> : vector<8x32xf32>
    %89 = tpu.matmul %87, %88, %cst_32 {dimension_numbers = #tpu.dot_dimension_numbers<[1], [0], [0], [1], [0, 0, 1, 1], [], []>} : vector<8x32xbf16>, vector<32x32xbf16>, vector<8x32xf32> -> vector<8x32xf32>
    %c0_33 = arith.constant 0 : index
    %c0_34 = arith.constant 0 : index
    %90 = vector.load %arg12[%c0_33, %c0_34] : memref<1x32xf32, #tpu.memory_space<vmem>>, vector<1x32xf32>
    %91 = vector.broadcast %90 : vector<1x32xf32> to vector<8x32xf32>
    %92 = arith.addf %89, %91 : vector<8x32xf32>
    %93 = arith.addf %92, %4 : vector<8x32xf32>
    %c0_35 = arith.constant 0 : index
    %c0_36 = arith.constant 0 : index
    %94 = vector.load %arg13[%c0_35, %c0_36] : memref<1x32xf32, #tpu.memory_space<vmem>>, vector<1x32xf32>
    %c0_37 = arith.constant 0 : index
    %c0_38 = arith.constant 0 : index
    %95 = vector.load %arg14[%c0_37, %c0_38] : memref<1x32xf32, #tpu.memory_space<vmem>>, vector<1x32xf32>
    %cst_39 = arith.constant dense<0.000000e+00> : vector<8xf32>
    %96 = vector.multi_reduction <add>, %93, %cst_39 [1] : vector<8x32xf32> to vector<8xf32>
    %97 = vector.shape_cast %96 : vector<8xf32> to vector<8x1xf32>
    %cst_40 = arith.constant 3.200000e+01 : f32
    %98 = vector.broadcast %cst_40 : f32 to vector<8x1xf32>
    %99 = arith.divf %97, %98 : vector<8x1xf32>
    %100 = vector.broadcast %99 : vector<8x1xf32> to vector<8x32xf32>
    %101 = arith.subf %93, %100 : vector<8x32xf32>
    %102 = arith.mulf %101, %101 : vector<8x32xf32>
    %cst_41 = arith.constant dense<0.000000e+00> : vector<8xf32>
    %103 = vector.multi_reduction <add>, %102, %cst_41 [1] : vector<8x32xf32> to vector<8xf32>
    %104 = vector.shape_cast %103 : vector<8xf32> to vector<8x1xf32>
    %cst_42 = arith.constant 3.200000e+01 : f32
    %105 = vector.broadcast %cst_42 : f32 to vector<8x1xf32>
    %106 = arith.divf %104, %105 : vector<8x1xf32>
    %cst_43 = arith.constant 9.99999996E-13 : f32
    %107 = vector.broadcast %cst_43 : f32 to vector<8x1xf32>
    %108 = arith.addf %106, %107 : vector<8x1xf32>
    %109 = math.rsqrt %108 : vector<8x1xf32>
    %110 = vector.broadcast %109 : vector<8x1xf32> to vector<8x32xf32>
    %111 = arith.mulf %101, %110 : vector<8x32xf32>
    %112 = vector.broadcast %94 : vector<1x32xf32> to vector<8x32xf32>
    %113 = arith.mulf %111, %112 : vector<8x32xf32>
    %114 = vector.broadcast %95 : vector<1x32xf32> to vector<8x32xf32>
    %115 = arith.addf %113, %114 : vector<8x32xf32>
    %c0_44 = arith.constant 0 : index
    %c0_45 = arith.constant 0 : index
    %c0_46 = arith.constant 0 : index
    %116 = vector.load %arg15[%c0_44, %c0_45, %c0_46] : memref<1x8x32xf32, #tpu.memory_space<vmem>>, vector<1x8x32xf32>
    %117 = vector.shape_cast %116 : vector<1x8x32xf32> to vector<8x32xf32>
    %118 = vector.shape_cast %115 : vector<8x32xf32> to vector<1x8x32xf32>
    tpu.vector_store %arg15[%c0_44, %c0_45, %c0_46], %118 {strides = array<i32>} : memref<1x8x32xf32, #tpu.memory_space<vmem>>, vector<1x8x32xf32>,
    return
  }
  func.func @transform_0(%arg0: i32, %arg1: i32) -> (i32, i32, i32) {
    %c0_i32 = arith.constant 0 : i32
    %c0_i32_0 = arith.constant 0 : i32
    return %arg0, %arg1, %c0_i32 : i32, i32, i32
  }
  func.func @transform_1(%arg0: i32, %arg1: i32) -> (i32, i32, i32) {
    %c0_i32 = arith.constant 0 : i32
    %c0_i32_0 = arith.constant 0 : i32
    %c0_i32_1 = arith.constant 0 : i32
    return %arg0, %c0_i32, %c0_i32_0 : i32, i32, i32
  }
  func.func @transform_2(%arg0: i32, %arg1: i32) -> (i32, i32, i32) {
    %c0_i32 = arith.constant 0 : i32
    %c0_i32_0 = arith.constant 0 : i32
    %c0_i32_1 = arith.constant 0 : i32
    return %arg0, %c0_i32, %c0_i32_0 : i32, i32, i32
  }
  func.func @transform_3(%arg0: i32, %arg1: i32) -> (i32, i32) {
    %c0_i32 = arith.constant 0 : i32
    %c0_i32_0 = arith.constant 0 : i32
    %c0_i32_1 = arith.constant 0 : i32
    return %c0_i32, %c0_i32_0 : i32, i32
  }
  func.func @transform_4(%arg0: i32, %arg1: i32) -> (i32, i32) {
    %c0_i32 = arith.constant 0 : i32
    %c0_i32_0 = arith.constant 0 : i32
    %c0_i32_1 = arith.constant 0 : i32
    return %c0_i32, %c0_i32_0 : i32, i32
  }
  func.func @transform_5(%arg0: i32, %arg1: i32) -> (i32, i32) {
    %c0_i32 = arith.constant 0 : i32
    %c0_i32_0 = arith.constant 0 : i32
    %c0_i32_1 = arith.constant 0 : i32
    return %c0_i32, %c0_i32_0 : i32, i32
  }
  func.func @transform_6(%arg0: i32, %arg1: i32) -> (i32, i32) {
    %c0_i32 = arith.constant 0 : i32
    %c0_i32_0 = arith.constant 0 : i32
    %c0_i32_1 = arith.constant 0 : i32
    return %c0_i32, %c0_i32_0 : i32, i32
  }
  func.func @transform_7(%arg0: i32, %arg1: i32) -> (i32, i32) {
    %c0_i32 = arith.constant 0 : i32
    %c0_i32_0 = arith.constant 0 : i32
    %c0_i32_1 = arith.constant 0 : i32
    return %c0_i32, %c0_i32_0 : i32, i32
  }
  func.func @transform_8(%arg0: i32, %arg1: i32) -> (i32, i32) {
    %c0_i32 = arith.constant 0 : i32
    %c0_i32_0 = arith.constant 0 : i32
    %c0_i32_1 = arith.constant 0 : i32
    return %c0_i32, %c0_i32_0 : i32, i32
  }
  func.func @transform_9(%arg0: i32, %arg1: i32) -> (i32, i32) {
    %c0_i32 = arith.constant 0 : i32
    %c0_i32_0 = arith.constant 0 : i32
    %c0_i32_1 = arith.constant 0 : i32
    return %c0_i32, %c0_i32_0 : i32, i32
  }
  func.func @transform_10(%arg0: i32, %arg1: i32) -> (i32, i32) {
    %c0_i32 = arith.constant 0 : i32
    %c0_i32_0 = arith.constant 0 : i32
    %c0_i32_1 = arith.constant 0 : i32
    return %c0_i32, %c0_i32_0 : i32, i32
  }
  func.func @transform_11(%arg0: i32, %arg1: i32) -> (i32, i32) {
    %c0_i32 = arith.constant 0 : i32
    %c0_i32_0 = arith.constant 0 : i32
    %c0_i32_1 = arith.constant 0 : i32
    return %c0_i32, %c0_i32_0 : i32, i32
  }
  func.func @transform_12(%arg0: i32, %arg1: i32) -> (i32, i32) {
    %c0_i32 = arith.constant 0 : i32
    %c0_i32_0 = arith.constant 0 : i32
    %c0_i32_1 = arith.constant 0 : i32
    return %c0_i32, %c0_i32_0 : i32, i32
  }
  func.func @transform_13(%arg0: i32, %arg1: i32) -> (i32, i32, i32) {
    %c0_i32 = arith.constant 0 : i32
    %c0_i32_0 = arith.constant 0 : i32
    return %arg0, %arg1, %c0_i32 : i32, i32, i32
  }
}

module attributes {stable_mosaic.version = 11 : i64} {
  func.func @_ffn_kernel(%arg0: i32, %arg1: memref<16x32xf32, #tpu.memory_space<vmem>>, %arg2: memref<32x64xbf16, #tpu.memory_space<vmem>>, %arg3: memref<1x64xf32, #tpu.memory_space<vmem>>, %arg4: memref<64x32xbf16, #tpu.memory_space<vmem>>, %arg5: memref<1x32xf32, #tpu.memory_space<vmem>>, %arg6: memref<1x32xf32, #tpu.memory_space<vmem>>, %arg7: memref<1x32xf32, #tpu.memory_space<vmem>>, %arg8: memref<16x32xf32, #tpu.memory_space<vmem>>) attributes {dimension_semantics = [#tpu.dimension_semantics<parallel>], iteration_bounds = array<i64: 1>, scalar_prefetch = 0 : i64, scratch_operands = 0 : i64, tpu.core_type = #tpu.core_type<tc>, window_params = [{transform_indices = @transform_0, window_bounds = array<i64: 16, 32>}, {pipeline_mode = #tpu.pipeline_mode<synchronous>, transform_indices = @transform_1, window_bounds = array<i64: 32, 64>}, {pipeline_mode = #tpu.pipeline_mode<synchronous>, transform_indices = @transform_2, window_bounds = array<i64: 1, 64>}, {pipeline_mode = #tpu.pipeline_mode<synchronous>, transform_indices = @transform_3, window_bounds = array<i64: 64, 32>}, {pipeline_mode = #tpu.pipeline_mode<synchronous>, transform_indices = @transform_4, window_bounds = array<i64: 1, 32>}, {pipeline_mode = #tpu.pipeline_mode<synchronous>, transform_indices = @transform_5, window_bounds = array<i64: 1, 32>}, {pipeline_mode = #tpu.pipeline_mode<synchronous>, transform_indices = @transform_6, window_bounds = array<i64: 1, 32>}, {transform_indices = @transform_7, window_bounds = array<i64: 16, 32>}]} {
    %c0 = arith.constant 0 : index
    %c0_0 = arith.constant 0 : index
    %0 = vector.load %arg1[%c0, %c0_0] : memref<16x32xf32, #tpu.memory_space<vmem>>, vector<16x32xf32>
    %1 = arith.truncf %0 : vector<16x32xf32> to vector<16x32xbf16>
    %c0_1 = arith.constant 0 : index
    %c0_2 = arith.constant 0 : index
    %2 = vector.load %arg2[%c0_1, %c0_2] : memref<32x64xbf16, #tpu.memory_space<vmem>>, vector<32x64xbf16>
    %cst = arith.constant dense<0.000000e+00> : vector<16x64xf32>
    %3 = tpu.matmul %1, %2, %cst {dimension_numbers = #tpu.dot_dimension_numbers<[1], [0], [0], [1], [0, 0, 1, 1], [], []>} : vector<16x32xbf16>, vector<32x64xbf16>, vector<16x64xf32> -> vector<16x64xf32>
    %c0_3 = arith.constant 0 : index
    %c0_4 = arith.constant 0 : index
    %4 = vector.load %arg3[%c0_3, %c0_4] : memref<1x64xf32, #tpu.memory_space<vmem>>, vector<1x64xf32>
    %5 = vector.broadcast %4 : vector<1x64xf32> to vector<16x64xf32>
    %6 = arith.addf %3, %5 : vector<16x64xf32>
    %cst_5 = arith.constant 5.000000e-01 : f32
    %7 = vector.broadcast %cst_5 : f32 to vector<16x64xf32>
    %8 = arith.mulf %7, %6 : vector<16x64xf32>
    %cst_6 = arith.constant 4.471500e-02 : f32
    %9 = vector.broadcast %cst_6 : f32 to vector<16x64xf32>
    %10 = arith.mulf %9, %6 : vector<16x64xf32>
    %11 = arith.mulf %10, %6 : vector<16x64xf32>
    %12 = arith.mulf %11, %6 : vector<16x64xf32>
    %13 = arith.addf %6, %12 : vector<16x64xf32>
    %cst_7 = arith.constant 0.797884583 : f32
    %14 = vector.broadcast %cst_7 : f32 to vector<16x64xf32>
    %15 = arith.mulf %14, %13 : vector<16x64xf32>
    %16 = math.tanh %15 : vector<16x64xf32>
    %cst_8 = arith.constant 1.000000e+00 : f32
    %17 = vector.broadcast %cst_8 : f32 to vector<16x64xf32>
    %18 = arith.addf %17, %16 : vector<16x64xf32>
    %19 = arith.mulf %8, %18 : vector<16x64xf32>
    %20 = arith.truncf %19 : vector<16x64xf32> to vector<16x64xbf16>
    %c0_9 = arith.constant 0 : index
    %c0_10 = arith.constant 0 : index
    %21 = vector.load %arg4[%c0_9, %c0_10] : memref<64x32xbf16, #tpu.memory_space<vmem>>, vector<64x32xbf16>
    %cst_11 = arith.constant dense<0.000000e+00> : vector<16x32xf32>
    %22 = tpu.matmul %20, %21, %cst_11 {dimension_numbers = #tpu.dot_dimension_numbers<[1], [0], [0], [1], [0, 0, 1, 1], [], []>} : vector<16x64xbf16>, vector<64x32xbf16>, vector<16x32xf32> -> vector<16x32xf32>
    %c0_12 = arith.constant 0 : index
    %c0_13 = arith.constant 0 : index
    %23 = vector.load %arg5[%c0_12, %c0_13] : memref<1x32xf32, #tpu.memory_space<vmem>>, vector<1x32xf32>
    %24 = vector.broadcast %23 : vector<1x32xf32> to vector<16x32xf32>
    %25 = arith.addf %22, %24 : vector<16x32xf32>
    %26 = arith.addf %25, %0 : vector<16x32xf32>
    %c0_14 = arith.constant 0 : index
    %c0_15 = arith.constant 0 : index
    %27 = vector.load %arg6[%c0_14, %c0_15] : memref<1x32xf32, #tpu.memory_space<vmem>>, vector<1x32xf32>
    %c0_16 = arith.constant 0 : index
    %c0_17 = arith.constant 0 : index
    %28 = vector.load %arg7[%c0_16, %c0_17] : memref<1x32xf32, #tpu.memory_space<vmem>>, vector<1x32xf32>
    %cst_18 = arith.constant dense<0.000000e+00> : vector<16xf32>
    %29 = vector.multi_reduction <add>, %26, %cst_18 [1] : vector<16x32xf32> to vector<16xf32>
    %30 = vector.shape_cast %29 : vector<16xf32> to vector<16x1xf32>
    %cst_19 = arith.constant 3.200000e+01 : f32
    %31 = vector.broadcast %cst_19 : f32 to vector<16x1xf32>
    %32 = arith.divf %30, %31 : vector<16x1xf32>
    %33 = vector.broadcast %32 : vector<16x1xf32> to vector<16x32xf32>
    %34 = arith.subf %26, %33 : vector<16x32xf32>
    %35 = arith.mulf %34, %34 : vector<16x32xf32>
    %cst_20 = arith.constant dense<0.000000e+00> : vector<16xf32>
    %36 = vector.multi_reduction <add>, %35, %cst_20 [1] : vector<16x32xf32> to vector<16xf32>
    %37 = vector.shape_cast %36 : vector<16xf32> to vector<16x1xf32>
    %cst_21 = arith.constant 3.200000e+01 : f32
    %38 = vector.broadcast %cst_21 : f32 to vector<16x1xf32>
    %39 = arith.divf %37, %38 : vector<16x1xf32>
    %cst_22 = arith.constant 9.99999996E-13 : f32
    %40 = vector.broadcast %cst_22 : f32 to vector<16x1xf32>
    %41 = arith.addf %39, %40 : vector<16x1xf32>
    %42 = math.rsqrt %41 : vector<16x1xf32>
    %43 = vector.broadcast %42 : vector<16x1xf32> to vector<16x32xf32>
    %44 = arith.mulf %34, %43 : vector<16x32xf32>
    %45 = vector.broadcast %27 : vector<1x32xf32> to vector<16x32xf32>
    %46 = arith.mulf %44, %45 : vector<16x32xf32>
    %47 = vector.broadcast %28 : vector<1x32xf32> to vector<16x32xf32>
    %48 = arith.addf %46, %47 : vector<16x32xf32>
    %c0_23 = arith.constant 0 : index
    %c0_24 = arith.constant 0 : index
    %49 = vector.load %arg8[%c0_23, %c0_24] : memref<16x32xf32, #tpu.memory_space<vmem>>, vector<16x32xf32>
    tpu.vector_store %arg8[%c0_23, %c0_24], %48 {strides = array<i32>} : memref<16x32xf32, #tpu.memory_space<vmem>>, vector<16x32xf32>,
    return
  }
  func.func @transform_0(%arg0: i32) -> (i32, i32) {
    %c0_i32 = arith.constant 0 : i32
    %c0_i32_0 = arith.constant 0 : i32
    return %arg0, %c0_i32 : i32, i32
  }
  func.func @transform_1(%arg0: i32) -> (i32, i32) {
    %c0_i32 = arith.constant 0 : i32
    %c0_i32_0 = arith.constant 0 : i32
    %c0_i32_1 = arith.constant 0 : i32
    return %c0_i32, %c0_i32_0 : i32, i32
  }
  func.func @transform_2(%arg0: i32) -> (i32, i32) {
    %c0_i32 = arith.constant 0 : i32
    %c0_i32_0 = arith.constant 0 : i32
    %c0_i32_1 = arith.constant 0 : i32
    return %c0_i32, %c0_i32_0 : i32, i32
  }
  func.func @transform_3(%arg0: i32) -> (i32, i32) {
    %c0_i32 = arith.constant 0 : i32
    %c0_i32_0 = arith.constant 0 : i32
    %c0_i32_1 = arith.constant 0 : i32
    return %c0_i32, %c0_i32_0 : i32, i32
  }
  func.func @transform_4(%arg0: i32) -> (i32, i32) {
    %c0_i32 = arith.constant 0 : i32
    %c0_i32_0 = arith.constant 0 : i32
    %c0_i32_1 = arith.constant 0 : i32
    return %c0_i32, %c0_i32_0 : i32, i32
  }
  func.func @transform_5(%arg0: i32) -> (i32, i32) {
    %c0_i32 = arith.constant 0 : i32
    %c0_i32_0 = arith.constant 0 : i32
    %c0_i32_1 = arith.constant 0 : i32
    return %c0_i32, %c0_i32_0 : i32, i32
  }
  func.func @transform_6(%arg0: i32) -> (i32, i32) {
    %c0_i32 = arith.constant 0 : i32
    %c0_i32_0 = arith.constant 0 : i32
    %c0_i32_1 = arith.constant 0 : i32
    return %c0_i32, %c0_i32_0 : i32, i32
  }
  func.func @transform_7(%arg0: i32) -> (i32, i32) {
    %c0_i32 = arith.constant 0 : i32
    %c0_i32_0 = arith.constant 0 : i32
    return %arg0, %c0_i32 : i32, i32
  }
}

module attributes {stable_mosaic.version = 11 : i64} {
  func.func @_att_block_kernel(%arg0: i32, %arg1: i32, %arg2: memref<1x16x32xf32, #tpu.memory_space<vmem>>, %arg3: memref<1x8x32xf32, #tpu.memory_space<vmem>>, %arg4: memref<1x1x8xf32, #tpu.memory_space<vmem>>, %arg5: memref<32x32xbf16, #tpu.memory_space<vmem>>, %arg6: memref<1x32xf32, #tpu.memory_space<vmem>>, %arg7: memref<32x32xbf16, #tpu.memory_space<vmem>>, %arg8: memref<1x32xf32, #tpu.memory_space<vmem>>, %arg9: memref<32x32xbf16, #tpu.memory_space<vmem>>, %arg10: memref<1x32xf32, #tpu.memory_space<vmem>>, %arg11: memref<32x32xbf16, #tpu.memory_space<vmem>>, %arg12: memref<1x32xf32, #tpu.memory_space<vmem>>, %arg13: memref<1x32xf32, #tpu.memory_space<vmem>>, %arg14: memref<1x32xf32, #tpu.memory_space<vmem>>, %arg15: memref<1x16x32xf32, #tpu.memory_space<vmem>>, %arg16: memref<32x8xbf16, #tpu.memory_space<vmem>>, %arg17: memref<8x32xbf16, #tpu.memory_space<vmem>>) attributes {dimension_semantics = [#tpu.dimension_semantics<parallel>, #tpu.dimension_semantics<arbitrary>], iteration_bounds = array<i64: 2, 1>, scalar_prefetch = 0 : i64, scratch_operands = 2 : i64, tpu.core_type = #tpu.core_type<tc>, window_params = [{transform_indices = @transform_0, window_bounds = array<i64: 1, 16, 32>}, {transform_indices = @transform_1, window_bounds = array<i64: 1, 8, 32>}, {transform_indices = @transform_2, window_bounds = array<i64: 1, 1, 8>}, {pipeline_mode = #tpu.pipeline_mode<synchronous>, transform_indices = @transform_3, window_bounds = array<i64: 32, 32>}, {pipeline_mode = #tpu.pipeline_mode<synchronous>, transform_indices = @transform_4, window_bounds = array<i64: 1, 32>}, {pipeline_mode = #tpu.pipeline_mode<synchronous>, transform_indices = @transform_5, window_bounds = array<i64: 32, 32>}, {pipeline_mode = #tpu.pipeline_mode<synchronous>, transform_indices = @transform_6, window_bounds = array<i64: 1, 32>}, {pipeline_mode = #tpu.pipeline_mode<synchronous>, transform_indices = @transform_7, window_bounds = array<i64: 32, 32>}, {pipeline_mode = #tpu.pipeline_mode<synchronous>, transform_indices = @transform_8, window_bounds = array<i64: 1, 32>}, {pipeline_mode = #tpu.pipeline_mode<synchronous>, transform_indices = @transform_9, window_bounds = array<i64: 32, 32>}, {pipeline_mode = #tpu.pipeline_mode<synchronous>, transform_indices = @transform_10, window_bounds = array<i64: 1, 32>}, {pipeline_mode = #tpu.pipeline_mode<synchronous>, transform_indices = @transform_11, window_bounds = array<i64: 1, 32>}, {pipeline_mode = #tpu.pipeline_mode<synchronous>, transform_indices = @transform_12, window_bounds = array<i64: 1, 32>}, {transform_indices = @transform_13, window_bounds = array<i64: 1, 16, 32>}]} {
    %c0_i32 = arith.constant 0 : i32
    %0 = arith.cmpi eq, %arg1, %c0_i32 : i32
    %1 = arith.extui %0 : i1 to i32
    %c0_i32_0 = arith.constant 0 : i32
    %2 = arith.cmpi ne, %1, %c0_i32_0 : i32
    scf.if %2 {
      %c0_47 = arith.constant 0 : index
      %c0_48 = arith.constant 0 : index
      %c0_49 = arith.constant 0 : index
      %119 = vector.load %arg3[%c0_47, %c0_48, %c0_49] : memref<1x8x32xf32, #tpu.memory_space<vmem>>, vector<1x8x32xf32>
      %120 = vector.shape_cast %119 : vector<1x8x32xf32> to vector<8x32xf32>
      %121 = arith.truncf %120 : vector<8x32xf32> to vector<8x32xbf16>
      %c0_50 = arith.constant 0 : index
      %c0_51 = arith.constant 0 : index
      %122 = vector.load %arg7[%c0_50, %c0_51] : memref<32x32xbf16, #tpu.memory_space<vmem>>, vector<32x32xbf16>
      %cst_52 = arith.constant dense<0.000000e+00> : vector<8x32xf32>
      %123 = tpu.matmul %121, %122, %cst_52 {dimension_numbers = #tpu.dot_dimension_numbers<[1], [0], [0], [1], [0, 0, 1, 1], [], []>} : vector<8x32xbf16>, vector<32x32xbf16>, vector<8x32xf32> -> vector<8x32xf32>
      %c0_53 = arith.constant 0 : index
      %c0_54 = arith.constant 0 : index
      %124 = vector.load %arg8[%c0_53, %c0_54] : memref<1x32xf32, #tpu.memory_space<vmem>>, vector<1x32xf32>
      %125 = vector.broadcast %124 : vector<1x32xf32> to vector<8x32xf32>
      %126 = arith.addf %123, %125 : vector<8x32xf32>
      %c0_55 = arith.constant 0 : index
      %c0_56 = arith.constant 0 : index
      %127 = vector.load %arg9[%c0_55, %c0_56] : memref<32x32xbf16, #tpu.memory_space<vmem>>, vector<32x32xbf16>
      %cst_57 = arith.constant dense<0.000000e+00> : vector<8x32xf32>
      %128 = tpu.matmul %121, %127, %cst_57 {dimension_numbers = #tpu.dot_dimension_numbers<[1], [0], [0], [1], [0, 0, 1, 1], [], []>} : vector<8x32xbf16>, vector<32x32xbf16>, vector<8x32xf32> -> vector<8x32xf32>
      %c0_58 = arith.constant 0 : index
      %c0_59 = arith.constant 0 : index
      %129 = vector.load %arg10[%c0_58, %c0_59] : memref<1x32xf32, #tpu.memory_space<vmem>>, vector<1x32xf32>
      %130 = vector.broadcast %129 : vector<1x32xf32> to vector<8x32xf32>
      %131 = arith.addf %128, %130 : vector<8x32xf32>
      %132 = tpu.transpose %126, [1, 0] : vector<8x32xf32> -> vector<32x8xf32>
      %133 = arith.truncf %132 : vector<32x8xf32> to vector<32x8xbf16>
      %c0_60 = arith.constant 0 : index
      %c0_61 = arith.constant 0 : index
      %134 = vector.load %arg16[%c0_60, %c0_61] : memref<32x8xbf16, #tpu.memory_space<vmem>>, vector<32x8xbf16>
      tpu.vector_store %arg16[%c0_60, %c0_61], %133 {strides = array<i32>} : memref<32x8xbf16, #tpu.memory_space<vmem>>, vector<32x8xbf16>,
      %135 = arith.truncf %131 : vector<8x32xf32> to vector<8x32xbf16>
      %c0_62 = arith.constant 0 : index
      %c0_63 = arith.constant 0 : index
      %136 = vector.load %arg17[%c0_62, %c0_63] : memref<8x32xbf16, #tpu.memory_space<vmem>>, vector<8x32xbf16>
      tpu.vector_store %arg17[%c0_62, %c0_63], %135 {strides = array<i32>} : memref<8x32xbf16, #tpu.memory_space<vmem>>, vector<8x32xbf16>,
    } else {
    }
    %c0 = arith.constant 0 : index
    %c0_1 = arith.constant 0 : index
    %c0_2 = arith.constant 0 : index
    %3 = vector.load %arg2[%c0, %c0_1, %c0_2] : memref<1x16x32xf32, #tpu.memory_space<vmem>>, vector<1x16x32xf32>
    %4 = vector.shape_cast %3 : vector<1x16x32xf32> to vector<16x32xf32>
    %5 = arith.truncf %4 : vector<16x32xf32> to vector<16x32xbf16>
    %c0_3 = arith.constant 0 : index
    %c0_4 = arith.constant 0 : index
    %6 = vector.load %arg5[%c0_3, %c0_4] : memref<32x32xbf16, #tpu.memory_space<vmem>>, vector<32x32xbf16>
    %cst = arith.constant dense<0.000000e+00> : vector<16x32xf32>
    %7 = tpu.matmul %5, %6, %cst {dimension_numbers = #tpu.dot_dimension_numbers<[1], [0], [0], [1], [0, 0, 1, 1], [], []>} : vector<16x32xbf16>, vector<32x32xbf16>, vector<16x32xf32> -> vector<16x32xf32>
    %c0_5 = arith.constant 0 : index
    %c0_6 = arith.constant 0 : index
    %8 = vector.load %arg6[%c0_5, %c0_6] : memref<1x32xf32, #tpu.memory_space<vmem>>, vector<1x32xf32>
    %9 = vector.broadcast %8 : vector<1x32xf32> to vector<16x32xf32>
    %10 = arith.addf %7, %9 : vector<16x32xf32>
    %11 = arith.truncf %10 : vector<16x32xf32> to vector<16x32xbf16>
    %c0_7 = arith.constant 0 : index
    %c0_8 = arith.constant 0 : index
    %12 = vector.load %arg16[%c0_7, %c0_8] : memref<32x8xbf16, #tpu.memory_space<vmem>>, vector<32x8xbf16>
    %c0_9 = arith.constant 0 : index
    %c0_10 = arith.constant 0 : index
    %13 = vector.load %arg17[%c0_9, %c0_10] : memref<8x32xbf16, #tpu.memory_space<vmem>>, vector<8x32xbf16>
    %c0_11 = arith.constant 0 : index
    %c0_12 = arith.constant 0 : index
    %c0_13 = arith.constant 0 : index
    %14 = vector.load %arg4[%c0_11, %c0_12, %c0_13] : memref<1x1x8xf32, #tpu.memory_space<vmem>>, vector<1x1x8xf32>
    %15 = vector.shape_cast %14 : vector<1x1x8xf32> to vector<1x8xf32>
    %16 = vector.shape_cast %15 : vector<1x8xf32> to vector<1x8xf32>
    %17 = vector.broadcast %16 : vector<1x8xf32> to vector<16x8xf32>
    %18 = vector.extract_strided_slice %11 {offsets = [0, 0], sizes = [16, 8], strides = [1, 1]} : vector<16x32xbf16> to vector<16x8xbf16>
    %19 = vector.extract_strided_slice %12 {offsets = [0, 0], sizes = [8, 8], strides = [1, 1]} : vector<32x8xbf16> to vector<8x8xbf16>
    %cst_14 = arith.constant dense<0.000000e+00> : vector<16x8xf32>
    %20 = tpu.matmul %18, %19, %cst_14 {dimension_numbers = #tpu.dot_dimension_numbers<[1], [0], [0], [1], [0, 0, 1, 1], [], []>} : vector<16x8xbf16>, vector<8x8xbf16>, vector<16x8xf32> -> vector<16x8xf32>
    %21 = arith.addf %20, %17 : vector<16x8xf32>
    %cst_15 = arith.constant dense<0xFF800000> : vector<16xf32>
    %22 = vector.multi_reduction <maximumf>, %21, %cst_15 [1] : vector<16x8xf32> to vector<16xf32>
    %23 = vector.shape_cast %22 : vector<16xf32> to vector<16x1xf32>
    %24 = vector.broadcast %23 : vector<16x1xf32> to vector<16x8xf32>
    %25 = arith.subf %21, %24 : vector<16x8xf32>
    %26 = math.exp %25 : vector<16x8xf32>
    %cst_16 = arith.constant dense<0.000000e+00> : vector<16xf32>
    %27 = vector.multi_reduction <add>, %26, %cst_16 [1] : vector<16x8xf32> to vector<16xf32>
    %28 = vector.shape_cast %27 : vector<16xf32> to vector<16x1xf32>
    %29 = tpu.reciprocal %28 {approx = true} : vector<16x1xf32> -> vector<16x1xf32>
    %30 = vector.broadcast %29 : vector<16x1xf32> to vector<16x8xf32>
    %31 = arith.mulf %26, %30 : vector<16x8xf32>
    %32 = arith.truncf %31 : vector<16x8xf32> to vector<16x8xbf16>
    %33 = vector.extract_strided_slice %13 {offsets = [0, 0], sizes = [8, 8], strides = [1, 1]} : vector<8x32xbf16> to vector<8x8xbf16>
    %cst_17 = arith.constant dense<0.000000e+00> : vector<16x8xf32>
    %34 = tpu.matmul %32, %33, %cst_17 {dimension_numbers = #tpu.dot_dimension_numbers<[1], [0], [0], [1], [0, 0, 1, 1], [], []>} : vector<16x8xbf16>, vector<8x8xbf16>, vector<16x8xf32> -> vector<16x8xf32>
    %35 = vector.extract_strided_slice %11 {offsets = [0, 8], sizes = [16, 8], strides = [1, 1]} : vector<16x32xbf16> to vector<16x8xbf16>
    %36 = vector.extract_strided_slice %12 {offsets = [8, 0], sizes = [8, 8], strides = [1, 1]} : vector<32x8xbf16> to vector<8x8xbf16>
    %cst_18 = arith.constant dense<0.000000e+00> : vector<16x8xf32>
    %37 = tpu.matmul %35, %36, %cst_18 {dimension_numbers = #tpu.dot_dimension_numbers<[1], [0], [0], [1], [0, 0, 1, 1], [], []>} : vector<16x8xbf16>, vector<8x8xbf16>, vector<16x8xf32> -> vector<16x8xf32>
    %38 = arith.addf %37, %17 : vector<16x8xf32>
    %cst_19 = arith.constant dense<0xFF800000> : vector<16xf32>
    %39 = vector.multi_reduction <maximumf>, %38, %cst_19 [1] : vector<16x8xf32> to vector<16xf32>
    %40 = vector.shape_cast %39 : vector<16xf32> to vector<16x1xf32>
    %41 = vector.broadcast %40 : vector<16x1xf32> to vector<16x8xf32>
    %42 = arith.subf %38, %41 : vector<16x8xf32>
    %43 = math.exp %42 : vector<16x8xf32>
    %cst_20 = arith.constant dense<0.000000e+00> : vector<16xf32>
    %44 = vector.multi_reduction <add>, %43, %cst_20 [1] : vector<16x8xf32> to vector<16xf32>
    %45 = vector.shape_cast %44 : vector<16xf32> to vector<16x1xf32>
    %46 = tpu.reciprocal %45 {approx = true} : vector<16x1xf32> -> vector<16x1xf32>
    %47 = vector.broadcast %46 : vector<16x1xf32> to vector<16x8xf32>
    %48 = arith.mulf %43, %47 : vector<16x8xf32>
    %49 = arith.truncf %48 : vector<16x8xf32> to vector<16x8xbf16>
    %50 = vector.extract_strided_slice %13 {offsets = [0, 8], sizes = [8, 8], strides = [1, 1]} : vector<8x32xbf16> to vector<8x8xbf16>
    %cst_21 = arith.constant dense<0.000000e+00> : vector<16x8xf32>
    %51 = tpu.matmul %49, %50, %cst_21 {dimension_numbers = #tpu.dot_dimension_numbers<[1], [0], [0], [1], [0, 0, 1, 1], [], []>} : vector<16x8xbf16>, vector<8x8xbf16>, vector<16x8xf32> -> vector<16x8xf32>
    %52 = vector.extract_strided_slice %11 {offsets = [0, 16], sizes = [16, 8], strides = [1, 1]} : vector<16x32xbf16> to vector<16x8xbf16>
    %53 = vector.extract_strided_slice %12 {offsets = [16, 0], sizes = [8, 8], strides = [1, 1]} : vector<32x8xbf16> to vector<8x8xbf16>
    %cst_22 = arith.constant dense<0.000000e+00> : vector<16x8xf32>
    %54 = tpu.matmul %52, %53, %cst_22 {dimension_numbers = #tpu.dot_dimension_numbers<[1], [0], [0], [1], [0, 0, 1, 1], [], []>} : vector<16x8xbf16>, vector<8x8xbf16>, vector<16x8xf32> -> vector<16x8xf32>
    %55 = arith.addf %54, %17 : vector<16x8xf32>
    %cst_23 = arith.constant dense<0xFF800000> : vector<16xf32>
    %56 = vector.multi_reduction <maximumf>, %55, %cst_23 [1] : vector<16x8xf32> to vector<16xf32>
    %57 = vector.shape_cast %56 : vector<16xf32> to vector<16x1xf32>
    %58 = vector.broadcast %57 : vector<16x1xf32> to vector<16x8xf32>
    %59 = arith.subf %55, %58 : vector<16x8xf32>
    %60 = math.exp %59 : vector<16x8xf32>
    %cst_24 = arith.constant dense<0.000000e+00> : vector<16xf32>
    %61 = vector.multi_reduction <add>, %60, %cst_24 [1] : vector<16x8xf32> to vector<16xf32>
    %62 = vector.shape_cast %61 : vector<16xf32> to vector<16x1xf32>
    %63 = tpu.reciprocal %62 {approx = true} : vector<16x1xf32> -> vector<16x1xf32>
    %64 = vector.broadcast %63 : vector<16x1xf32> to vector<16x8xf32>
    %65 = arith.mulf %60, %64 : vector<16x8xf32>
    %66 = arith.truncf %65 : vector<16x8xf32> to vector<16x8xbf16>
    %67 = vector.extract_strided_slice %13 {offsets = [0, 16], sizes = [8, 8], strides = [1, 1]} : vector<8x32xbf16> to vector<8x8xbf16>
    %cst_25 = arith.constant dense<0.000000e+00> : vector<16x8xf32>
    %68 = tpu.matmul %66, %67, %cst_25 {dimension_numbers = #tpu.dot_dimension_numbers<[1], [0], [0], [1], [0, 0, 1, 1], [], []>} : vector<16x8xbf16>, vector<8x8xbf16>, vector<16x8xf32> -> vector<16x8xf32>
    %69 = vector.extract_strided_slice %11 {offsets = [0, 24], sizes = [16, 8], strides = [1, 1]} : vector<16x32xbf16> to vector<16x8xbf16>
    %70 = vector.extract_strided_slice %12 {offsets = [24, 0], sizes = [8, 8], strides = [1, 1]} : vector<32x8xbf16> to vector<8x8xbf16>
    %cst_26 = arith.constant dense<0.000000e+00> : vector<16x8xf32>
    %71 = tpu.matmul %69, %70, %cst_26 {dimension_numbers = #tpu.dot_dimension_numbers<[1], [0], [0], [1], [0, 0, 1, 1], [], []>} : vector<16x8xbf16>, vector<8x8xbf16>, vector<16x8xf32> -> vector<16x8xf32>
    %72 = arith.addf %71, %17 : vector<16x8xf32>
    %cst_27 = arith.constant dense<0xFF800000> : vector<16xf32>
    %73 = vector.multi_reduction <maximumf>, %72, %cst_27 [1] : vector<16x8xf32> to vector<16xf32>
    %74 = vector.shape_cast %73 : vector<16xf32> to vector<16x1xf32>
    %75 = vector.broadcast %74 : vector<16x1xf32> to vector<16x8xf32>
    %76 = arith.subf %72, %75 : vector<16x8xf32>
    %77 = math.exp %76 : vector<16x8xf32>
    %cst_28 = arith.constant dense<0.000000e+00> : vector<16xf32>
    %78 = vector.multi_reduction <add>, %77, %cst_28 [1] : vector<16x8xf32> to vector<16xf32>
    %79 = vector.shape_cast %78 : vector<16xf32> to vector<16x1xf32>
    %80 = tpu.reciprocal %79 {approx = true} : vector<16x1xf32> -> vector<16x1xf32>
    %81 = vector.broadcast %80 : vector<16x1xf32> to vector<16x8xf32>
    %82 = arith.mulf %77, %81 : vector<16x8xf32>
    %83 = arith.truncf %82 : vector<16x8xf32> to vector<16x8xbf16>
    %84 = vector.extract_strided_slice %13 {offsets = [0, 24], sizes = [8, 8], strides = [1, 1]} : vector<8x32xbf16> to vector<8x8xbf16>
    %cst_29 = arith.constant dense<0.000000e+00> : vector<16x8xf32>
    %85 = tpu.matmul %83, %84, %cst_29 {dimension_numbers = #tpu.dot_dimension_numbers<[1], [0], [0], [1], [0, 0, 1, 1], [], []>} : vector<16x8xbf16>, vector<8x8xbf16>, vector<16x8xf32> -> vector<16x8xf32>
    %86 = tpu.concatenate %34, %51, %68, %85 in 1 : vector<16x8xf32>, vector<16x8xf32>, vector<16x8xf32>, vector<16x8xf32> -> vector<16x32xf32>
    %87 = arith.truncf %86 : vector<16x32xf32> to vector<16x32xbf16>
    %c0_30 = arith.constant 0 : index
    %c0_31 = arith.constant 0 : index
    %88 = vector.load %arg11[%c0_30, %c0_31] : memref<32x32xbf16, #tpu.memory_space<vmem>>, vector<32x32xbf16>
    %cst_32 = arith.constant dense<0.000000e+00> : vector<16x32xf32>
    %89 = tpu.matmul %87, %88, %cst_32 {dimension_numbers = #tpu.dot_dimension_numbers<[1], [0], [0], [1], [0, 0, 1, 1], [], []>} : vector<16x32xbf16>, vector<32x32xbf16>, vector<16x32xf32> -> vector<16x32xf32>
    %c0_33 = arith.constant 0 : index
    %c0_34 = arith.constant 0 : index
    %90 = vector.load %arg12[%c0_33, %c0_34] : memref<1x32xf32, #tpu.memory_space<vmem>>, vector<1x32xf32>
    %91 = vector.broadcast %90 : vector<1x32xf32> to vector<16x32xf32>
    %92 = arith.addf %89, %91 : vector<16x32xf32>
    %93 = arith.addf %92, %4 : vector<16x32xf32>
    %c0_35 = arith.constant 0 : index
    %c0_36 = arith.constant 0 : index
    %94 = vector.load %arg13[%c0_35, %c0_36] : memref<1x32xf32, #tpu.memory_space<vmem>>, vector<1x32xf32>
    %c0_37 = arith.constant 0 : index
    %c0_38 = arith.constant 0 : index
    %95 = vector.load %arg14[%c0_37, %c0_38] : memref<1x32xf32, #tpu.memory_space<vmem>>, vector<1x32xf32>
    %cst_39 = arith.constant dense<0.000000e+00> : vector<16xf32>
    %96 = vector.multi_reduction <add>, %93, %cst_39 [1] : vector<16x32xf32> to vector<16xf32>
    %97 = vector.shape_cast %96 : vector<16xf32> to vector<16x1xf32>
    %cst_40 = arith.constant 3.200000e+01 : f32
    %98 = vector.broadcast %cst_40 : f32 to vector<16x1xf32>
    %99 = arith.divf %97, %98 : vector<16x1xf32>
    %100 = vector.broadcast %99 : vector<16x1xf32> to vector<16x32xf32>
    %101 = arith.subf %93, %100 : vector<16x32xf32>
    %102 = arith.mulf %101, %101 : vector<16x32xf32>
    %cst_41 = arith.constant dense<0.000000e+00> : vector<16xf32>
    %103 = vector.multi_reduction <add>, %102, %cst_41 [1] : vector<16x32xf32> to vector<16xf32>
    %104 = vector.shape_cast %103 : vector<16xf32> to vector<16x1xf32>
    %cst_42 = arith.constant 3.200000e+01 : f32
    %105 = vector.broadcast %cst_42 : f32 to vector<16x1xf32>
    %106 = arith.divf %104, %105 : vector<16x1xf32>
    %cst_43 = arith.constant 9.99999996E-13 : f32
    %107 = vector.broadcast %cst_43 : f32 to vector<16x1xf32>
    %108 = arith.addf %106, %107 : vector<16x1xf32>
    %109 = math.rsqrt %108 : vector<16x1xf32>
    %110 = vector.broadcast %109 : vector<16x1xf32> to vector<16x32xf32>
    %111 = arith.mulf %101, %110 : vector<16x32xf32>
    %112 = vector.broadcast %94 : vector<1x32xf32> to vector<16x32xf32>
    %113 = arith.mulf %111, %112 : vector<16x32xf32>
    %114 = vector.broadcast %95 : vector<1x32xf32> to vector<16x32xf32>
    %115 = arith.addf %113, %114 : vector<16x32xf32>
    %c0_44 = arith.constant 0 : index
    %c0_45 = arith.constant 0 : index
    %c0_46 = arith.constant 0 : index
    %116 = vector.load %arg15[%c0_44, %c0_45, %c0_46] : memref<1x16x32xf32, #tpu.memory_space<vmem>>, vector<1x16x32xf32>
    %117 = vector.shape_cast %116 : vector<1x16x32xf32> to vector<16x32xf32>
    %118 = vector.shape_cast %115 : vector<16x32xf32> to vector<1x16x32xf32>
    tpu.vector_store %arg15[%c0_44, %c0_45, %c0_46], %118 {strides = array<i32>} : memref<1x16x32xf32, #tpu.memory_space<vmem>>, vector<1x16x32xf32>,
    return
  }
  func.func @transform_0(%arg0: i32, %arg1: i32) -> (i32, i32, i32) {
    %c0_i32 = arith.constant 0 : i32
    %c0_i32_0 = arith.constant 0 : i32
    return %arg0, %arg1, %c0_i32 : i32, i32, i32
  }
  func.func @transform_1(%arg0: i32, %arg1: i32) -> (i32, i32, i32) {
    %c0_i32 = arith.constant 0 : i32
    %c0_i32_0 = arith.constant 0 : i32
    %c0_i32_1 = arith.constant 0 : i32
    return %arg0, %c0_i32, %c0_i32_0 : i32, i32, i32
  }
  func.func @transform_2(%arg0: i32, %arg1: i32) -> (i32, i32, i32) {
    %c0_i32 = arith.constant 0 : i32
    %c0_i32_0 = arith.constant 0 : i32
    %c0_i32_1 = arith.constant 0 : i32
    return %arg0, %c0_i32, %c0_i32_0 : i32, i32, i32
  }
  func.func @transform_3(%arg0: i32, %arg1: i32) -> (i32, i32) {
    %c0_i32 = arith.constant 0 : i32
    %c0_i32_0 = arith.constant 0 : i32
    %c0_i32_1 = arith.constant 0 : i32
    return %c0_i32, %c0_i32_0 : i32, i32
  }
  func.func @transform_4(%arg0: i32, %arg1: i32) -> (i32, i32) {
    %c0_i32 = arith.constant 0 : i32
    %c0_i32_0 = arith.constant 0 : i32
    %c0_i32_1 = arith.constant 0 : i32
    return %c0_i32, %c0_i32_0 : i32, i32
  }
  func.func @transform_5(%arg0: i32, %arg1: i32) -> (i32, i32) {
    %c0_i32 = arith.constant 0 : i32
    %c0_i32_0 = arith.constant 0 : i32
    %c0_i32_1 = arith.constant 0 : i32
    return %c0_i32, %c0_i32_0 : i32, i32
  }
  func.func @transform_6(%arg0: i32, %arg1: i32) -> (i32, i32) {
    %c0_i32 = arith.constant 0 : i32
    %c0_i32_0 = arith.constant 0 : i32
    %c0_i32_1 = arith.constant 0 : i32
    return %c0_i32, %c0_i32_0 : i32, i32
  }
  func.func @transform_7(%arg0: i32, %arg1: i32) -> (i32, i32) {
    %c0_i32 = arith.constant 0 : i32
    %c0_i32_0 = arith.constant 0 : i32
    %c0_i32_1 = arith.constant 0 : i32
    return %c0_i32, %c0_i32_0 : i32, i32
  }
  func.func @transform_8(%arg0: i32, %arg1: i32) -> (i32, i32) {
    %c0_i32 = arith.constant 0 : i32
    %c0_i32_0 = arith.constant 0 : i32
    %c0_i32_1 = arith.constant 0 : i32
    return %c0_i32, %c0_i32_0 : i32, i32
  }
  func.func @transform_9(%arg0: i32, %arg1: i32) -> (i32, i32) {
    %c0_i32 = arith.constant 0 : i32
    %c0_i32_0 = arith.constant 0 : i32
    %c0_i32_1 = arith.constant 0 : i32
    return %c0_i32, %c0_i32_0 : i32, i32
  }
  func.func @transform_10(%arg0: i32, %arg1: i32) -> (i32, i32) {
    %c0_i32 = arith.constant 0 : i32
    %c0_i32_0 = arith.constant 0 : i32
    %c0_i32_1 = arith.constant 0 : i32
    return %c0_i32, %c0_i32_0 : i32, i32
  }
  func.func @transform_11(%arg0: i32, %arg1: i32) -> (i32, i32) {
    %c0_i32 = arith.constant 0 : i32
    %c0_i32_0 = arith.constant 0 : i32
    %c0_i32_1 = arith.constant 0 : i32
    return %c0_i32, %c0_i32_0 : i32, i32
  }
  func.func @transform_12(%arg0: i32, %arg1: i32) -> (i32, i32) {
    %c0_i32 = arith.constant 0 : i32
    %c0_i32_0 = arith.constant 0 : i32
    %c0_i32_1 = arith.constant 0 : i32
    return %c0_i32, %c0_i32_0 : i32, i32
  }
  func.func @transform_13(%arg0: i32, %arg1: i32) -> (i32, i32, i32) {
    %c0_i32 = arith.constant 0 : i32
    %c0_i32_0 = arith.constant 0 : i32
    return %arg0, %arg1, %c0_i32 : i32, i32, i32
  }
}

module attributes {stable_mosaic.version = 11 : i64} {
  func.func @_att_block_kernel(%arg0: i32, %arg1: i32, %arg2: memref<1x16x32xf32, #tpu.memory_space<vmem>>, %arg3: memref<1x16x32xf32, #tpu.memory_space<vmem>>, %arg4: memref<1x1x16xf32, #tpu.memory_space<vmem>>, %arg5: memref<32x32xbf16, #tpu.memory_space<vmem>>, %arg6: memref<1x32xf32, #tpu.memory_space<vmem>>, %arg7: memref<32x32xbf16, #tpu.memory_space<vmem>>, %arg8: memref<1x32xf32, #tpu.memory_space<vmem>>, %arg9: memref<32x32xbf16, #tpu.memory_space<vmem>>, %arg10: memref<1x32xf32, #tpu.memory_space<vmem>>, %arg11: memref<32x32xbf16, #tpu.memory_space<vmem>>, %arg12: memref<1x32xf32, #tpu.memory_space<vmem>>, %arg13: memref<1x32xf32, #tpu.memory_space<vmem>>, %arg14: memref<1x32xf32, #tpu.memory_space<vmem>>, %arg15: memref<1x16x32xf32, #tpu.memory_space<vmem>>, %arg16: memref<32x16xbf16, #tpu.memory_space<vmem>>, %arg17: memref<16x32xbf16, #tpu.memory_space<vmem>>) attributes {dimension_semantics = [#tpu.dimension_semantics<parallel>, #tpu.dimension_semantics<arbitrary>], iteration_bounds = array<i64: 2, 1>, scalar_prefetch = 0 : i64, scratch_operands = 2 : i64, tpu.core_type = #tpu.core_type<tc>, window_params = [{transform_indices = @transform_0, window_bounds = array<i64: 1, 16, 32>}, {transform_indices = @transform_1, window_bounds = array<i64: 1, 16, 32>}, {transform_indices = @transform_2, window_bounds = array<i64: 1, 1, 16>}, {pipeline_mode = #tpu.pipeline_mode<synchronous>, transform_indices = @transform_3, window_bounds = array<i64: 32, 32>}, {pipeline_mode = #tpu.pipeline_mode<synchronous>, transform_indices = @transform_4, window_bounds = array<i64: 1, 32>}, {pipeline_mode = #tpu.pipeline_mode<synchronous>, transform_indices = @transform_5, window_bounds = array<i64: 32, 32>}, {pipeline_mode = #tpu.pipeline_mode<synchronous>, transform_indices = @transform_6, window_bounds = array<i64: 1, 32>}, {pipeline_mode = #tpu.pipeline_mode<synchronous>, transform_indices = @transform_7, window_bounds = array<i64: 32, 32>}, {pipeline_mode = #tpu.pipeline_mode<synchronous>, transform_indices = @transform_8, window_bounds = array<i64: 1, 32>}, {pipeline_mode = #tpu.pipeline_mode<synchronous>, transform_indices = @transform_9, window_bounds = array<i64: 32, 32>}, {pipeline_mode = #tpu.pipeline_mode<synchronous>, transform_indices = @transform_10, window_bounds = array<i64: 1, 32>}, {pipeline_mode = #tpu.pipeline_mode<synchronous>, transform_indices = @transform_11, window_bounds = array<i64: 1, 32>}, {pipeline_mode = #tpu.pipeline_mode<synchronous>, transform_indices = @transform_12, window_bounds = array<i64: 1, 32>}, {transform_indices = @transform_13, window_bounds = array<i64: 1, 16, 32>}]} {
    %c0_i32 = arith.constant 0 : i32
    %0 = arith.cmpi eq, %arg1, %c0_i32 : i32
    %1 = arith.extui %0 : i1 to i32
    %c0_i32_0 = arith.constant 0 : i32
    %2 = arith.cmpi ne, %1, %c0_i32_0 : i32
    scf.if %2 {
      %c0_47 = arith.constant 0 : index
      %c0_48 = arith.constant 0 : index
      %c0_49 = arith.constant 0 : index
      %119 = vector.load %arg3[%c0_47, %c0_48, %c0_49] : memref<1x16x32xf32, #tpu.memory_space<vmem>>, vector<1x16x32xf32>
      %120 = vector.shape_cast %119 : vector<1x16x32xf32> to vector<16x32xf32>
      %121 = arith.truncf %120 : vector<16x32xf32> to vector<16x32xbf16>
      %c0_50 = arith.constant 0 : index
      %c0_51 = arith.constant 0 : index
      %122 = vector.load %arg7[%c0_50, %c0_51] : memref<32x32xbf16, #tpu.memory_space<vmem>>, vector<32x32xbf16>
      %cst_52 = arith.constant dense<0.000000e+00> : vector<16x32xf32>
      %123 = tpu.matmul %121, %122, %cst_52 {dimension_numbers = #tpu.dot_dimension_numbers<[1], [0], [0], [1], [0, 0, 1, 1], [], []>} : vector<16x32xbf16>, vector<32x32xbf16>, vector<16x32xf32> -> vector<16x32xf32>
      %c0_53 = arith.constant 0 : index
      %c0_54 = arith.constant 0 : index
      %124 = vector.load %arg8[%c0_53, %c0_54] : memref<1x32xf32, #tpu.memory_space<vmem>>, vector<1x32xf32>
      %125 = vector.broadcast %124 : vector<1x32xf32> to vector<16x32xf32>
      %126 = arith.addf %123, %125 : vector<16x32xf32>
      %c0_55 = arith.constant 0 : index
      %c0_56 = arith.constant 0 : index
      %127 = vector.load %arg9[%c0_55, %c0_56] : memref<32x32xbf16, #tpu.memory_space<vmem>>, vector<32x32xbf16>
      %cst_57 = arith.constant dense<0.000000e+00> : vector<16x32xf32>
      %128 = tpu.matmul %121, %127, %cst_57 {dimension_numbers = #tpu.dot_dimension_numbers<[1], [0], [0], [1], [0, 0, 1, 1], [], []>} : vector<16x32xbf16>, vector<32x32xbf16>, vector<16x32xf32> -> vector<16x32xf32>
      %c0_58 = arith.constant 0 : index
      %c0_59 = arith.constant 0 : index
      %129 = vector.load %arg10[%c0_58, %c0_59] : memref<1x32xf32, #tpu.memory_space<vmem>>, vector<1x32xf32>
      %130 = vector.broadcast %129 : vector<1x32xf32> to vector<16x32xf32>
      %131 = arith.addf %128, %130 : vector<16x32xf32>
      %132 = tpu.transpose %126, [1, 0] : vector<16x32xf32> -> vector<32x16xf32>
      %133 = arith.truncf %132 : vector<32x16xf32> to vector<32x16xbf16>
      %c0_60 = arith.constant 0 : index
      %c0_61 = arith.constant 0 : index
      %134 = vector.load %arg16[%c0_60, %c0_61] : memref<32x16xbf16, #tpu.memory_space<vmem>>, vector<32x16xbf16>
      tpu.vector_store %arg16[%c0_60, %c0_61], %133 {strides = array<i32>} : memref<32x16xbf16, #tpu.memory_space<vmem>>, vector<32x16xbf16>,
      %135 = arith.truncf %131 : vector<16x32xf32> to vector<16x32xbf16>
      %c0_62 = arith.constant 0 : index
      %c0_63 = arith.constant 0 : index
      %136 = vector.load %arg17[%c0_62, %c0_63] : memref<16x32xbf16, #tpu.memory_space<vmem>>, vector<16x32xbf16>
      tpu.vector_store %arg17[%c0_62, %c0_63], %135 {strides = array<i32>} : memref<16x32xbf16, #tpu.memory_space<vmem>>, vector<16x32xbf16>,
    } else {
    }
    %c0 = arith.constant 0 : index
    %c0_1 = arith.constant 0 : index
    %c0_2 = arith.constant 0 : index
    %3 = vector.load %arg2[%c0, %c0_1, %c0_2] : memref<1x16x32xf32, #tpu.memory_space<vmem>>, vector<1x16x32xf32>
    %4 = vector.shape_cast %3 : vector<1x16x32xf32> to vector<16x32xf32>
    %5 = arith.truncf %4 : vector<16x32xf32> to vector<16x32xbf16>
    %c0_3 = arith.constant 0 : index
    %c0_4 = arith.constant 0 : index
    %6 = vector.load %arg5[%c0_3, %c0_4] : memref<32x32xbf16, #tpu.memory_space<vmem>>, vector<32x32xbf16>
    %cst = arith.constant dense<0.000000e+00> : vector<16x32xf32>
    %7 = tpu.matmul %5, %6, %cst {dimension_numbers = #tpu.dot_dimension_numbers<[1], [0], [0], [1], [0, 0, 1, 1], [], []>} : vector<16x32xbf16>, vector<32x32xbf16>, vector<16x32xf32> -> vector<16x32xf32>
    %c0_5 = arith.constant 0 : index
    %c0_6 = arith.constant 0 : index
    %8 = vector.load %arg6[%c0_5, %c0_6] : memref<1x32xf32, #tpu.memory_space<vmem>>, vector<1x32xf32>
    %9 = vector.broadcast %8 : vector<1x32xf32> to vector<16x32xf32>
    %10 = arith.addf %7, %9 : vector<16x32xf32>
    %11 = arith.truncf %10 : vector<16x32xf32> to vector<16x32xbf16>
    %c0_7 = arith.constant 0 : index
    %c0_8 = arith.constant 0 : index
    %12 = vector.load %arg16[%c0_7, %c0_8] : memref<32x16xbf16, #tpu.memory_space<vmem>>, vector<32x16xbf16>
    %c0_9 = arith.constant 0 : index
    %c0_10 = arith.constant 0 : index
    %13 = vector.load %arg17[%c0_9, %c0_10] : memref<16x32xbf16, #tpu.memory_space<vmem>>, vector<16x32xbf16>
    %c0_11 = arith.constant 0 : index
    %c0_12 = arith.constant 0 : index
    %c0_13 = arith.constant 0 : index
    %14 = vector.load %arg4[%c0_11, %c0_12, %c0_13] : memref<1x1x16xf32, #tpu.memory_space<vmem>>, vector<1x1x16xf32>
    %15 = vector.shape_cast %14 : vector<1x1x16xf32> to vector<1x16xf32>
    %16 = vector.shape_cast %15 : vector<1x16xf32> to vector<1x16xf32>
    %17 = vector.broadcast %16 : vector<1x16xf32> to vector<16x16xf32>
    %18 = vector.extract_strided_slice %11 {offsets = [0, 0], sizes = [16, 8], strides = [1, 1]} : vector<16x32xbf16> to vector<16x8xbf16>
    %19 = vector.extract_strided_slice %12 {offsets = [0, 0], sizes = [8, 16], strides = [1, 1]} : vector<32x16xbf16> to vector<8x16xbf16>
    %cst_14 = arith.constant dense<0.000000e+00> : vector<16x16xf32>
    %20 = tpu.matmul %18, %19, %cst_14 {dimension_numbers = #tpu.dot_dimension_numbers<[1], [0], [0], [1], [0, 0, 1, 1], [], []>} : vector<16x8xbf16>, vector<8x16xbf16>, vector<16x16xf32> -> vector<16x16xf32>
    %21 = arith.addf %20, %17 : vector<16x16xf32>
    %cst_15 = arith.constant dense<0xFF800000> : vector<16xf32>
    %22 = vector.multi_reduction <maximumf>, %21, %cst_15 [1] : vector<16x16xf32> to vector<16xf32>
    %23 = vector.shape_cast %22 : vector<16xf32> to vector<16x1xf32>
    %24 = vector.broadcast %23 : vector<16x1xf32> to vector<16x16xf32>
    %25 = arith.subf %21, %24 : vector<16x16xf32>
    %26 = math.exp %25 : vector<16x16xf32>
    %cst_16 = arith.constant dense<0.000000e+00> : vector<16xf32>
    %27 = vector.multi_reduction <add>, %26, %cst_16 [1] : vector<16x16xf32> to vector<16xf32>
    %28 = vector.shape_cast %27 : vector<16xf32> to vector<16x1xf32>
    %29 = tpu.reciprocal %28 {approx = true} : vector<16x1xf32> -> vector<16x1xf32>
    %30 = vector.broadcast %29 : vector<16x1xf32> to vector<16x16xf32>
    %31 = arith.mulf %26, %30 : vector<16x16xf32>
    %32 = arith.truncf %31 : vector<16x16xf32> to vector<16x16xbf16>
    %33 = vector.extract_strided_slice %13 {offsets = [0, 0], sizes = [16, 8], strides = [1, 1]} : vector<16x32xbf16> to vector<16x8xbf16>
    %cst_17 = arith.constant dense<0.000000e+00> : vector<16x8xf32>
    %34 = tpu.matmul %32, %33, %cst_17 {dimension_numbers = #tpu.dot_dimension_numbers<[1], [0], [0], [1], [0, 0, 1, 1], [], []>} : vector<16x16xbf16>, vector<16x8xbf16>, vector<16x8xf32> -> vector<16x8xf32>
    %35 = vector.extract_strided_slice %11 {offsets = [0, 8], sizes = [16, 8], strides = [1, 1]} : vector<16x32xbf16> to vector<16x8xbf16>
    %36 = vector.extract_strided_slice %12 {offsets = [8, 0], sizes = [8, 16], strides = [1, 1]} : vector<32x16xbf16> to vector<8x16xbf16>
    %cst_18 = arith.constant dense<0.000000e+00> : vector<16x16xf32>
    %37 = tpu.matmul %35, %36, %cst_18 {dimension_numbers = #tpu.dot_dimension_numbers<[1], [0], [0], [1], [0, 0, 1, 1], [], []>} : vector<16x8xbf16>, vector<8x16xbf16>, vector<16x16xf32> -> vector<16x16xf32>
    %38 = arith.addf %37, %17 : vector<16x16xf32>
    %cst_19 = arith.constant dense<0xFF800000> : vector<16xf32>
    %39 = vector.multi_reduction <maximumf>, %38, %cst_19 [1] : vector<16x16xf32> to vector<16xf32>
    %40 = vector.shape_cast %39 : vector<16xf32> to vector<16x1xf32>
    %41 = vector.broadcast %40 : vector<16x1xf32> to vector<16x16xf32>
    %42 = arith.subf %38, %41 : vector<16x16xf32>
    %43 = math.exp %42 : vector<16x16xf32>
    %cst_20 = arith.constant dense<0.000000e+00> : vector<16xf32>
    %44 = vector.multi_reduction <add>, %43, %cst_20 [1] : vector<16x16xf32> to vector<16xf32>
    %45 = vector.shape_cast %44 : vector<16xf32> to vector<16x1xf32>
    %46 = tpu.reciprocal %45 {approx = true} : vector<16x1xf32> -> vector<16x1xf32>
    %47 = vector.broadcast %46 : vector<16x1xf32> to vector<16x16xf32>
    %48 = arith.mulf %43, %47 : vector<16x16xf32>
    %49 = arith.truncf %48 : vector<16x16xf32> to vector<16x16xbf16>
    %50 = vector.extract_strided_slice %13 {offsets = [0, 8], sizes = [16, 8], strides = [1, 1]} : vector<16x32xbf16> to vector<16x8xbf16>
    %cst_21 = arith.constant dense<0.000000e+00> : vector<16x8xf32>
    %51 = tpu.matmul %49, %50, %cst_21 {dimension_numbers = #tpu.dot_dimension_numbers<[1], [0], [0], [1], [0, 0, 1, 1], [], []>} : vector<16x16xbf16>, vector<16x8xbf16>, vector<16x8xf32> -> vector<16x8xf32>
    %52 = vector.extract_strided_slice %11 {offsets = [0, 16], sizes = [16, 8], strides = [1, 1]} : vector<16x32xbf16> to vector<16x8xbf16>
    %53 = vector.extract_strided_slice %12 {offsets = [16, 0], sizes = [8, 16], strides = [1, 1]} : vector<32x16xbf16> to vector<8x16xbf16>
    %cst_22 = arith.constant dense<0.000000e+00> : vector<16x16xf32>
    %54 = tpu.matmul %52, %53, %cst_22 {dimension_numbers = #tpu.dot_dimension_numbers<[1], [0], [0], [1], [0, 0, 1, 1], [], []>} : vector<16x8xbf16>, vector<8x16xbf16>, vector<16x16xf32> -> vector<16x16xf32>
    %55 = arith.addf %54, %17 : vector<16x16xf32>
    %cst_23 = arith.constant dense<0xFF800000> : vector<16xf32>
    %56 = vector.multi_reduction <maximumf>, %55, %cst_23 [1] : vector<16x16xf32> to vector<16xf32>
    %57 = vector.shape_cast %56 : vector<16xf32> to vector<16x1xf32>
    %58 = vector.broadcast %57 : vector<16x1xf32> to vector<16x16xf32>
    %59 = arith.subf %55, %58 : vector<16x16xf32>
    %60 = math.exp %59 : vector<16x16xf32>
    %cst_24 = arith.constant dense<0.000000e+00> : vector<16xf32>
    %61 = vector.multi_reduction <add>, %60, %cst_24 [1] : vector<16x16xf32> to vector<16xf32>
    %62 = vector.shape_cast %61 : vector<16xf32> to vector<16x1xf32>
    %63 = tpu.reciprocal %62 {approx = true} : vector<16x1xf32> -> vector<16x1xf32>
    %64 = vector.broadcast %63 : vector<16x1xf32> to vector<16x16xf32>
    %65 = arith.mulf %60, %64 : vector<16x16xf32>
    %66 = arith.truncf %65 : vector<16x16xf32> to vector<16x16xbf16>
    %67 = vector.extract_strided_slice %13 {offsets = [0, 16], sizes = [16, 8], strides = [1, 1]} : vector<16x32xbf16> to vector<16x8xbf16>
    %cst_25 = arith.constant dense<0.000000e+00> : vector<16x8xf32>
    %68 = tpu.matmul %66, %67, %cst_25 {dimension_numbers = #tpu.dot_dimension_numbers<[1], [0], [0], [1], [0, 0, 1, 1], [], []>} : vector<16x16xbf16>, vector<16x8xbf16>, vector<16x8xf32> -> vector<16x8xf32>
    %69 = vector.extract_strided_slice %11 {offsets = [0, 24], sizes = [16, 8], strides = [1, 1]} : vector<16x32xbf16> to vector<16x8xbf16>
    %70 = vector.extract_strided_slice %12 {offsets = [24, 0], sizes = [8, 16], strides = [1, 1]} : vector<32x16xbf16> to vector<8x16xbf16>
    %cst_26 = arith.constant dense<0.000000e+00> : vector<16x16xf32>
    %71 = tpu.matmul %69, %70, %cst_26 {dimension_numbers = #tpu.dot_dimension_numbers<[1], [0], [0], [1], [0, 0, 1, 1], [], []>} : vector<16x8xbf16>, vector<8x16xbf16>, vector<16x16xf32> -> vector<16x16xf32>
    %72 = arith.addf %71, %17 : vector<16x16xf32>
    %cst_27 = arith.constant dense<0xFF800000> : vector<16xf32>
    %73 = vector.multi_reduction <maximumf>, %72, %cst_27 [1] : vector<16x16xf32> to vector<16xf32>
    %74 = vector.shape_cast %73 : vector<16xf32> to vector<16x1xf32>
    %75 = vector.broadcast %74 : vector<16x1xf32> to vector<16x16xf32>
    %76 = arith.subf %72, %75 : vector<16x16xf32>
    %77 = math.exp %76 : vector<16x16xf32>
    %cst_28 = arith.constant dense<0.000000e+00> : vector<16xf32>
    %78 = vector.multi_reduction <add>, %77, %cst_28 [1] : vector<16x16xf32> to vector<16xf32>
    %79 = vector.shape_cast %78 : vector<16xf32> to vector<16x1xf32>
    %80 = tpu.reciprocal %79 {approx = true} : vector<16x1xf32> -> vector<16x1xf32>
    %81 = vector.broadcast %80 : vector<16x1xf32> to vector<16x16xf32>
    %82 = arith.mulf %77, %81 : vector<16x16xf32>
    %83 = arith.truncf %82 : vector<16x16xf32> to vector<16x16xbf16>
    %84 = vector.extract_strided_slice %13 {offsets = [0, 24], sizes = [16, 8], strides = [1, 1]} : vector<16x32xbf16> to vector<16x8xbf16>
    %cst_29 = arith.constant dense<0.000000e+00> : vector<16x8xf32>
    %85 = tpu.matmul %83, %84, %cst_29 {dimension_numbers = #tpu.dot_dimension_numbers<[1], [0], [0], [1], [0, 0, 1, 1], [], []>} : vector<16x16xbf16>, vector<16x8xbf16>, vector<16x8xf32> -> vector<16x8xf32>
    %86 = tpu.concatenate %34, %51, %68, %85 in 1 : vector<16x8xf32>, vector<16x8xf32>, vector<16x8xf32>, vector<16x8xf32> -> vector<16x32xf32>
    %87 = arith.truncf %86 : vector<16x32xf32> to vector<16x32xbf16>
    %c0_30 = arith.constant 0 : index
    %c0_31 = arith.constant 0 : index
    %88 = vector.load %arg11[%c0_30, %c0_31] : memref<32x32xbf16, #tpu.memory_space<vmem>>, vector<32x32xbf16>
    %cst_32 = arith.constant dense<0.000000e+00> : vector<16x32xf32>
    %89 = tpu.matmul %87, %88, %cst_32 {dimension_numbers = #tpu.dot_dimension_numbers<[1], [0], [0], [1], [0, 0, 1, 1], [], []>} : vector<16x32xbf16>, vector<32x32xbf16>, vector<16x32xf32> -> vector<16x32xf32>
    %c0_33 = arith.constant 0 : index
    %c0_34 = arith.constant 0 : index
    %90 = vector.load %arg12[%c0_33, %c0_34] : memref<1x32xf32, #tpu.memory_space<vmem>>, vector<1x32xf32>
    %91 = vector.broadcast %90 : vector<1x32xf32> to vector<16x32xf32>
    %92 = arith.addf %89, %91 : vector<16x32xf32>
    %93 = arith.addf %92, %4 : vector<16x32xf32>
    %c0_35 = arith.constant 0 : index
    %c0_36 = arith.constant 0 : index
    %94 = vector.load %arg13[%c0_35, %c0_36] : memref<1x32xf32, #tpu.memory_space<vmem>>, vector<1x32xf32>
    %c0_37 = arith.constant 0 : index
    %c0_38 = arith.constant 0 : index
    %95 = vector.load %arg14[%c0_37, %c0_38] : memref<1x32xf32, #tpu.memory_space<vmem>>, vector<1x32xf32>
    %cst_39 = arith.constant dense<0.000000e+00> : vector<16xf32>
    %96 = vector.multi_reduction <add>, %93, %cst_39 [1] : vector<16x32xf32> to vector<16xf32>
    %97 = vector.shape_cast %96 : vector<16xf32> to vector<16x1xf32>
    %cst_40 = arith.constant 3.200000e+01 : f32
    %98 = vector.broadcast %cst_40 : f32 to vector<16x1xf32>
    %99 = arith.divf %97, %98 : vector<16x1xf32>
    %100 = vector.broadcast %99 : vector<16x1xf32> to vector<16x32xf32>
    %101 = arith.subf %93, %100 : vector<16x32xf32>
    %102 = arith.mulf %101, %101 : vector<16x32xf32>
    %cst_41 = arith.constant dense<0.000000e+00> : vector<16xf32>
    %103 = vector.multi_reduction <add>, %102, %cst_41 [1] : vector<16x32xf32> to vector<16xf32>
    %104 = vector.shape_cast %103 : vector<16xf32> to vector<16x1xf32>
    %cst_42 = arith.constant 3.200000e+01 : f32
    %105 = vector.broadcast %cst_42 : f32 to vector<16x1xf32>
    %106 = arith.divf %104, %105 : vector<16x1xf32>
    %cst_43 = arith.constant 9.99999996E-13 : f32
    %107 = vector.broadcast %cst_43 : f32 to vector<16x1xf32>
    %108 = arith.addf %106, %107 : vector<16x1xf32>
    %109 = math.rsqrt %108 : vector<16x1xf32>
    %110 = vector.broadcast %109 : vector<16x1xf32> to vector<16x32xf32>
    %111 = arith.mulf %101, %110 : vector<16x32xf32>
    %112 = vector.broadcast %94 : vector<1x32xf32> to vector<16x32xf32>
    %113 = arith.mulf %111, %112 : vector<16x32xf32>
    %114 = vector.broadcast %95 : vector<1x32xf32> to vector<16x32xf32>
    %115 = arith.addf %113, %114 : vector<16x32xf32>
    %c0_44 = arith.constant 0 : index
    %c0_45 = arith.constant 0 : index
    %c0_46 = arith.constant 0 : index
    %116 = vector.load %arg15[%c0_44, %c0_45, %c0_46] : memref<1x16x32xf32, #tpu.memory_space<vmem>>, vector<1x16x32xf32>
    %117 = vector.shape_cast %116 : vector<1x16x32xf32> to vector<16x32xf32>
    %118 = vector.shape_cast %115 : vector<16x32xf32> to vector<1x16x32xf32>
    tpu.vector_store %arg15[%c0_44, %c0_45, %c0_46], %118 {strides = array<i32>} : memref<1x16x32xf32, #tpu.memory_space<vmem>>, vector<1x16x32xf32>,
    return
  }
  func.func @transform_0(%arg0: i32, %arg1: i32) -> (i32, i32, i32) {
    %c0_i32 = arith.constant 0 : i32
    %c0_i32_0 = arith.constant 0 : i32
    return %arg0, %arg1, %c0_i32 : i32, i32, i32
  }
  func.func @transform_1(%arg0: i32, %arg1: i32) -> (i32, i32, i32) {
    %c0_i32 = arith.constant 0 : i32
    %c0_i32_0 = arith.constant 0 : i32
    %c0_i32_1 = arith.constant 0 : i32
    return %arg0, %c0_i32, %c0_i32_0 : i32, i32, i32
  }
  func.func @transform_2(%arg0: i32, %arg1: i32) -> (i32, i32, i32) {
    %c0_i32 = arith.constant 0 : i32
    %c0_i32_0 = arith.constant 0 : i32
    %c0_i32_1 = arith.constant 0 : i32
    return %arg0, %c0_i32, %c0_i32_0 : i32, i32, i32
  }
  func.func @transform_3(%arg0: i32, %arg1: i32) -> (i32, i32) {
    %c0_i32 = arith.constant 0 : i32
    %c0_i32_0 = arith.constant 0 : i32
    %c0_i32_1 = arith.constant 0 : i32
    return %c0_i32, %c0_i32_0 : i32, i32
  }
  func.func @transform_4(%arg0: i32, %arg1: i32) -> (i32, i32) {
    %c0_i32 = arith.constant 0 : i32
    %c0_i32_0 = arith.constant 0 : i32
    %c0_i32_1 = arith.constant 0 : i32
    return %c0_i32, %c0_i32_0 : i32, i32
  }
  func.func @transform_5(%arg0: i32, %arg1: i32) -> (i32, i32) {
    %c0_i32 = arith.constant 0 : i32
    %c0_i32_0 = arith.constant 0 : i32
    %c0_i32_1 = arith.constant 0 : i32
    return %c0_i32, %c0_i32_0 : i32, i32
  }
  func.func @transform_6(%arg0: i32, %arg1: i32) -> (i32, i32) {
    %c0_i32 = arith.constant 0 : i32
    %c0_i32_0 = arith.constant 0 : i32
    %c0_i32_1 = arith.constant 0 : i32
    return %c0_i32, %c0_i32_0 : i32, i32
  }
  func.func @transform_7(%arg0: i32, %arg1: i32) -> (i32, i32) {
    %c0_i32 = arith.constant 0 : i32
    %c0_i32_0 = arith.constant 0 : i32
    %c0_i32_1 = arith.constant 0 : i32
    return %c0_i32, %c0_i32_0 : i32, i32
  }
  func.func @transform_8(%arg0: i32, %arg1: i32) -> (i32, i32) {
    %c0_i32 = arith.constant 0 : i32
    %c0_i32_0 = arith.constant 0 : i32
    %c0_i32_1 = arith.constant 0 : i32
    return %c0_i32, %c0_i32_0 : i32, i32
  }
  func.func @transform_9(%arg0: i32, %arg1: i32) -> (i32, i32) {
    %c0_i32 = arith.constant 0 : i32
    %c0_i32_0 = arith.constant 0 : i32
    %c0_i32_1 = arith.constant 0 : i32
    return %c0_i32, %c0_i32_0 : i32, i32
  }
  func.func @transform_10(%arg0: i32, %arg1: i32) -> (i32, i32) {
    %c0_i32 = arith.constant 0 : i32
    %c0_i32_0 = arith.constant 0 : i32
    %c0_i32_1 = arith.constant 0 : i32
    return %c0_i32, %c0_i32_0 : i32, i32
  }
  func.func @transform_11(%arg0: i32, %arg1: i32) -> (i32, i32) {
    %c0_i32 = arith.constant 0 : i32
    %c0_i32_0 = arith.constant 0 : i32
    %c0_i32_1 = arith.constant 0 : i32
    return %c0_i32, %c0_i32_0 : i32, i32
  }
  func.func @transform_12(%arg0: i32, %arg1: i32) -> (i32, i32) {
    %c0_i32 = arith.constant 0 : i32
    %c0_i32_0 = arith.constant 0 : i32
    %c0_i32_1 = arith.constant 0 : i32
    return %c0_i32, %c0_i32_0 : i32, i32
  }
  func.func @transform_13(%arg0: i32, %arg1: i32) -> (i32, i32, i32) {
    %c0_i32 = arith.constant 0 : i32
    %c0_i32_0 = arith.constant 0 : i32
    return %arg0, %arg1, %c0_i32 : i32, i32, i32
  }
}

module attributes {stable_mosaic.version = 11 : i64} {
  func.func @_ffn_kernel(%arg0: i32, %arg1: memref<32x32xf32, #tpu.memory_space<vmem>>, %arg2: memref<32x64xbf16, #tpu.memory_space<vmem>>, %arg3: memref<1x64xf32, #tpu.memory_space<vmem>>, %arg4: memref<64x32xbf16, #tpu.memory_space<vmem>>, %arg5: memref<1x32xf32, #tpu.memory_space<vmem>>, %arg6: memref<1x32xf32, #tpu.memory_space<vmem>>, %arg7: memref<1x32xf32, #tpu.memory_space<vmem>>, %arg8: memref<32x32xf32, #tpu.memory_space<vmem>>) attributes {dimension_semantics = [#tpu.dimension_semantics<parallel>], iteration_bounds = array<i64: 1>, scalar_prefetch = 0 : i64, scratch_operands = 0 : i64, tpu.core_type = #tpu.core_type<tc>, window_params = [{transform_indices = @transform_0, window_bounds = array<i64: 32, 32>}, {pipeline_mode = #tpu.pipeline_mode<synchronous>, transform_indices = @transform_1, window_bounds = array<i64: 32, 64>}, {pipeline_mode = #tpu.pipeline_mode<synchronous>, transform_indices = @transform_2, window_bounds = array<i64: 1, 64>}, {pipeline_mode = #tpu.pipeline_mode<synchronous>, transform_indices = @transform_3, window_bounds = array<i64: 64, 32>}, {pipeline_mode = #tpu.pipeline_mode<synchronous>, transform_indices = @transform_4, window_bounds = array<i64: 1, 32>}, {pipeline_mode = #tpu.pipeline_mode<synchronous>, transform_indices = @transform_5, window_bounds = array<i64: 1, 32>}, {pipeline_mode = #tpu.pipeline_mode<synchronous>, transform_indices = @transform_6, window_bounds = array<i64: 1, 32>}, {transform_indices = @transform_7, window_bounds = array<i64: 32, 32>}]} {
    %c0 = arith.constant 0 : index
    %c0_0 = arith.constant 0 : index
    %0 = vector.load %arg1[%c0, %c0_0] : memref<32x32xf32, #tpu.memory_space<vmem>>, vector<32x32xf32>
    %1 = arith.truncf %0 : vector<32x32xf32> to vector<32x32xbf16>
    %c0_1 = arith.constant 0 : index
    %c0_2 = arith.constant 0 : index
    %2 = vector.load %arg2[%c0_1, %c0_2] : memref<32x64xbf16, #tpu.memory_space<vmem>>, vector<32x64xbf16>
    %cst = arith.constant dense<0.000000e+00> : vector<32x64xf32>
    %3 = tpu.matmul %1, %2, %cst {dimension_numbers = #tpu.dot_dimension_numbers<[1], [0], [0], [1], [0, 0, 1, 1], [], []>} : vector<32x32xbf16>, vector<32x64xbf16>, vector<32x64xf32> -> vector<32x64xf32>
    %c0_3 = arith.constant 0 : index
    %c0_4 = arith.constant 0 : index
    %4 = vector.load %arg3[%c0_3, %c0_4] : memref<1x64xf32, #tpu.memory_space<vmem>>, vector<1x64xf32>
    %5 = vector.broadcast %4 : vector<1x64xf32> to vector<32x64xf32>
    %6 = arith.addf %3, %5 : vector<32x64xf32>
    %cst_5 = arith.constant 5.000000e-01 : f32
    %7 = vector.broadcast %cst_5 : f32 to vector<32x64xf32>
    %8 = arith.mulf %7, %6 : vector<32x64xf32>
    %cst_6 = arith.constant 4.471500e-02 : f32
    %9 = vector.broadcast %cst_6 : f32 to vector<32x64xf32>
    %10 = arith.mulf %9, %6 : vector<32x64xf32>
    %11 = arith.mulf %10, %6 : vector<32x64xf32>
    %12 = arith.mulf %11, %6 : vector<32x64xf32>
    %13 = arith.addf %6, %12 : vector<32x64xf32>
    %cst_7 = arith.constant 0.797884583 : f32
    %14 = vector.broadcast %cst_7 : f32 to vector<32x64xf32>
    %15 = arith.mulf %14, %13 : vector<32x64xf32>
    %16 = math.tanh %15 : vector<32x64xf32>
    %cst_8 = arith.constant 1.000000e+00 : f32
    %17 = vector.broadcast %cst_8 : f32 to vector<32x64xf32>
    %18 = arith.addf %17, %16 : vector<32x64xf32>
    %19 = arith.mulf %8, %18 : vector<32x64xf32>
    %20 = arith.truncf %19 : vector<32x64xf32> to vector<32x64xbf16>
    %c0_9 = arith.constant 0 : index
    %c0_10 = arith.constant 0 : index
    %21 = vector.load %arg4[%c0_9, %c0_10] : memref<64x32xbf16, #tpu.memory_space<vmem>>, vector<64x32xbf16>
    %cst_11 = arith.constant dense<0.000000e+00> : vector<32x32xf32>
    %22 = tpu.matmul %20, %21, %cst_11 {dimension_numbers = #tpu.dot_dimension_numbers<[1], [0], [0], [1], [0, 0, 1, 1], [], []>} : vector<32x64xbf16>, vector<64x32xbf16>, vector<32x32xf32> -> vector<32x32xf32>
    %c0_12 = arith.constant 0 : index
    %c0_13 = arith.constant 0 : index
    %23 = vector.load %arg5[%c0_12, %c0_13] : memref<1x32xf32, #tpu.memory_space<vmem>>, vector<1x32xf32>
    %24 = vector.broadcast %23 : vector<1x32xf32> to vector<32x32xf32>
    %25 = arith.addf %22, %24 : vector<32x32xf32>
    %26 = arith.addf %25, %0 : vector<32x32xf32>
    %c0_14 = arith.constant 0 : index
    %c0_15 = arith.constant 0 : index
    %27 = vector.load %arg6[%c0_14, %c0_15] : memref<1x32xf32, #tpu.memory_space<vmem>>, vector<1x32xf32>
    %c0_16 = arith.constant 0 : index
    %c0_17 = arith.constant 0 : index
    %28 = vector.load %arg7[%c0_16, %c0_17] : memref<1x32xf32, #tpu.memory_space<vmem>>, vector<1x32xf32>
    %cst_18 = arith.constant dense<0.000000e+00> : vector<32xf32>
    %29 = vector.multi_reduction <add>, %26, %cst_18 [1] : vector<32x32xf32> to vector<32xf32>
    %30 = vector.shape_cast %29 : vector<32xf32> to vector<32x1xf32>
    %cst_19 = arith.constant 3.200000e+01 : f32
    %31 = vector.broadcast %cst_19 : f32 to vector<32x1xf32>
    %32 = arith.divf %30, %31 : vector<32x1xf32>
    %33 = vector.broadcast %32 : vector<32x1xf32> to vector<32x32xf32>
    %34 = arith.subf %26, %33 : vector<32x32xf32>
    %35 = arith.mulf %34, %34 : vector<32x32xf32>
    %cst_20 = arith.constant dense<0.000000e+00> : vector<32xf32>
    %36 = vector.multi_reduction <add>, %35, %cst_20 [1] : vector<32x32xf32> to vector<32xf32>
    %37 = vector.shape_cast %36 : vector<32xf32> to vector<32x1xf32>
    %cst_21 = arith.constant 3.200000e+01 : f32
    %38 = vector.broadcast %cst_21 : f32 to vector<32x1xf32>
    %39 = arith.divf %37, %38 : vector<32x1xf32>
    %cst_22 = arith.constant 9.99999996E-13 : f32
    %40 = vector.broadcast %cst_22 : f32 to vector<32x1xf32>
    %41 = arith.addf %39, %40 : vector<32x1xf32>
    %42 = math.rsqrt %41 : vector<32x1xf32>
    %43 = vector.broadcast %42 : vector<32x1xf32> to vector<32x32xf32>
    %44 = arith.mulf %34, %43 : vector<32x32xf32>
    %45 = vector.broadcast %27 : vector<1x32xf32> to vector<32x32xf32>
    %46 = arith.mulf %44, %45 : vector<32x32xf32>
    %47 = vector.broadcast %28 : vector<1x32xf32> to vector<32x32xf32>
    %48 = arith.addf %46, %47 : vector<32x32xf32>
    %c0_23 = arith.constant 0 : index
    %c0_24 = arith.constant 0 : index
    %49 = vector.load %arg8[%c0_23, %c0_24] : memref<32x32xf32, #tpu.memory_space<vmem>>, vector<32x32xf32>
    tpu.vector_store %arg8[%c0_23, %c0_24], %48 {strides = array<i32>} : memref<32x32xf32, #tpu.memory_space<vmem>>, vector<32x32xf32>,
    return
  }
  func.func @transform_0(%arg0: i32) -> (i32, i32) {
    %c0_i32 = arith.constant 0 : i32
    %c0_i32_0 = arith.constant 0 : i32
    return %arg0, %c0_i32 : i32, i32
  }
  func.func @transform_1(%arg0: i32) -> (i32, i32) {
    %c0_i32 = arith.constant 0 : i32
    %c0_i32_0 = arith.constant 0 : i32
    %c0_i32_1 = arith.constant 0 : i32
    return %c0_i32, %c0_i32_0 : i32, i32
  }
  func.func @transform_2(%arg0: i32) -> (i32, i32) {
    %c0_i32 = arith.constant 0 : i32
    %c0_i32_0 = arith.constant 0 : i32
    %c0_i32_1 = arith.constant 0 : i32
    return %c0_i32, %c0_i32_0 : i32, i32
  }
  func.func @transform_3(%arg0: i32) -> (i32, i32) {
    %c0_i32 = arith.constant 0 : i32
    %c0_i32_0 = arith.constant 0 : i32
    %c0_i32_1 = arith.constant 0 : i32
    return %c0_i32, %c0_i32_0 : i32, i32
  }
  func.func @transform_4(%arg0: i32) -> (i32, i32) {
    %c0_i32 = arith.constant 0 : i32
    %c0_i32_0 = arith.constant 0 : i32
    %c0_i32_1 = arith.constant 0 : i32
    return %c0_i32, %c0_i32_0 : i32, i32
  }
  func.func @transform_5(%arg0: i32) -> (i32, i32) {
    %c0_i32 = arith.constant 0 : i32
    %c0_i32_0 = arith.constant 0 : i32
    %c0_i32_1 = arith.constant 0 : i32
    return %c0_i32, %c0_i32_0 : i32, i32
  }
  func.func @transform_6(%arg0: i32) -> (i32, i32) {
    %c0_i32 = arith.constant 0 : i32
    %c0_i32_0 = arith.constant 0 : i32
    %c0_i32_1 = arith.constant 0 : i32
    return %c0_i32, %c0_i32_0 : i32, i32
  }
  func.func @transform_7(%arg0: i32) -> (i32, i32) {
    %c0_i32 = arith.constant 0 : i32
    %c0_i32_0 = arith.constant 0 : i32
    return %arg0, %c0_i32 : i32, i32
  }
}

</mosaic_0001>

<bundles_post_ra>
// kernel: lxrt_x_layer.10
= control target key start
LH: loop header
LB: loop body
LE: loop exit
PB: predicated region body
PF: predicated region fallthrough
CT: control target
= control target key end

     0   :  { %s393_s0 = inlined_call_operand.vmem [shape: f32[16,32], index: 0, kind: input, shape index: {}]   ;;  %s394_s1 = inlined_call_operand.vmem [shape: bf16[32,64], index: 1, kind: input, shape index: {}]   ;;  %s395_s2 = inlined_call_operand.vmem [shape: f32[1,64], index: 2, kind: input, shape index: {}]   ;;  %s396_s3 = inlined_call_operand.vmem [shape: bf16[64,32], index: 3, kind: input, shape index: {}]   ;;  %s397_s4 = inlined_call_operand.vmem [shape: f32[1,32], index: 4, kind: input, shape index: {}]   ;;  %s398_s5 = inlined_call_operand.vmem [shape: f32[1,32], index: 5, kind: input, shape index: {}]   ;;  %s399_s6 = inlined_call_operand.vmem [shape: f32[1,32], index: 6, kind: input, shape index: {}]   ;;  %s400_s7 = inlined_call_operand.hbm [shape: f32[16,32], index: 7, kind: output, shape index: {}]  }
   0x1   :  { %v254_v0 = vld [vmem:[%s394_s1 + $0x8] sm:$0xff]  ;;  %v253_v1 = vld [vmem:[%s394_s1] sm:$0xff] }
   0x2   :  { %v28_v2 = vld [vmem:[%s393_s0] sm:$0xff]  ;;  %v29_v3 = vld [vmem:[%s393_s0 + $0x8] sm:$0xff]  ;;  %61 = vmatpush.bf16.msra.mxu0 %v254_v0 }
   0x3   :  { %12 = vsyncpa [#allocation3], 0  ;;  %v30_v4 = vpack.c.bf16 %v29_v3, %v28_v2  ;;  %vm51_vm0 = vcmask 261120   ;;  %v258_v5 = vld [vmem:[%s396_s3 + $0x18] sm:$0xff]  ;;  %v257_v6 = vld [vmem:[%s396_s3 + $0x10] sm:$0xff]  ;;  %vm124_vm1 = vcmask 523264  }
   0x4   :  { %132 = vmatpush.bf16.msra.mxu1 %v258_v5  ;;  %v256_v7 = vld [vmem:[%s396_s3 + $0x8] sm:$0xff]  ;;  %v255_v8 = vld [vmem:[%s396_s3] sm:$0xff]  ;;  %v303_v42 = vmov 32.0   ;;  %s215_s23 = sshll.u32 %s400_s7, 4  ;;  %s306_s24 = smov 8   ;;  %s216_s23 = int_to_ptr.hbm [resolvable:$true] %s215_s23 }
   0x5   :  { %v263_v9 = vld [vmem:[%s395_s2] ss:$0 sm:$0xff] }
   0x6   :  { %62 = vmatpush.bf16.msra.mxu0 %v253_v1  ;;  %v264_v33 = vld [vmem:[%s397_s4] ss:$0 sm:$0xff] }
   0x8   :  { %133 = vmatpush.bf16.msra.mxu1 %v257_v6 }
   0x9   :  { %235 = vmatmul.msk.bf16.vlgmr.msra.gmra.mxu0 %vm51_vm0, %v30_v4 }
   0xc   :  { %134 = vmatpush.bf16.msra.mxu1 %v256_v7 }
  0x10   :  { %135 = vmatpush.bf16.msra.mxu1 %v255_v8 }
  0x86   :  { %v64_v10 = vpop.f32.mrf.mxu0 }
  0x87   :  { %v65_v11 = vadd.f32 %v263_v9, %v64_v10 }
  0x89   :  { %v71_v12 = vmul.f32 0.044715, %v65_v11  ;;  %v69_v27 = vmul.f32 0.5, %v65_v11 }
  0x8b   :  { %v73_v13 = vmul.f32 %v71_v12, %v65_v11 }
  0x8d   :  { %v75_v14 = vmul.f32 %v73_v13, %v65_v11  ;;  %v266_v13 = vld [vmem:[%s399_s6] ss:$0 sm:$0xff]  ;;  %s305_s6 = smov 128  }
  0x8e   :  { %v66_v15 = vpop.f32.mrf.mxu0 }
  0x8f   :  { %v67_v16 = vadd.f32 %v263_v9, %v66_v15  ;;  %v77_v17 = vadd.f32 %v75_v14, %v65_v11  ;;  %v265_v9 = vld [vmem:[%s398_s5] ss:$0 sm:$0xff]  ;;  %s304_s5 = smov [#allocation2]  }
  0x90   :  { %s213_s20 = sshll.u32 %s304_s5, 4  ;;  %s214_s20 = int_to_ptr.vmem [resolvable:$true] %s213_s20 }
  0x91   :  { %v72_v18 = vmul.f32 0.044715, %v67_v16  ;;  %v79_v20 = vmul.f32 0.7978846, %v77_v17  ;;  %v70_v28 = vmul.f32 0.5, %v67_v16 }
  0x93   :  { %v74_v19 = vmul.f32 %v72_v18, %v67_v16  ;;  %267 = vtanh.f32 %v79_v20 }
  0x95   :  { %v76_v21 = vmul.f32 %v74_v19, %v67_v16 }
  0x97   :  { %v78_v22 = vadd.f32 %v76_v21, %v67_v16 }
  0x99   :  { %v80_v23 = vmul.f32 0.7978846, %v78_v22  ;;  %v268_v24 = vpop.eup %267 }
  0x9a   :  { %v83_v25 = vadd.f32 1.0, %v268_v24 }
  0x9b   :  { %269 = vtanh.f32 %v80_v23 }
  0x9c   :  { %v85_v30 = vmul.f32 %v83_v25, %v69_v27  ;;  %271 = vrcp.f32 %v303_v42 }
  0xa1   :  { %v270_v26 = vpop.eup %269 }
  0xa2   :  { %v84_v29 = vadd.f32 1.0, %v270_v26  ;;  %v272_v43 = vpop.eup %271 }
  0xa3   :  { %v153_v44 = vmul.f32 32.0, %v272_v43  ;;  %vm157_vm2 = vweird.f32 %v272_v43 }
  0xa4   :  { %v86_v31 = vmul.f32 %v84_v29, %v70_v28 }
  0xa5   :  { %v154_v45 = vsub.f32 1.0, %v153_v44 }
  0xa6   :  { %v87_v32 = vpack.c.bf16 %v86_v31, %v85_v30 }
  0xa7   :  { %v155_v46 = vmul.f32 %v272_v43, %v154_v45 }
  0xa8   :  { %252 = vmatmul.msk.bf16.vlgmr.msra.gmra.mxu1 %vm124_vm1, %v87_v32 }
  0xa9   :  { %v156_v47 = vadd.f32 %v272_v43, %v155_v46 }
  0xab   :  { %v158_v48 = vsel %vm157_vm2, %v272_v43, %v156_v47 }
 0x125   :  { %v137_v34 = vpop.f32.mrf.mxu1 }
 0x126   :  { %v138_v35 = vadd.f32 %v264_v33, %v137_v34 }
 0x128   :  { %v142_v36 = vadd.f32 %v138_v35, %v28_v2 }
 0x12a   :  { %v146_v37 = vsel %vm51_vm0, %v142_v36, 0.0 }
 0x12b   :  { %147 = vadd.xlane.f32.xlu0 %v146_v37 }
 0x12d   :  { %v139_v38 = vpop.f32.mrf.mxu1 }
 0x12e   :  { %v140_v39 = vadd.f32 %v264_v33, %v139_v38 }
 0x130   :  { %v143_v40 = vadd.f32 %v140_v39, %v29_v3 }
 0x132   :  { %v149_v41 = vsel %vm51_vm0, %v143_v40, 0.0 }
 0x133   :  { %150 = vadd.xlane.f32.xlu0 %v149_v41 }
 0x19e   :  { %v148_v49 = vpop.xlane.xlu0 %147 }
 0x19f   :  { %v159_v50 = vmul.f32 %v158_v48, %v148_v49 }
 0x1a1   :  { %v161_v51 = vsub.f32 %v142_v36, %v159_v50 }
 0x1a3   :  { %v163_v52 = vmul.f32 %v161_v51, %v161_v51 }
 0x1a5   :  { %v165_v53 = vsel %vm51_vm0, %v163_v52, 0.0 }
 0x1a6   :  { %166 = vadd.xlane.f32.xlu1 %v165_v53  ;;  %v151_v54 = vpop.xlane.xlu0 %150 }
 0x1a7   :  { %v160_v55 = vmul.f32 %v158_v48, %v151_v54 }
 0x1a9   :  { %v162_v56 = vsub.f32 %v143_v40, %v160_v55 }
 0x1ab   :  { %v164_v57 = vmul.f32 %v162_v56, %v162_v56 }
 0x1ad   :  { %v168_v58 = vsel %vm51_vm0, %v164_v57, 0.0 }
 0x1ae   :  { %169 = vadd.xlane.f32.xlu1 %v168_v58 }
 0x219   :  { %v167_v59 = vpop.xlane.xlu1 %166 }
 0x21a   :  { %v171_v60 = vmul.f32 %v167_v59, %v158_v48 }
 0x21c   :  { %v173_v61 = vadd.f32 1e-12, %v171_v60 }
 0x21e   :  { %273 = vrsqrt.f32 %v173_v61  ;;  %vm181_vm4 = vweird.f32 %v173_v61 }
 0x221   :  { %v170_v62 = vpop.xlane.xlu1 %169 }
 0x222   :  { %v172_v63 = vmul.f32 %v170_v62, %v158_v48 }
 0x224   :  { %v274_v0 = vpop.eup %273  ;;  %v174_v1 = vadd.f32 1e-12, %v172_v63 }
 0x225   :  { %v176_v2 = vmul.f32 %v274_v0, %v173_v61  ;;  %vm182_vm3 = vweird.f32 %v274_v0 }
 0x226   :  { %275 = vrsqrt.f32 %v174_v1  ;;  %vm183_vm5 = vmor %vm181_vm4, %vm182_vm3  ;;  %vm191_vm7 = vweird.f32 %v174_v1 }
 0x227   :  { %v177_v3 = vmul.f32 %v274_v0, %v176_v2 }
 0x229   :  { %v178_v4 = vmul.f32 0.5, %v177_v3 }
 0x22b   :  { %v179_v5 = vsub.f32 1.5, %v178_v4 }
 0x22c   :  { %v276_v6 = vpop.eup %275 }
 0x22d   :  { %v180_v7 = vmul.f32 %v274_v0, %v179_v5  ;;  %v186_v8 = vmul.f32 %v276_v6, %v174_v1  ;;  %vm192_vm6 = vweird.f32 %v276_v6 }
 0x22e   :  { %vm193_vm8 = vmor %vm191_vm7, %vm192_vm6 }
 0x22f   :  { %v184_v10 = vsel %vm183_vm5, %v274_v0, %v180_v7  ;;  %v187_v11 = vmul.f32 %v276_v6, %v186_v8 }
 0x230   :  { %v195_v12 = vmul.f32 %v184_v10, %v161_v51 }
 0x231   :  { %v188_v14 = vmul.f32 0.5, %v187_v11 }
 0x232   :  { %v200_v15 = vmul.f32 %v265_v9, %v195_v12 }
 0x233   :  { %v189_v16 = vsub.f32 1.5, %v188_v14 }
 0x234   :  { %v205_v17 = vadd.f32 %v266_v13, %v200_v15 }
 0x235   :  { %v190_v18 = vmul.f32 %v276_v6, %v189_v16 }
 0x236   :  { %207 = vst.msk [vmem:[#allocation2] sm:$0xff] %vm51_vm0, %v205_v17 }
 0x237   :  { %v194_v19 = vsel %vm193_vm8, %v276_v6, %v190_v18 }
 0x238   :  { %v196_v20 = vmul.f32 %v194_v19, %v162_v56 }
 0x23a   :  { %v201_v21 = vmul.f32 %v265_v9, %v196_v20 }
 0x23c   :  { %v206_v22 = vadd.f32 %v266_v13, %v201_v21 }
 0x23e   :  { %208 = vst.msk [vmem:[#allocation2 + $0x8] sm:$0xff] %vm51_vm0, %v206_v22 }
 0x23f   :  { %221 = dma.vmem_to_hbm [thread:$0]  %s214_s20, 256, %s216_s23, [#allocation3], %s305_s6, %s305_s6, %s306_s24  }
 0x240   :  { %301 = dma.done.wait [#allocation3], 256  }
 0x241   :  { %302 = vsyncadd [#allocation3], 4294967040 }
 0x242   :  { %226 = vsyncpa [#allocation3], 1 }

// kernel: lxrt_x_layer.8
= control target key start
LH: loop header
LB: loop body
LE: loop exit
PB: predicated region body
PF: predicated region fallthrough
CT: control target
= control target key end

     0   :  { %s1300_s25 = smov 0   ;;  %s1302_s26 = smov 0   ;;  %s1446_s0 = inlined_call_operand.vmem [shape: f32[2,8,32], index: 0, kind: input, shape index: {}, may-alias: {0,1}]   ;;  %s1447_s1 = inlined_call_operand.vmem [shape: f32[2,8,32], index: 1, kind: input, shape index: {}, may-alias: {0,1}]   ;;  %s1448_s2 = inlined_call_operand.vmem [shape: f32[2,1,8], index: 2, kind: input, shape index: {}]   ;;  %s1449_s3 = inlined_call_operand.vmem [shape: bf16[32,32], index: 3, kind: input, shape index: {}]   ;;  %s1450_s4 = inlined_call_operand.vmem [shape: f32[1,32], index: 4, kind: input, shape index: {}]   ;;  %s1451_s5 = inlined_call_operand.vmem [shape: bf16[32,32], index: 5, kind: input, shape index: {}]   ;;  %s1452_s6 = inlined_call_operand.vmem [shape: f32[1,32], index: 6, kind: input, shape index: {}]   ;;  %s1453_s7 = inlined_call_operand.vmem [shape: bf16[32,32], index: 7, kind: input, shape index: {}]   ;;  %s1454_s8 = inlined_call_operand.vmem [shape: f32[1,32], index: 8, kind: input, shape index: {}]   ;;  %s1455_s9 = inlined_call_operand.vmem [shape: bf16[32,32], index: 9, kind: input, shape index: {}]   ;;  %s1456_s10 = inlined_call_operand.vmem [shape: f32[1,32], index: 10, kind: input, shape index: {}]   ;;  %s1457_s11 = inlined_call_operand.vmem [shape: f32[1,32], index: 11, kind: input, shape index: {}]   ;;  %s1458_s12 = inlined_call_operand.vmem [shape: f32[1,32], index: 12, kind: input, shape index: {}]   ;;  %s1459_s13 = inlined_call_operand.vmem [shape: f32[2,8,32], index: 13, kind: output, shape index: {}]  }
   0x1   :  { %s1304_s27 = smov 0  }
   0x2 LB: > { %s35_s28 = sadd.s32 1, %s1217_s26  ;;  %p1082_p0 = scmp.ge.s32.totalorder %s1221_s27, 1  ;;  %s1221_s27 = sphi %s1304_s27, %s23_s27   ;;  %s1217_s26 = sphi %s1302_s26, %s1461_s26   ;;  %s1213_s25 = sphi %s1300_s25, %s1460_s25  }
   0x3   : > { %p37_p1 = scmp.ge.s32.totalorder %s35_s28, 2  ;;  %p422_p2 = scmp.lt.s32.totalorder %s1221_s27, 3 }
   0x5   : > { %s1463_s28 = smov (%p37_p1, %s35_s28), 0  ;;  %p423_p3 = pnand %p1082_p0, %p422_p2 }
   0x6   : > { %p477_p4 = scmp.lt.s32.totalorder (!%p423_p3), %s1213_s25, 1  ;;  %s1223_s18 = smov (!%p423_p3), 112  }
   0x7   : > { %426 = sbr.rel (%p423_p3) target bundleno = 1495 (0x5d7), region = 72  ;;  %s1224_s19 = smov (!%p423_p3), 104  }
   0x8   : > { %s1225_s21 = smov (!%p423_p3), 120  }
   0xc   : > { %v1133_v0 = vld [vmem:[%s1451_s5 + $0x8] sm:$0xff]  ;;  %v1132_v2 = vld [vmem:[%s1451_s5] sm:$0xff]  ;;  %s1465_s25 = smov (!%p477_p4, %s1213_s25), 1  ;;  %vm525_vm0 = vcmask 261120   ;;  %vm611_vm1 = vcmask 60416   ;;  %vm672_vm2 = vcmask 1043456  }
   0xd   : > { %v1137_v1 = vld [vmem:[%s1449_s3 + $0x8] sm:$0xff]  ;;  %535 = vmatpush.bf16.msra.mxu0 %v1133_v0  ;;  %v1136_v3 = vld [vmem:[%s1449_s3] sm:$0xff]  ;;  %s1333_s20 = sshll.u32 %s1465_s25, 3  ;;  %s490_s24 = scalar_lea.vmem %s1448_s2, %s1465_s25  ;;  %vm668_vm3 = vcmask 64512   ;;  %vm617_vm4 = vcmask 257024   ;;  %vm901_vm5 = vcmask 130048  }
   0xe   : > { %651 = vmatpush.bf16.msra.mxu2 %v1137_v1  ;;  %s487_s23 = scalar_lea.vmem %s1447_s1, %s1333_s20  ;;  %s483_s30 = scalar_lea.vmem %s1446_s0, %s1333_s20  ;;  %v1172_v8 = vld [vmem:[%s1452_s6] ss:$0 sm:$0xff]  ;;  %v1135_v38 = vld [vmem:[%s1453_s7 + $0x8] sm:$0xff]  ;;  %vm903_vm6 = vcmask 195584  }
   0xf   : > { %v503_v4 = vld [vmem:[%s487_s23] sm:$0xff]  ;;  %568 = vmatpush.bf16.msra.mxu1 %v1135_v38 }
  0x10   : > { %v1343_v5 = vpack.c.bf16 %v503_v4, %v503_v4  ;;  %v1345_v6 = vld [vmem:[%s483_s30] sm:$0xff] }
  0x11   : > { %536 = vmatpush.bf16.msra.mxu0 %v1132_v2  ;;  %v620_v7 = vpack.c.bf16 %v1345_v6, %v1345_v6  ;;  %v1173_v11 = vld [vmem:[%s1450_s4] ss:$0 sm:$0xff] }
  0x12   : > { %652 = vmatpush.bf16.msra.mxu2 %v1136_v3  ;;  %v1134_v39 = vld [vmem:[%s1453_s7] sm:$0xff] }
  0x13   : > { %569 = vmatpush.bf16.msra.mxu1 %v1134_v39  ;;  %v1174_v40 = vld [vmem:[%s490_s24] ss:$0 sm:$0xff] }
  0x14   : > { %1094 = vmatmul.msk.bf16.vlgmr.msra.gmra.mxu0 %vm525_vm0, %v1343_v5  ;;  %v1175_v58 = vld [vmem:[%s1454_s8] ss:$0 sm:$0xff] }
  0x15   : > { %1112 = vmatmul.msk.bf16.vlgmr.msra.gmra.mxu2 %vm525_vm0, %v620_v7 }
  0x16   : > { %1103 = vmatmul.msk.bf16.vlgmr.msra.gmra.mxu1 %vm525_vm0, %v1343_v5 }
  0x91   : > { %v538_v9 = vpop.f32.mrf.mxu0 }
  0x92   : > { %v539_v10 = vadd.f32 %v1172_v8, %v538_v9 }
  0x93   : > { %v571_v61 = vpop.f32.mrf.mxu1 }
  0x94   : > { %575 = vxpose.xlu0.b32.start.end [1/1] (short) (narrow) %v539_v10, 32  ;;  %v572_v62 = vadd.f32 %v1175_v58, %v571_v61 }
  0x96   : > { %v616_v63 = vpack.c.bf16 %v572_v62, %v572_v62  ;;  %v1176_v62 = vld [vmem:[%s1456_s10] ss:$0 sm:$0xff] }
  0x98   : > { %v654_v12 = vpop.f32.mrf.mxu2  ;;  %618 = vst.msk [vmem:[#allocation3] sm:$0xf] %vm617_vm4, %v616_v63 }
  0x99   : > { %v540_v13 = vpop.f32.mrf.mxu0  ;;  %v655_v14 = vadd.f32 %v1173_v11, %v654_v12 }
  0x9b   : > { %v658_v15 = vpack.c.bf16 %v655_v14, %v655_v14  ;;  %v573_v1 = vpop.f32.mrf.mxu1 }
  0x9d   : > { %v721_v16 = vunpack.c.l.b16 %v658_v15 }
  0x9f   : > { %v722_v17 = vpack.c.b16 %v721_v16, %v721_v16  ;;  %v663_v9 = vld [vmem:[#allocation3] sm:$0xf] }
  0xa0   : > { %v656_v18 = vpop.f32.mrf.mxu2  ;;  %v757_v10 = vunpack.c.l.b16 %v663_v9  ;;  %v705_v12 = vsel %vm672_vm2, %v663_v9, 0 }
  0xa1   : > { %780 = vrot.lane.b32.xlu1 %v722_v17, %s1223_s18 }
  0xa2   : > { %v758_v11 = vpack.c.b16 %v757_v10, %v757_v10 }
  0xa9   : > { %834 = vrot.lane.b32.xlu1 %v722_v17, %s1224_s19 }
 0x113   : > { %v781_v33 = vpop.permute.xlu1 %780 }
 0x11a   : > { %723 = vrot.lane.b32.xlu0 %v722_v17, %s1225_s21 }
 0x11b   : > { %v835_v37 = vpop.permute.xlu1 %834 }
 0x138   : > { %v591_v19 = vpop.trf.xlu0 }
 0x139   : > { %v607_v20 = vpack.c.bf16 %v591_v19, %v591_v19 }
 0x13b   : > { %612 = vst.msk [vmem:[#allocation2] sm:$0xf] %vm611_vm1, %v607_v20 }
 0x140   : > { %v592_v21 = vpop.trf.xlu0 }
 0x141   : > { %v608_v22 = vpack.c.bf16 %v592_v21, %v592_v21 }
 0x142   : > { %v659_v23 = vld [vmem:[#allocation2] sm:$0xf] }
 0x143   : > { %613 = vst.msk [vmem:[#allocation2 + $0x4] sm:$0xf] %vm611_vm1, %v608_v22  ;;  %v674_v24 = vsel %vm672_vm2, %v659_v23, 0 }
 0x144   : > { %683 = vmatpush.bf16.msra.mxu3 %v674_v24 }
 0x147   : > { %1113 = vmatmul.msk.bf16.vlgmr.msra.gmra.mxu3 %vm668_vm3, %v658_v15 }
 0x148   : > { %v593_v25 = vpop.trf.xlu0  ;;  %714 = vmatpush.bf16.msrb.mxu3 %v705_v12 }
 0x149   : > { %v609_v26 = vpack.c.bf16 %v593_v25, %v593_v25 }
 0x14a   : > { %v660_v27 = vld [vmem:[#allocation2 + $0x4] sm:$0xf] }
 0x14b   : > { %614 = vst.msk [vmem:[#allocation2 + $0x8] sm:$0xf] %vm611_vm1, %v609_v26  ;;  %v729_v28 = vsel %vm672_vm2, %v660_v27, 0 }
 0x14c   : > { %738 = vmatpush.bf16.msrb.mxu0 %v729_v28 }
 0x150   : > { %v594_v29 = vpop.trf.xlu0 }
 0x151   : > { %v610_v30 = vpack.c.bf16 %v594_v29, %v594_v29 }
 0x152   : > { %v661_v31 = vld [vmem:[#allocation2 + $0x8] sm:$0xf] }
 0x153   : > { %v786_v32 = vsel %vm672_vm2, %v661_v31, 0  ;;  %615 = vst.msk [vmem:[#allocation2 + $0xc] sm:$0xf] %vm611_vm1, %v610_v30 }
 0x154   : > { %795 = vmatpush.bf16.msrb.mxu2 %v786_v32 }
 0x157   : > { %1117 = vmatmul.msk.bf16.vlgmr.msrb.gmra.mxu2 %vm668_vm3, %v781_v33 }
 0x15a   : > { %v662_v34 = vld [vmem:[#allocation2 + $0xc] sm:$0xf] }
 0x15b   : > { %v840_v35 = vsel %vm672_vm2, %v662_v34, 0 }
 0x15c   : > { %849 = vmatpush.bf16.msra.mxu0 %v840_v35 }
 0x18c   : > { %v724_v36 = vpop.permute.xlu0 %723 }
 0x18d   : > { %1115 = vmatmul.msk.bf16.vlgmr.msrb.gmra.mxu0 %vm668_vm3, %v724_v36 }
 0x19d   : > { %1119 = vmatmul.msk.bf16.vlgmr.msra.gmra.mxu0 %vm668_vm3, %v835_v37 }
 0x1ca   : > { %v685_v41 = vpop.f32.mrf.mxu3 }
 0x1cb   : > { %v686_v42 = vadd.f32 %v1174_v40, %v685_v41 }
 0x1cd   : > { %v689_v43 = vsel %vm668_vm3, %v686_v42, -inf }
 0x1ce   : > { %690 = vmax.xlane.f32.xlu2 %v689_v43 }
 0x1d2   : > { %v687_v44 = vpop.f32.mrf.mxu3 }
 0x1da   : > { %v797_v45 = vpop.f32.mrf.mxu2 }
 0x1db   : > { %v798_v46 = vadd.f32 %v1174_v40, %v797_v45 }
 0x1dd   : > { %v801_v47 = vsel %vm668_vm3, %v798_v46, -inf }
 0x1de   : > { %802 = vmax.xlane.f32.xlu1 %v801_v47 }
 0x1e2   : > { %v799_v48 = vpop.f32.mrf.mxu2 }
 0x20a   : > { %v740_v49 = vpop.f32.mrf.mxu0 }
 0x20b   : > { %v741_v50 = vadd.f32 %v1174_v40, %v740_v49 }
 0x20d   : > { %v744_v51 = vsel %vm668_vm3, %v741_v50, -inf }
 0x20e   : > { %745 = vmax.xlane.f32.xlu2 %v744_v51 }
 0x212   : > { %v742_v52 = vpop.f32.mrf.mxu0 }
 0x21a   : > { %v851_v53 = vpop.f32.mrf.mxu0 }
 0x21b   : > { %v852_v54 = vadd.f32 %v1174_v40, %v851_v53  ;;  %v1139_v53 = vld [vmem:[%s1455_s9 + $0x8] sm:$0xff] }
 0x21c   : > { %935 = vmatpush.bf16.msra.mxu2 %v1139_v53 }
 0x21d   : > { %v855_v55 = vsel %vm668_vm3, %v852_v54, -inf }
 0x21e   : > { %856 = vmax.xlane.f32.xlu2 %v855_v55 }
 0x222   : > { %v853_v56 = vpop.f32.mrf.mxu0 }
 0x241   : > { %v691_v57 = vpop.xlane.xlu2 %690 }
 0x242   : > { %v692_v59 = vsub.f32 %v686_v42, %v691_v57 }
 0x244   : > { %v693_v60 = vmul.f32 1.442695, %v692_v59 }
 0x246   : > { %1179 = vpow2.f32 %v693_v60 }
 0x24c   : > { %v1180_v0 = vpop.eup %1179 }
 0x24d   : > { %v695_v2 = vsel %vm668_vm3, %v1180_v0, 0.0 }
 0x24e   : > { %696 = vadd.xlane.f32.xlu2 %v695_v2 }
 0x251   : > { %v803_v3 = vpop.xlane.xlu1 %802 }
 0x252   : > { %v804_v4 = vsub.f32 %v798_v46, %v803_v3 }
 0x254   : > { %v805_v5 = vmul.f32 1.442695, %v804_v4  ;;  %v1229_v4 = vmov 32.0  }
 0x256   : > { %1181 = vpow2.f32 %v805_v5 }
 0x25c   : > { %v1182_v7 = vpop.eup %1181 }
 0x25d   : > { %v807_v8 = vsel %vm668_vm3, %v1182_v7, 0.0 }
 0x25e   : > { %808 = vadd.xlane.f32.xlu1 %v807_v8 }
 0x277   : > { %813 = vrot.lane.b32.xlu1 %v758_v11, %s1223_s18  ;;  %s1226_s18 = smov 16  }
 0x27f   : > { %867 = vrot.lane.b32.xlu1 %v758_v11, %s1224_s19  ;;  %s1227_s19 = smov 8  }
 0x281   : > { %v746_v13 = vpop.xlane.xlu2 %745 }
 0x282   : > { %v747_v14 = vsub.f32 %v741_v50, %v746_v13 }
 0x284   : > { %v748_v15 = vmul.f32 1.442695, %v747_v14 }
 0x286   : > { %1183 = vpow2.f32 %v748_v15 }
 0x28c   : > { %v1184_v16 = vpop.eup %1183 }
 0x28d   : > { %v750_v17 = vsel %vm668_vm3, %v1184_v16, 0.0 }
 0x28e   : > { %751 = vadd.xlane.f32.xlu2 %v750_v17 }
 0x291   : > { %v857_v18 = vpop.xlane.xlu2 %856 }
 0x292   : > { %v858_v19 = vsub.f32 %v852_v54, %v857_v18  ;;  %v1138_v54 = vld [vmem:[%s1455_s9] sm:$0xff] }
 0x293   : > { %936 = vmatpush.bf16.msra.mxu2 %v1138_v54 }
 0x294   : > { %v859_v20 = vmul.f32 1.442695, %v858_v19 }
 0x2a6   : > { %759 = vrot.lane.b32.xlu2 %v758_v11, %s1225_s21  ;;  %s1228_s21 = smov 24  }
 0x2c1   : > { %v697_v21 = vpop.xlane.xlu2 %696 }
 0x2c2   : > { %1185 = vrcp.f32 %v697_v21 }
 0x2c3   : > { %1187 = vpow2.f32 %v859_v20 }
 0x2c8   : > { %v1186_v22 = vpop.eup %1185 }
 0x2c9   : > { %v699_v23 = vmul.f32 %v1186_v22, %v1180_v0  ;;  %v1188_v24 = vpop.eup %1187 }
 0x2ca   : > { %v861_v26 = vsel %vm668_vm3, %v1188_v24, 0.0 }
 0x2cb   : > { %v700_v25 = vpack.c.bf16 %v699_v23, %v699_v23 }
 0x2cd   : > { %1114 = vmatmul.msk.bf16.vlgmr.msrb.gmra.mxu3 %vm668_vm3, %v700_v25  ;;  %v1177_v25 = vld [vmem:[%s1457_s11] ss:$0 sm:$0xff] }
 0x2cf   : > { %862 = vadd.xlane.f32.xlu2 %v861_v26 }
 0x2d1   : > { %v809_v27 = vpop.xlane.xlu1 %808 }
 0x2d2   : > { %1189 = vrcp.f32 %v809_v27  ;;  %v1178_v27 = vld [vmem:[%s1458_s12] ss:$0 sm:$0xff] }
 0x2d8   : > { %v1190_v28 = vpop.eup %1189 }
 0x2d9   : > { %v811_v29 = vmul.f32 %v1190_v28, %v1182_v7 }
 0x2db   : > { %v812_v32 = vpack.c.bf16 %v811_v29, %v811_v29 }
 0x2e9   : > { %v814_v30 = vpop.permute.xlu1 %813 }
 0x2ea   : > { %v819_v31 = vsel %vm672_vm2, %v814_v30, 0 }
 0x2eb   : > { %828 = vmatpush.bf16.msra.mxu3 %v819_v31 }
 0x2ee   : > { %1118 = vmatmul.msk.bf16.vlgmr.msra.gmra.mxu3 %vm668_vm3, %v812_v32 }
 0x2f1   : > { %v868_v34 = vpop.permute.xlu1 %867 }
 0x2f2   : > { %v873_v38 = vsel %vm672_vm2, %v868_v34, 0 }
 0x301   : > { %v752_v33 = vpop.xlane.xlu2 %751 }
 0x302   : > { %1191 = vrcp.f32 %v752_v33 }
 0x308   : > { %v1192_v35 = vpop.eup %1191 }
 0x309   : > { %v754_v36 = vmul.f32 %v1192_v35, %v1184_v16  ;;  %v760_v37 = vpop.permute.xlu2 %759 }
 0x30a   : > { %v765_v39 = vsel %vm672_vm2, %v760_v37, 0 }
 0x30b   : > { %774 = vmatpush.bf16.msrb.mxu1 %v765_v39  ;;  %v755_v40 = vpack.c.bf16 %v754_v36, %v754_v36 }
 0x30e   : > { %1116 = vmatmul.msk.bf16.vlgmr.msrb.gmra.mxu1 %vm668_vm3, %v755_v40 }
 0x30f   : > { %882 = vmatpush.bf16.msra.mxu1 %v873_v38 }
 0x342   : > { %v863_v41 = vpop.xlane.xlu2 %862 }
 0x343   : > { %1193 = vrcp.f32 %v863_v41 }
 0x344   : > { %1195 = vrcp.f32 %v1229_v4 }
 0x349   : > { %v1194_v42 = vpop.eup %1193 }
 0x34a   : > { %v865_v43 = vmul.f32 %v1194_v42, %v1188_v24  ;;  %v1196_v5 = vpop.eup %1195 }
 0x34b   : > { %v949_v7 = vmul.f32 32.0, %v1196_v5  ;;  %vm953_vm7 = vweird.f32 %v1196_v5 }
 0x34c   : > { %v866_v44 = vpack.c.bf16 %v865_v43, %v865_v43 }
 0x34d   : > { %v950_v8 = vsub.f32 1.0, %v949_v7 }
 0x34e   : > { %1120 = vmatmul.msk.bf16.vlgmr.msra.gmra.mxu1 %vm668_vm3, %v866_v44 }
 0x34f   : > { %v951_v9 = vmul.f32 %v1196_v5, %v950_v8 }
 0x350   : > { %v716_v45 = vpop.f32.mrf.mxu3 }
 0x351   : > { %v952_v10 = vadd.f32 %v1196_v5, %v951_v9 }
 0x353   : > { %v954_v11 = vsel %vm953_vm7, %v1196_v5, %v952_v10 }
 0x358   : > { %v718_v46 = vpop.f32.mrf.mxu3 }
 0x371   : > { %v830_v47 = vpop.f32.mrf.mxu3 }
 0x372   : > { %893 = vrot.lane.b32.xlu2 %v830_v47, %s1226_s18 }
 0x379   : > { %v832_v48 = vpop.f32.mrf.mxu3 }
 0x38b   : > { %v776_v49 = vpop.f32.mrf.mxu1 }
 0x38c   : > { %889 = vrot.lane.b32.xlu1 %v776_v49, %s1227_s19 }
 0x393   : > { %v778_v50 = vpop.f32.mrf.mxu1 }
 0x3cb   : > { %v884_v51 = vpop.f32.mrf.mxu1 }
 0x3cc   : > { %897 = vrot.lane.b32.xlu1 %v884_v51, %s1228_s21  ;;  %v894_v57 = vpop.permute.xlu2 %893  ;;  %s497_s21 = scalar_lea.vmem %s1459_s13, %s1333_s20 }
 0x3d3   : > { %v886_v52 = vpop.f32.mrf.mxu1 }
 0x3fe   : > { %v890_v55 = vpop.permute.xlu1 %889 }
 0x3ff   : > { %v900_v56 = vsel %vm668_vm3, %v716_v45, %v890_v55 }
 0x400   : > { %v902_v59 = vsel %vm901_vm5, %v900_v56, %v894_v57 }
 0x43e   : > { %v898_v58 = vpop.permute.xlu1 %897 }
 0x43f   : > { %v904_v60 = vsel %vm903_vm6, %v902_v59, %v898_v58 }
 0x440   : > { %v905_v61 = vpack.c.bf16 %v904_v60, %v904_v60 }
 0x442   : > { %1129 = vmatmul.msk.bf16.vlgmr.msra.gmra.mxu2 %vm525_vm0, %v905_v61 }
 0x4c5   : > { %v938_v63 = vpop.f32.mrf.mxu2 }
 0x4c6   : > { %v939_v0 = vadd.f32 %v1176_v62, %v938_v63 }
 0x4c8   : > { %v942_v1 = vadd.f32 %v939_v0, %v1345_v6 }
 0x4ca   : > { %v945_v2 = vsel %vm525_vm0, %v942_v1, 0.0 }
 0x4cb   : > { %946 = vadd.xlane.f32.xlu1 %v945_v2 }
 0x4cd   : > { %v940_v3 = vpop.f32.mrf.mxu2 }
 0x53e   : > { %v947_v12 = vpop.xlane.xlu1 %946 }
 0x53f   : > { %v955_v13 = vmul.f32 %v954_v11, %v947_v12 }
 0x541   : > { %v956_v14 = vsub.f32 %v942_v1, %v955_v13 }
 0x543   : > { %v957_v15 = vmul.f32 %v956_v14, %v956_v14 }
 0x545   : > { %v958_v16 = vsel %vm525_vm0, %v957_v15, 0.0 }
 0x546   : > { %959 = vadd.xlane.f32.xlu2 %v958_v16 }
 0x5b9   : > { %v960_v6 = vpop.xlane.xlu2 %959 }
 0x5ba   : > { %v961_v17 = vmul.f32 %v960_v6, %v954_v11 }
 0x5bc   : > { %v962_v18 = vadd.f32 1e-12, %v961_v17 }
 0x5be   : > { %1197 = vrsqrt.f32 %v962_v18  ;;  %vm969_vm9 = vweird.f32 %v962_v18 }
 0x5c4   : > { %v1198_v19 = vpop.eup %1197 }
 0x5c5   : > { %v964_v20 = vmul.f32 %v1198_v19, %v962_v18  ;;  %vm970_vm8 = vweird.f32 %v1198_v19 }
 0x5c6   : > { %vm971_vm10 = vmor %vm969_vm9, %vm970_vm8 }
 0x5c7   : > { %v965_v21 = vmul.f32 %v1198_v19, %v964_v20 }
 0x5c9   : > { %v966_v22 = vmul.f32 0.5, %v965_v21 }
 0x5cb   : > { %v967_v23 = vsub.f32 1.5, %v966_v22 }
 0x5cd   : > { %v968_v24 = vmul.f32 %v1198_v19, %v967_v23 }
 0x5cf   : > { %v972_v26 = vsel %vm971_vm10, %v1198_v19, %v968_v24 }
 0x5d0   : > { %v973_v28 = vmul.f32 %v972_v26, %v956_v14 }
 0x5d2   : > { %v977_v29 = vmul.f32 %v1177_v25, %v973_v28 }
 0x5d4   : > { %v981_v30 = vadd.f32 %v1178_v27, %v977_v29 }
 0x5d6   : > { %982 = vst.msk [vmem:[%s497_s21] sm:$0xff] %vm525_vm0, %v981_v30 }
 0x5d7 PF: > { %s23_s27 = sadd.s32 1, %s1221_s27   ;;  %s1460_s25 = smov %s1217_s26 }
 0x5d8   : > { %p20_p5 = scmp.ge.s32.totalorder %s23_s27, 4   ;;  %s1461_s26 = smov %s1463_s28 }
 0x5da   :  { %22 = sbr.rel (!%p20_p5) target bundleno = 2 (0x2), region = 112 }

// kernel: lxrt_x_layer.6
= control target key start
LH: loop header
LB: loop body
LE: loop exit
PB: predicated region body
PF: predicated region fallthrough
CT: control target
= control target key end

     0   :  { %s1310_s25 = smov 0   ;;  %s1312_s26 = smov 0   ;;  %s1451_s0 = inlined_call_operand.vmem [shape: f32[2,8,32], index: 0, kind: input, shape index: {}]   ;;  %s1452_s1 = inlined_call_operand.vmem [shape: f32[2,16,32], index: 1, kind: input, shape index: {}]   ;;  %s1453_s2 = inlined_call_operand.vmem [shape: f32[2,1,16], index: 2, kind: input, shape index: {}]   ;;  %s1454_s3 = inlined_call_operand.vmem [shape: bf16[32,32], index: 3, kind: input, shape index: {}]   ;;  %s1455_s4 = inlined_call_operand.vmem [shape: f32[1,32], index: 4, kind: input, shape index: {}]   ;;  %s1456_s5 = inlined_call_operand.vmem [shape: bf16[32,32], index: 5, kind: input, shape index: {}]   ;;  %s1457_s6 = inlined_call_operand.vmem [shape: f32[1,32], index: 6, kind: input, shape index: {}]   ;;  %s1458_s7 = inlined_call_operand.vmem [shape: bf16[32,32], index: 7, kind: input, shape index: {}]   ;;  %s1459_s8 = inlined_call_operand.vmem [shape: f32[1,32], index: 8, kind: input, shape index: {}]   ;;  %s1460_s9 = inlined_call_operand.vmem [shape: bf16[32,32], index: 9, kind: input, shape index: {}]   ;;  %s1461_s10 = inlined_call_operand.vmem [shape: f32[1,32], index: 10, kind: input, shape index: {}]   ;;  %s1462_s11 = inlined_call_operand.vmem [shape: f32[1,32], index: 11, kind: input, shape index: {}]   ;;  %s1463_s12 = inlined_call_operand.vmem [shape: f32[1,32], index: 12, kind: input, shape index: {}]   ;;  %s1464_s13 = inlined_call_operand.vmem [shape: f32[2,8,32], index: 13, kind: output, shape index: {}]  }
   0x1   :  { %s1314_s27 = smov 0  }
   0x2 LB: > { %s35_s28 = sadd.s32 1, %s1227_s26  ;;  %p1085_p0 = scmp.ge.s32.totalorder %s1231_s27, 1  ;;  %s1231_s27 = sphi %s1314_s27, %s23_s27   ;;  %s1227_s26 = sphi %s1312_s26, %s1466_s26   ;;  %s1223_s25 = sphi %s1310_s25, %s1465_s25  }
   0x3   : > { %p37_p1 = scmp.ge.s32.totalorder %s35_s28, 2  ;;  %p423_p2 = scmp.lt.s32.totalorder %s1231_s27, 3 }
   0x5   : > { %s1468_s28 = smov (%p37_p1, %s35_s28), 0  ;;  %p424_p3 = pnand %p1085_p0, %p423_p2 }
   0x6   : > { %p479_p4 = scmp.lt.s32.totalorder (!%p424_p3), %s1223_s25, 1  ;;  %s1233_s19 = smov (!%p424_p3), 120  }
   0x7   : > { %427 = sbr.rel (%p424_p3) target bundleno = 1390 (0x56e), region = 72  ;;  %s1235_s22 = smov (!%p424_p3), 112  }
   0xc   : > { %v1142_v0 = vld [vmem:[%s1456_s5 + $0x8] sm:$0xff]  ;;  %v1141_v2 = vld [vmem:[%s1456_s5] sm:$0xff]  ;;  %s1470_s25 = smov (!%p479_p4, %s1223_s25), 1  ;;  %vm529_vm0 = vcmask 261120   ;;  %vm617_vm1 = vcmask 125952   ;;  %vm681_vm2 = vcmask 1043456  }
   0xd   : > { %v1146_v1 = vld [vmem:[%s1454_s3 + $0x8] sm:$0xff]  ;;  %539 = vmatpush.bf16.msra.mxu0 %v1142_v0  ;;  %v1145_v3 = vld [vmem:[%s1454_s3] sm:$0xff]  ;;  %s1140_s20 = sshll.u32 %s1470_s25, 4  ;;  %s1086_s21 = sshll.u32 %s1470_s25, 3  ;;  %vm677_vm3 = vcmask 64512   ;;  %vm624_vm4 = vcmask 257024  }
   0xe   : > { %659 = vmatpush.bf16.msra.mxu2 %v1146_v1  ;;  %s490_s24 = scalar_lea.vmem %s1452_s1, %s1140_s20  ;;  %s485_s14 = scalar_lea.vmem %s1451_s0, %s1086_s21  ;;  %v1182_v9 = vld [vmem:[%s1457_s6] ss:$0 sm:$0xff]  ;;  %v1144_v23 = vld [vmem:[%s1458_s7 + $0x8] sm:$0xff]  ;;  %vm698_vm5 = vcmask 130048   ;;  %vm906_vm6 = vcmask 195584  }
   0xf   : > { %v506_v4 = vld [vmem:[%s490_s24] sm:$0xff]  ;;  %v507_v5 = vld [vmem:[%s490_s24 + $0x8] sm:$0xff]  ;;  %s1234_s20 = smov 104   ;;  %s493_s29 = scalar_lea.vmem %s1453_s2, %s1470_s25  ;;  %573 = vmatpush.bf16.msra.mxu1 %v1144_v23 }
  0x10   : > { %v1352_v6 = vld [vmem:[%s485_s14] sm:$0xff]  ;;  %v508_v7 = vpack.c.bf16 %v507_v5, %v506_v4 }
  0x11   : > { %540 = vmatpush.bf16.msra.mxu0 %v1141_v2  ;;  %v628_v8 = vpack.c.bf16 %v1352_v6, %v1352_v6  ;;  %v1183_v12 = vld [vmem:[%s1455_s4] ss:$0 sm:$0xff] }
  0x12   : > { %660 = vmatpush.bf16.msra.mxu2 %v1145_v3  ;;  %v1143_v26 = vld [vmem:[%s1458_s7] sm:$0xff] }
  0x13   : > { %574 = vmatpush.bf16.msra.mxu1 %v1143_v26  ;;  %v1185_v42 = vld [vmem:[%s1459_s8] ss:$0 sm:$0xff] }
  0x14   : > { %1098 = vmatmul.msk.bf16.vlgmr.msra.gmra.mxu0 %vm529_vm0, %v508_v7  ;;  %v1184_v45 = vld [vmem:[%s493_s29] ss:$0 sm:$0xff]  ;;  %s500_s29 = scalar_lea.vmem %s1464_s13, %s1086_s21 }
  0x15   : > { %1116 = vmatmul.msk.bf16.vlgmr.msra.gmra.mxu2 %vm529_vm0, %v628_v8 }
  0x16   : > { %1107 = vmatmul.msk.bf16.vlgmr.msra.gmra.mxu1 %vm529_vm0, %v508_v7 }
  0x91   : > { %v542_v10 = vpop.f32.mrf.mxu0 }
  0x92   : > { %v543_v11 = vadd.f32 %v1182_v9, %v542_v10 }
  0x93   : > { %v576_v43 = vpop.f32.mrf.mxu1 }
  0x94   : > { %581 = vxpose.xlu0.b32.start [1/2] (short) (narrow) %v543_v11, 32  ;;  %v577_v44 = vadd.f32 %v1185_v42, %v576_v43 }
  0x96   : > { %v622_v46 = vpack.c.bf16 %v577_v44, %v577_v44 }
  0x98   : > { %v662_v13 = vpop.f32.mrf.mxu2  ;;  %625 = vst.msk [vmem:[#allocation3] sm:$0xf] %vm624_vm4, %v622_v46 }
  0x99   : > { %v663_v14 = vadd.f32 %v1183_v12, %v662_v13  ;;  %v544_v15 = vpop.f32.mrf.mxu0 }
  0x9a   : > { %v545_v16 = vadd.f32 %v1182_v9, %v544_v15 }
  0x9b   : > { %v666_v17 = vpack.c.bf16 %v663_v14, %v663_v14  ;;  %v578_v52 = vpop.f32.mrf.mxu1 }
  0x9c   : > { %582 = vxpose.xlu0.b32.end [2/2] (short) (narrow) %v545_v16, 32  ;;  %v579_v53 = vadd.f32 %v1185_v42, %v578_v52  ;;  %v1148_v52 = vld [vmem:[%s1460_s9] sm:$0xff] }
  0x9d   : > { %v734_v18 = vunpack.c.l.b16 %v666_v17 }
  0x9e   : > { %v623_v55 = vpack.c.bf16 %v579_v53, %v579_v53 }
  0x9f   : > { %v735_v19 = vpack.c.b16 %v734_v18, %v734_v18 }
  0xa0   : > { %v664_v20 = vpop.f32.mrf.mxu2  ;;  %626 = vst.msk [vmem:[#allocation3 + $0x4] sm:$0xf] %vm624_vm4, %v623_v55 }
  0xa1   : > { %736 = vrot.lane.b32.xlu1 %v735_v19, %s1233_s19  ;;  %840 = vrot.lane.b32.xlu2 %v735_v19, %s1234_s20 }
  0xa7   : > { %v1147_v58 = vld [vmem:[#allocation3] sm:$0xff] }
  0xa9   : > { %788 = vrot.lane.b32.xlu1 %v735_v19, %s1235_s22 }
  0xfb   : > { %v841_v41 = vpop.permute.xlu2 %840 }
 0x113   : > { %v737_v33 = vpop.permute.xlu1 %736 }
 0x11b   : > { %v789_v38 = vpop.permute.xlu1 %788 }
 0x138   : > { %v597_v21 = vpop.trf.xlu0 }
 0x139   : > { %v613_v22 = vpack.c.bf16 %v597_v21, %v597_v21 }
 0x13b   : > { %618 = vst.msk [vmem:[#allocation2] sm:$0xf] %vm617_vm1, %v613_v22 }
 0x140   : > { %v598_v24 = vpop.trf.xlu0 }
 0x141   : > { %v614_v25 = vpack.c.bf16 %v598_v24, %v598_v24 }
 0x142   : > { %v667_v27 = vld [vmem:[#allocation2] sm:$0xf] }
 0x143   : > { %619 = vst.msk [vmem:[#allocation2 + $0x4] sm:$0xf] %vm617_vm1, %v614_v25  ;;  %v683_v28 = vsel %vm681_vm2, %v667_v27, 0 }
 0x144   : > { %692 = vmatpush.bf16.msra.mxu3 %v683_v28 }
 0x147   : > { %1117 = vmatmul.msk.bf16.vlgmr.msra.gmra.mxu3 %vm677_vm3, %v666_v17 }
 0x148   : > { %v599_v29 = vpop.trf.xlu0  ;;  %727 = vmatpush.bf16.msrb.mxu3 %v1147_v58 }
 0x149   : > { %v615_v30 = vpack.c.bf16 %v599_v29, %v599_v29 }
 0x14a   : > { %v668_v31 = vld [vmem:[#allocation2 + $0x4] sm:$0xf] }
 0x14b   : > { %620 = vst.msk [vmem:[#allocation2 + $0x8] sm:$0xf] %vm617_vm1, %v615_v30  ;;  %v742_v32 = vsel %vm681_vm2, %v668_v31, 0 }
 0x14c   : > { %751 = vmatpush.bf16.msrb.mxu0 %v742_v32 }
 0x14f   : > { %1123 = vmatmul.msk.bf16.vlgmr.msrb.gmra.mxu0 %vm677_vm3, %v737_v33 }
 0x150   : > { %v600_v34 = vpop.trf.xlu0 }
 0x151   : > { %v616_v35 = vpack.c.bf16 %v600_v34, %v600_v34 }
 0x152   : > { %v669_v36 = vld [vmem:[#allocation2 + $0x8] sm:$0xf] }
 0x153   : > { %621 = vst.msk [vmem:[#allocation2 + $0xc] sm:$0xf] %vm617_vm1, %v616_v35  ;;  %v794_v37 = vsel %vm681_vm2, %v669_v36, 0 }
 0x154   : > { %803 = vmatpush.bf16.msrb.mxu2 %v794_v37 }
 0x157   : > { %1125 = vmatmul.msk.bf16.vlgmr.msrb.gmra.mxu2 %vm677_vm3, %v789_v38 }
 0x15a   : > { %v670_v39 = vld [vmem:[#allocation2 + $0xc] sm:$0xf] }
 0x15b   : > { %v846_v40 = vsel %vm681_vm2, %v670_v39, 0 }
 0x15c   : > { %855 = vmatpush.bf16.msra.mxu0 %v846_v40 }
 0x15f   : > { %1127 = vmatmul.msk.bf16.vlgmr.msra.gmra.mxu0 %vm677_vm3, %v841_v41 }
 0x1ca   : > { %v694_v47 = vpop.f32.mrf.mxu3 }
 0x1cb   : > { %v695_v48 = vadd.f32 %v1184_v45, %v694_v47 }
 0x1cc   : > { %v753_v49 = vpop.f32.mrf.mxu0 }
 0x1cd   : > { %v754_v50 = vadd.f32 %v1184_v45, %v753_v49  ;;  %v699_v51 = vsel %vm698_vm5, %v695_v48, -inf }
 0x1ce   : > { %700 = vmax.xlane.f32.xlu2 %v699_v51  ;;  %v1149_v51 = vld [vmem:[%s1460_s9 + $0x8] sm:$0xff] }
 0x1cf   : > { %v757_v54 = vsel %vm698_vm5, %v754_v50, -inf  ;;  %938 = vmatpush.bf16.msra.mxu2 %v1149_v51 }
 0x1d0   : > { %758 = vmax.xlane.f32.xlu0 %v757_v54 }
 0x1d2   : > { %v696_v56 = vpop.f32.mrf.mxu3 }
 0x1d3   : > { %939 = vmatpush.bf16.msra.mxu2 %v1148_v52 }
 0x1d4   : > { %v755_v57 = vpop.f32.mrf.mxu0 }
 0x1da   : > { %v805_v59 = vpop.f32.mrf.mxu2 }
 0x1db   : > { %v806_v60 = vadd.f32 %v1184_v45, %v805_v59 }
 0x1dc   : > { %v857_v61 = vpop.f32.mrf.mxu0 }
 0x1dd   : > { %v858_v62 = vadd.f32 %v1184_v45, %v857_v61  ;;  %v809_v63 = vsel %vm698_vm5, %v806_v60, -inf }
 0x1de   : > { %810 = vmax.xlane.f32.xlu1 %v809_v63 }
 0x1df   : > { %v861_v0 = vsel %vm698_vm5, %v858_v62, -inf }
 0x1e0   : > { %862 = vmax.xlane.f32.xlu2 %v861_v0 }
 0x1e2   : > { %v807_v1 = vpop.f32.mrf.mxu2 }
 0x1e4   : > { %v859_v2 = vpop.f32.mrf.mxu0 }
 0x1e5   : > { %v1239_v2 = vmov 32.0  }
 0x1f8   : > { %769 = vrot.lane.b32.xlu2 %v1147_v58, %s1233_s19  ;;  %s1236_s19 = smov 8  }
 0x241   : > { %v701_v3 = vpop.xlane.xlu2 %700 }
 0x242   : > { %v702_v4 = vsub.f32 %v695_v48, %v701_v3 }
 0x243   : > { %v759_v5 = vpop.xlane.xlu0 %758 }
 0x244   : > { %v703_v7 = vmul.f32 1.442695, %v702_v4  ;;  %v760_v8 = vsub.f32 %v754_v50, %v759_v5 }
 0x246   : > { %1189 = vpow2.f32 %v703_v7  ;;  %v761_v9 = vmul.f32 1.442695, %v760_v8 }
 0x248   : > { %1191 = vpow2.f32 %v761_v9 }
 0x24c   : > { %v1190_v10 = vpop.eup %1189 }
 0x24d   : > { %v705_v11 = vsel %vm698_vm5, %v1190_v10, 0.0 }
 0x24e   : > { %v1192_v12 = vpop.eup %1191  ;;  %706 = vadd.xlane.f32.xlu2 %v705_v11 }
 0x24f   : > { %v763_v13 = vsel %vm698_vm5, %v1192_v12, 0.0 }
 0x250   : > { %764 = vadd.xlane.f32.xlu1 %v763_v13 }
 0x251   : > { %v811_v14 = vpop.xlane.xlu1 %810 }
 0x252   : > { %v812_v15 = vsub.f32 %v806_v60, %v811_v14  ;;  %v1186_v60 = vld [vmem:[%s1461_s10] ss:$0 sm:$0xff] }
 0x253   : > { %v863_v16 = vpop.xlane.xlu2 %862 }
 0x254   : > { %v813_v17 = vmul.f32 1.442695, %v812_v15  ;;  %v864_v18 = vsub.f32 %v858_v62, %v863_v16 }
 0x256   : > { %1193 = vpow2.f32 %v813_v17  ;;  %v865_v19 = vmul.f32 1.442695, %v864_v18 }
 0x258   : > { %1195 = vpow2.f32 %v865_v19 }
 0x25b   : > { %v770_v22 = vpop.permute.xlu2 %769 }
 0x25c   : > { %v1194_v20 = vpop.eup %1193  ;;  %782 = vmatpush.bf16.msrb.mxu1 %v770_v22 }
 0x25d   : > { %v815_v21 = vsel %vm698_vm5, %v1194_v20, 0.0 }
 0x25e   : > { %816 = vadd.xlane.f32.xlu1 %v815_v21  ;;  %v1196_v23 = vpop.eup %1195 }
 0x25f   : > { %v867_v24 = vsel %vm698_vm5, %v1196_v23, 0.0 }
 0x266   : > { %873 = vrot.lane.b32.xlu2 %v1147_v58, %s1234_s20  ;;  %868 = vadd.xlane.f32.xlu1 %v867_v24  ;;  %s1237_s20 = smov 24  }
 0x27f   : > { %821 = vrot.lane.b32.xlu1 %v1147_v58, %s1235_s22  ;;  %s1238_s22 = smov 16  }
 0x2c1   : > { %v707_v25 = vpop.xlane.xlu2 %706 }
 0x2c2   : > { %1197 = vrcp.f32 %v707_v25  ;;  %v1188_v25 = vld [vmem:[%s1463_s12] ss:$0 sm:$0xff] }
 0x2c3   : > { %v765_v26 = vpop.xlane.xlu1 %764 }
 0x2c4   : > { %1199 = vrcp.f32 %v765_v26 }
 0x2c8   : > { %v1198_v27 = vpop.eup %1197 }
 0x2c9   : > { %v709_v28 = vmul.f32 %v1198_v27, %v1190_v10  ;;  %v874_v29 = vpop.permute.xlu2 %873 }
 0x2ca   : > { %v1200_v30 = vpop.eup %1199  ;;  %886 = vmatpush.bf16.msra.mxu1 %v874_v29 }
 0x2cb   : > { %v767_v31 = vmul.f32 %v1200_v30, %v1192_v12  ;;  %v710_v32 = vpack.c.bf16 %v709_v28, %v709_v28 }
 0x2cd   : > { %1122 = vmatmul.msk.bf16.vlgmr.msrb.gmra.mxu3 %vm698_vm5, %v710_v32  ;;  %v768_v33 = vpack.c.bf16 %v767_v31, %v767_v31 }
 0x2cf   : > { %1124 = vmatmul.msk.bf16.vlgmr.msrb.gmra.mxu1 %vm698_vm5, %v768_v33 }
 0x2d1   : > { %v817_v34 = vpop.xlane.xlu1 %816 }
 0x2d9   : > { %v869_v35 = vpop.xlane.xlu1 %868 }
 0x2da   : > { %1201 = vrcp.f32 %v869_v35 }
 0x2db   : > { %1203 = vrcp.f32 %v817_v34 }
 0x2dc   : > { %1205 = vrcp.f32 %v1239_v2 }
 0x2e0   : > { %v1202_v36 = vpop.eup %1201 }
 0x2e1   : > { %v871_v37 = vmul.f32 %v1202_v36, %v1196_v23  ;;  %v1204_v39 = vpop.eup %1203  ;;  %v1187_v23 = vld [vmem:[%s1462_s11] ss:$0 sm:$0xff] }
 0x2e2   : > { %v819_v40 = vmul.f32 %v1204_v39, %v1194_v20  ;;  %v1206_v3 = vpop.eup %1205 }
 0x2e3   : > { %v872_v38 = vpack.c.bf16 %v871_v37, %v871_v37  ;;  %v952_v4 = vmul.f32 32.0, %v1206_v3  ;;  %vm956_vm7 = vweird.f32 %v1206_v3 }
 0x2e4   : > { %v820_v42 = vpack.c.bf16 %v819_v40, %v819_v40 }
 0x2e5   : > { %1128 = vmatmul.msk.bf16.vlgmr.msra.gmra.mxu1 %vm698_vm5, %v872_v38  ;;  %v953_v5 = vsub.f32 1.0, %v952_v4 }
 0x2e7   : > { %v954_v7 = vmul.f32 %v1206_v3, %v953_v5 }
 0x2e9   : > { %v955_v8 = vadd.f32 %v1206_v3, %v954_v7 }
 0x2eb   : > { %v957_v9 = vsel %vm956_vm7, %v1206_v3, %v955_v8 }
 0x2f1   : > { %v822_v41 = vpop.permute.xlu1 %821 }
 0x2f2   : > { %834 = vmatpush.bf16.msra.mxu3 %v822_v41 }
 0x2f5   : > { %1126 = vmatmul.msk.bf16.vlgmr.msra.gmra.mxu3 %vm698_vm5, %v820_v42 }
 0x34c   : > { %v784_v43 = vpop.f32.mrf.mxu1 }
 0x34d   : > { %893 = vrot.lane.b32.xlu2 %v784_v43, %s1236_s19 }
 0x350   : > { %v729_v44 = vpop.f32.mrf.mxu3 }
 0x354   : > { %v786_v45 = vpop.f32.mrf.mxu1 }
 0x358   : > { %v731_v46 = vpop.f32.mrf.mxu3 }
 0x362   : > { %v888_v47 = vpop.f32.mrf.mxu1 }
 0x363   : > { %901 = vrot.lane.b32.xlu1 %v888_v47, %s1237_s20 }
 0x36a   : > { %v890_v48 = vpop.f32.mrf.mxu1 }
 0x378   : > { %v836_v49 = vpop.f32.mrf.mxu3 }
 0x379   : > { %897 = vrot.lane.b32.xlu2 %v836_v49, %s1238_s22 }
 0x380   : > { %v838_v50 = vpop.f32.mrf.mxu3 }
 0x3a7   : > { %v894_v53 = vpop.permute.xlu2 %893 }
 0x3a8   : > { %v904_v54 = vsel %vm677_vm3, %v729_v44, %v894_v53 }
 0x3d3   : > { %v898_v55 = vpop.permute.xlu2 %897 }
 0x3d4   : > { %v905_v56 = vsel %vm698_vm5, %v904_v54, %v898_v55 }
 0x3d5   : > { %v902_v57 = vpop.permute.xlu1 %901 }
 0x3d6   : > { %v907_v58 = vsel %vm906_vm6, %v905_v56, %v902_v57 }
 0x3d7   : > { %v908_v59 = vpack.c.bf16 %v907_v58, %v907_v58 }
 0x3d9   : > { %1137 = vmatmul.msk.bf16.vlgmr.msra.gmra.mxu2 %vm529_vm0, %v908_v59 }
 0x45c   : > { %v941_v61 = vpop.f32.mrf.mxu2 }
 0x45d   : > { %v942_v62 = vadd.f32 %v1186_v60, %v941_v61 }
 0x45f   : > { %v945_v63 = vadd.f32 %v942_v62, %v1352_v6 }
 0x461   : > { %v948_v0 = vsel %vm529_vm0, %v945_v63, 0.0 }
 0x462   : > { %949 = vadd.xlane.f32.xlu2 %v948_v0 }
 0x464   : > { %v943_v1 = vpop.f32.mrf.mxu2 }
 0x4d5   : > { %v950_v10 = vpop.xlane.xlu2 %949 }
 0x4d6   : > { %v958_v11 = vmul.f32 %v957_v9, %v950_v10 }
 0x4d8   : > { %v959_v12 = vsub.f32 %v945_v63, %v958_v11 }
 0x4da   : > { %v960_v13 = vmul.f32 %v959_v12, %v959_v12 }
 0x4dc   : > { %v961_v14 = vsel %vm529_vm0, %v960_v13, 0.0 }
 0x4dd   : > { %962 = vadd.xlane.f32.xlu1 %v961_v14 }
 0x550   : > { %v963_v6 = vpop.xlane.xlu1 %962 }
 0x551   : > { %v964_v15 = vmul.f32 %v963_v6, %v957_v9 }
 0x553   : > { %v965_v16 = vadd.f32 1e-12, %v964_v15 }
 0x555   : > { %1207 = vrsqrt.f32 %v965_v16  ;;  %vm972_vm9 = vweird.f32 %v965_v16 }
 0x55b   : > { %v1208_v17 = vpop.eup %1207 }
 0x55c   : > { %v967_v18 = vmul.f32 %v1208_v17, %v965_v16  ;;  %vm973_vm8 = vweird.f32 %v1208_v17 }
 0x55d   : > { %vm974_vm10 = vmor %vm972_vm9, %vm973_vm8 }
 0x55e   : > { %v968_v19 = vmul.f32 %v1208_v17, %v967_v18 }
 0x560   : > { %v969_v20 = vmul.f32 0.5, %v968_v19 }
 0x562   : > { %v970_v21 = vsub.f32 1.5, %v969_v20 }
 0x564   : > { %v971_v22 = vmul.f32 %v1208_v17, %v970_v21 }
 0x566   : > { %v975_v24 = vsel %vm974_vm10, %v1208_v17, %v971_v22 }
 0x567   : > { %v976_v26 = vmul.f32 %v975_v24, %v959_v12 }
 0x569   : > { %v980_v27 = vmul.f32 %v1187_v23, %v976_v26 }
 0x56b   : > { %v984_v28 = vadd.f32 %v1188_v25, %v980_v27 }
 0x56d   : > { %985 = vst.msk [vmem:[%s500_s29] sm:$0xff] %vm529_vm0, %v984_v28 }
 0x56e PF: > { %s23_s27 = sadd.s32 1, %s1231_s27   ;;  %s1465_s25 = smov %s1227_s26 }
 0x56f   : > { %p20_p5 = scmp.ge.s32.totalorder %s23_s27, 4   ;;  %s1466_s26 = smov %s1468_s28 }
 0x571   :  { %22 = sbr.rel (!%p20_p5) target bundleno = 2 (0x2), region = 112 }

// kernel: lxrt_x_layer.7
= control target key start
LH: loop header
LB: loop body
LE: loop exit
PB: predicated region body
PF: predicated region fallthrough
CT: control target
= control target key end

     0   :  { %s1462_s25 = smov 0   ;;  %s1464_s26 = smov 0   ;;  %s1639_s0 = inlined_call_operand.vmem [shape: f32[2,16,32], index: 0, kind: input, shape index: {}]   ;;  %s1640_s1 = inlined_call_operand.vmem [shape: f32[2,8,32], index: 1, kind: input, shape index: {}]   ;;  %s1641_s2 = inlined_call_operand.vmem [shape: f32[2,1,8], index: 2, kind: input, shape index: {}]   ;;  %s1642_s3 = inlined_call_operand.vmem [shape: bf16[32,32], index: 3, kind: input, shape index: {}]   ;;  %s1643_s4 = inlined_call_operand.vmem [shape: f32[1,32], index: 4, kind: input, shape index: {}]   ;;  %s1644_s5 = inlined_call_operand.vmem [shape: bf16[32,32], index: 5, kind: input, shape index: {}]   ;;  %s1645_s6 = inlined_call_operand.vmem [shape: f32[1,32], index: 6, kind: input, shape index: {}]   ;;  %s1646_s7 = inlined_call_operand.vmem [shape: bf16[32,32], index: 7, kind: input, shape index: {}]   ;;  %s1647_s8 = inlined_call_operand.vmem [shape: f32[1,32], index: 8, kind: input, shape index: {}]   ;;  %s1648_s9 = inlined_call_operand.vmem [shape: bf16[32,32], index: 9, kind: input, shape index: {}]   ;;  %s1649_s10 = inlined_call_operand.vmem [shape: f32[1,32], index: 10, kind: input, shape index: {}]   ;;  %s1650_s11 = inlined_call_operand.vmem [shape: f32[1,32], index: 11, kind: input, shape index: {}]   ;;  %s1651_s12 = inlined_call_operand.vmem [shape: f32[1,32], index: 12, kind: input, shape index: {}]   ;;  %s1652_s13 = inlined_call_operand.vmem [shape: f32[2,16,32], index: 13, kind: output, shape index: {}]  }
   0x1   :  { %s1466_s27 = smov 0  }
   0x2 LB: > { %s35_s28 = sadd.s32 1, %s1379_s26  ;;  %p1207_p0 = scmp.ge.s32.totalorder %s1383_s27, 1  ;;  %s1383_s27 = sphi %s1466_s27, %s23_s27   ;;  %s1379_s26 = sphi %s1464_s26, %s1654_s26   ;;  %s1375_s25 = sphi %s1462_s25, %s1653_s25  }
   0x3   : > { %p37_p1 = scmp.ge.s32.totalorder %s35_s28, 2  ;;  %p425_p2 = scmp.lt.s32.totalorder %s1383_s27, 3 }
   0x5   : > { %s1656_s28 = smov (%p37_p1, %s35_s28), 0  ;;  %p426_p3 = pnand %p1207_p0, %p425_p2 }
   0x6   : > { %p485_p4 = scmp.lt.s32.totalorder (!%p426_p3), %s1375_s25, 1  ;;  %s1385_s22 = smov (!%p426_p3), 112  }
   0x7   : > { %429 = sbr.rel (%p426_p3) target bundleno = 1515 (0x5eb), region = 72  ;;  %s1386_s24 = smov (!%p426_p3), 104  }
   0x8   : > { %s1387_s29 = smov (!%p426_p3), 120   ;;  %s1388_s21 = smov (!%p426_p3), 8  }
   0xc   : > { %v1262_v0 = vld [vmem:[%s1644_s5 + $0x8] sm:$0xff]  ;;  %v1261_v2 = vld [vmem:[%s1644_s5] sm:$0xff]  ;;  %s1658_s25 = smov (!%p485_p4, %s1375_s25), 1  ;;  %vm538_vm0 = vcmask 261120   ;;  %vm624_vm1 = vcmask 60416   ;;  %vm693_vm2 = vcmask 1043456  }
   0xd   : > { %v1266_v1 = vld [vmem:[%s1642_s3 + $0x8] sm:$0xff]  ;;  %548 = vmatpush.bf16.msra.mxu0 %v1262_v0  ;;  %v1265_v3 = vld [vmem:[%s1642_s3] sm:$0xff]  ;;  %s1210_s20 = sshll.u32 %s1658_s25, 3  ;;  %s500_s23 = scalar_lea.vmem %s1641_s2, %s1658_s25  ;;  %vm689_vm3 = vcmask 64512   ;;  %vm630_vm4 = vcmask 257024   ;;  %vm984_vm5 = vcmask 130048  }
   0xe   : > { %665 = vmatpush.bf16.msra.mxu2 %v1266_v1  ;;  %s497_s30 = scalar_lea.vmem %s1640_s1, %s1210_s20  ;;  %s1259_s14 = sshll.u32 %s1658_s25, 4  ;;  %v1317_v9 = vld [vmem:[%s1645_s6] ss:$0 sm:$0xff]  ;;  %v1264_v42 = vld [vmem:[%s1646_s7 + $0x8] sm:$0xff]  ;;  %vm987_vm6 = vcmask 195584  }
   0xf   : > { %v516_v4 = vld [vmem:[%s497_s30] sm:$0xff]  ;;  %s492_s17 = scalar_lea.vmem %s1639_s0, %s1259_s14  ;;  %581 = vmatpush.bf16.msra.mxu1 %v1264_v42 }
  0x10   : > { %v1508_v5 = vpack.c.bf16 %v516_v4, %v516_v4  ;;  %v1510_v6 = vld [vmem:[%s492_s17] sm:$0xff]  ;;  %v1512_v7 = vld [vmem:[%s492_s17 + $0x8] sm:$0xff] }
  0x11   : > { %549 = vmatpush.bf16.msra.mxu0 %v1261_v2  ;;  %v634_v8 = vpack.c.bf16 %v1512_v7, %v1510_v6  ;;  %v1318_v12 = vld [vmem:[%s1643_s4] ss:$0 sm:$0xff] }
  0x12   : > { %666 = vmatpush.bf16.msra.mxu2 %v1265_v3  ;;  %v1316_v43 = vld [vmem:[%s500_s23] ss:$0 sm:$0xff] }
  0x13   : > { %v1263_v53 = vld [vmem:[%s1646_s7] sm:$0xff] }
  0x14   : > { %1221 = vmatmul.msk.bf16.vlgmr.msra.gmra.mxu0 %vm538_vm0, %v1508_v5  ;;  %582 = vmatpush.bf16.msra.mxu1 %v1263_v53 }
  0x15   : > { %1239 = vmatmul.msk.bf16.vlgmr.msra.gmra.mxu2 %vm538_vm0, %v634_v8 }
  0x17   : > { %1230 = vmatmul.msk.bf16.vlgmr.msra.gmra.mxu1 %vm538_vm0, %v1508_v5 }
  0x91   : > { %v551_v10 = vpop.f32.mrf.mxu0 }
  0x92   : > { %v552_v11 = vadd.f32 %v1317_v9, %v551_v10 }
  0x94   : > { %588 = vxpose.xlu0.b32.start.end [1/1] (short) (narrow) %v552_v11, 32 }
  0x98   : > { %v668_v13 = vpop.f32.mrf.mxu2 }
  0x99   : > { %v553_v14 = vpop.f32.mrf.mxu0  ;;  %v669_v15 = vadd.f32 %v1318_v12, %v668_v13 }
  0x9b   : > { %v673_v16 = vpack.c.bf16 %v669_v15, %v669_v15 }
  0x9d   : > { %v686_v19 = vunpack.c.l.b16 %v673_v16 }
  0xa0   : > { %v670_v17 = vpop.f32.mrf.mxu2 }
  0xa1   : > { %v671_v18 = vadd.f32 %v1318_v12, %v670_v17 }
  0xa3   : > { %v674_v20 = vpack.c.bf16 %v671_v18, %v671_v18 }
  0xa5   : > { %v687_v21 = vunpack.c.l.b16 %v674_v20 }
  0xa7   : > { %v688_v22 = vpack.c.b16 %v687_v21, %v686_v19 }
  0xa9   : > { %824 = vrot.lane.b32.xlu1 %v688_v22, %s1385_s22 }
  0xb1   : > { %891 = vrot.lane.b32.xlu1 %v688_v22, %s1386_s24 }
 0x11a   : > { %754 = vrot.lane.b32.xlu0 %v688_v22, %s1387_s29 }
 0x11b   : > { %v825_v37 = vpop.permute.xlu1 %824 }
 0x123   : > { %v892_v41 = vpop.permute.xlu1 %891 }
 0x138   : > { %v604_v23 = vpop.trf.xlu0 }
 0x139   : > { %v620_v24 = vpack.c.bf16 %v604_v23, %v604_v23  ;;  %v1319_v23 = vld [vmem:[%s1647_s8] ss:$0 sm:$0xff] }
 0x13b   : > { %625 = vst.msk [vmem:[#allocation2] sm:$0xf] %vm624_vm1, %v620_v24 }
 0x140   : > { %v605_v25 = vpop.trf.xlu0 }
 0x141   : > { %v621_v26 = vpack.c.bf16 %v605_v25, %v605_v25 }
 0x142   : > { %v675_v27 = vld [vmem:[#allocation2] sm:$0xf] }
 0x143   : > { %626 = vst.msk [vmem:[#allocation2 + $0x4] sm:$0xf] %vm624_vm1, %v621_v26  ;;  %v695_v28 = vsel %vm693_vm2, %v675_v27, 0 }
 0x144   : > { %704 = vmatpush.bf16.msra.mxu3 %v695_v28 }
 0x147   : > { %1240 = vmatmul.msk.bf16.vlgmr.msra.gmra.mxu3 %vm689_vm3, %v688_v22  ;;  %v584_v22 = vpop.f32.mrf.mxu1 }
 0x148   : > { %v606_v29 = vpop.trf.xlu0  ;;  %v585_v24 = vadd.f32 %v1319_v23, %v584_v22 }
 0x149   : > { %v622_v30 = vpack.c.bf16 %v606_v29, %v606_v29 }
 0x14a   : > { %v676_v31 = vld [vmem:[#allocation2 + $0x4] sm:$0xf]  ;;  %v629_v25 = vpack.c.bf16 %v585_v24, %v585_v24 }
 0x14b   : > { %627 = vst.msk [vmem:[#allocation2 + $0x8] sm:$0xf] %vm624_vm1, %v622_v30  ;;  %v760_v32 = vsel %vm693_vm2, %v676_v31, 0 }
 0x14c   : > { %769 = vmatpush.bf16.msrb.mxu0 %v760_v32  ;;  %631 = vst.msk [vmem:[#allocation3] sm:$0xf] %vm630_vm4, %v629_v25 }
 0x14f   : > { %v586_v26 = vpop.f32.mrf.mxu1 }
 0x150   : > { %v607_v33 = vpop.trf.xlu0 }
 0x151   : > { %v623_v34 = vpack.c.bf16 %v607_v33, %v607_v33 }
 0x152   : > { %v677_v35 = vld [vmem:[#allocation2 + $0x8] sm:$0xf] }
 0x153   : > { %v830_v36 = vsel %vm693_vm2, %v677_v35, 0  ;;  %628 = vst.msk [vmem:[#allocation2 + $0xc] sm:$0xf] %vm624_vm1, %v623_v34  ;;  %v679_v28 = vld [vmem:[#allocation3] sm:$0xf] }
 0x154   : > { %839 = vmatpush.bf16.msrb.mxu2 %v830_v36  ;;  %v738_v30 = vsel %vm693_vm2, %v679_v28, 0 }
 0x155   : > { %747 = vmatpush.bf16.msrb.mxu3 %v738_v30 }
 0x157   : > { %1244 = vmatmul.msk.bf16.vlgmr.msrb.gmra.mxu2 %vm689_vm3, %v825_v37 }
 0x15a   : > { %v678_v38 = vld [vmem:[#allocation2 + $0xc] sm:$0xf] }
 0x15b   : > { %v897_v39 = vsel %vm693_vm2, %v678_v38, 0 }
 0x15c   : > { %906 = vmatpush.bf16.msra.mxu0 %v897_v39 }
 0x18c   : > { %v755_v40 = vpop.permute.xlu0 %754 }
 0x18d   : > { %1242 = vmatmul.msk.bf16.vlgmr.msrb.gmra.mxu0 %vm689_vm3, %v755_v40 }
 0x19d   : > { %1246 = vmatmul.msk.bf16.vlgmr.msra.gmra.mxu0 %vm689_vm3, %v892_v41 }
 0x1ca   : > { %v706_v44 = vpop.f32.mrf.mxu3 }
 0x1cb   : > { %v707_v45 = vadd.f32 %v1316_v43, %v706_v44 }
 0x1cd   : > { %v711_v46 = vsel %vm689_vm3, %v707_v45, -inf }
 0x1ce   : > { %712 = vmax.xlane.f32.xlu2 %v711_v46 }
 0x1d2   : > { %v708_v47 = vpop.f32.mrf.mxu3 }
 0x1d3   : > { %v709_v48 = vadd.f32 %v1316_v43, %v708_v47  ;;  %v800_v47 = vunpack.c.l.b16 %v679_v28 }
 0x1d5   : > { %v714_v49 = vsel %vm689_vm3, %v709_v48, -inf }
 0x1d6   : > { %715 = vmax.xlane.f32.xlu2 %v714_v49 }
 0x1da   : > { %v841_v50 = vpop.f32.mrf.mxu2 }
 0x1db   : > { %v842_v51 = vadd.f32 %v1316_v43, %v841_v50 }
 0x1dd   : > { %v846_v52 = vsel %vm689_vm3, %v842_v51, -inf }
 0x1de   : > { %847 = vmax.xlane.f32.xlu2 %v846_v52 }
 0x1e2   : > { %v843_v60 = vpop.f32.mrf.mxu2 }
 0x1e3   : > { %v844_v61 = vadd.f32 %v1316_v43, %v843_v60 }
 0x1e5   : > { %v849_v63 = vsel %vm689_vm3, %v844_v61, -inf }
 0x20a   : > { %v771_v54 = vpop.f32.mrf.mxu0 }
 0x20b   : > { %v772_v55 = vadd.f32 %v1316_v43, %v771_v54 }
 0x20d   : > { %v776_v56 = vsel %vm689_vm3, %v772_v55, -inf }
 0x20e   : > { %777 = vmax.xlane.f32.xlu1 %v776_v56 }
 0x212   : > { %v773_v57 = vpop.f32.mrf.mxu0 }
 0x213   : > { %v774_v58 = vadd.f32 %v1316_v43, %v773_v57 }
 0x215   : > { %v779_v59 = vsel %vm689_vm3, %v774_v58, -inf }
 0x216   : > { %780 = vmax.xlane.f32.xlu2 %v779_v59 }
 0x21a   : > { %v908_v62 = vpop.f32.mrf.mxu0 }
 0x21b   : > { %v909_v0 = vadd.f32 %v1316_v43, %v908_v62 }
 0x21d   : > { %v913_v1 = vsel %vm689_vm3, %v909_v0, -inf }
 0x21e   : > { %850 = vmax.xlane.f32.xlu2 %v849_v63 }
 0x222   : > { %v910_v2 = vpop.f32.mrf.mxu0 }
 0x223   : > { %v1560_v3 = vadd.f32 %v1316_v43, %v910_v2 }
 0x225   : > { %v916_v4 = vsel %vm689_vm3, %v1560_v3, -inf }
 0x226   : > { %914 = vmax.xlane.f32.xlu2 %v913_v1 }
 0x22e   : > { %917 = vmax.xlane.f32.xlu2 %v916_v4 }
 0x241   : > { %v713_v5 = vpop.xlane.xlu2 %712 }
 0x242   : > { %v717_v8 = vsub.f32 %v707_v45, %v713_v5 }
 0x244   : > { %v719_v9 = vmul.f32 1.442695, %v717_v8 }
 0x246   : > { %1323 = vpow2.f32 %v719_v9 }
 0x249   : > { %v716_v10 = vpop.xlane.xlu2 %715 }
 0x24a   : > { %v718_v11 = vsub.f32 %v709_v48, %v716_v10  ;;  %v801_v48 = vpack.c.b16 %v800_v47, %v800_v47 }
 0x24c   : > { %v1564_v12 = vpop.eup %1323  ;;  %v721_v13 = vmul.f32 1.442695, %v718_v11 }
 0x24d   : > { %v723_v14 = vsel %vm689_vm3, %v1564_v12, 0.0 }
 0x24e   : > { %1325 = vpow2.f32 %v721_v13  ;;  %724 = vadd.xlane.f32.xlu2 %v723_v14 }
 0x251   : > { %v848_v15 = vpop.xlane.xlu2 %847 }
 0x252   : > { %v852_v16 = vsub.f32 %v842_v51, %v848_v15 }
 0x254   : > { %v1568_v17 = vpop.eup %1325  ;;  %v854_v18 = vmul.f32 1.442695, %v852_v16 }
 0x255   : > { %v726_v19 = vsel %vm689_vm3, %v1568_v17, 0.0 }
 0x256   : > { %1327 = vpow2.f32 %v854_v18  ;;  %727 = vadd.xlane.f32.xlu1 %v726_v19 }
 0x25c   : > { %v1572_v20 = vpop.eup %1327 }
 0x25d   : > { %v858_v21 = vsel %vm689_vm3, %v1572_v20, 0.0 }
 0x25e   : > { %859 = vadd.xlane.f32.xlu1 %v858_v21 }
 0x281   : > { %v778_v27 = vpop.xlane.xlu1 %777 }
 0x282   : > { %v782_v29 = vsub.f32 %v772_v55, %v778_v27 }
 0x284   : > { %v784_v31 = vmul.f32 1.442695, %v782_v29 }
 0x286   : > { %1329 = vpow2.f32 %v784_v31 }
 0x289   : > { %v781_v32 = vpop.xlane.xlu2 %780 }
 0x28a   : > { %v783_v33 = vsub.f32 %v774_v58, %v781_v32 }
 0x28c   : > { %v1330_v34 = vpop.eup %1329  ;;  %v786_v35 = vmul.f32 1.442695, %v783_v33 }
 0x28d   : > { %v788_v36 = vsel %vm689_vm3, %v1330_v34, 0.0 }
 0x28e   : > { %1331 = vpow2.f32 %v786_v35  ;;  %789 = vadd.xlane.f32.xlu2 %v788_v36 }
 0x291   : > { %v851_v37 = vpop.xlane.xlu2 %850 }
 0x292   : > { %v853_v38 = vsub.f32 %v844_v61, %v851_v37 }
 0x294   : > { %v1332_v39 = vpop.eup %1331  ;;  %v856_v40 = vmul.f32 1.442695, %v853_v38 }
 0x295   : > { %v791_v41 = vsel %vm689_vm3, %v1332_v39, 0.0 }
 0x296   : > { %1333 = vpow2.f32 %v856_v40  ;;  %792 = vadd.xlane.f32.xlu1 %v791_v41  ;;  %v1267_v40 = vld [vmem:[%s1648_s9] sm:$0xff] }
 0x299   : > { %v915_v42 = vpop.xlane.xlu2 %914 }
 0x29a   : > { %v919_v43 = vsub.f32 %v909_v0, %v915_v42 }
 0x29c   : > { %v1334_v44 = vpop.eup %1333  ;;  %v921_v45 = vmul.f32 1.442695, %v919_v43 }
 0x29d   : > { %v861_v46 = vsel %vm689_vm3, %v1334_v44, 0.0 }
 0x29e   : > { %1335 = vpow2.f32 %v921_v45  ;;  %862 = vadd.xlane.f32.xlu1 %v861_v46 }
 0x2a1   : > { %v918_v51 = vpop.xlane.xlu2 %917 }
 0x2a2   : > { %v920_v52 = vsub.f32 %v1560_v3, %v918_v51 }
 0x2a4   : > { %v1336_v49 = vpop.eup %1335  ;;  %v923_v53 = vmul.f32 1.442695, %v920_v52 }
 0x2a5   : > { %v925_v50 = vsel %vm689_vm3, %v1336_v49, 0.0 }
 0x2a6   : > { %802 = vrot.lane.b32.xlu2 %v801_v48, %s1387_s29  ;;  %926 = vadd.xlane.f32.xlu1 %v925_v50  ;;  %1337 = vpow2.f32 %v923_v53  ;;  %s509_s29 = scalar_lea.vmem %s1652_s13, %s1259_s14 }
 0x2ac   : > { %v1338_v56 = vpop.eup %1337 }
 0x2ad   : > { %v928_v58 = vsel %vm689_vm3, %v1338_v56, 0.0 }
 0x2bf   : > { %869 = vrot.lane.b32.xlu1 %v801_v48, %s1385_s22  ;;  %s1389_s22 = smov 16  }
 0x2c1   : > { %v725_v54 = vpop.xlane.xlu2 %724 }
 0x2c2   : > { %1339 = vrcp.f32 %v725_v54 }
 0x2c7   : > { %936 = vrot.lane.b32.xlu1 %v801_v48, %s1386_s24  ;;  %s1390_s24 = smov 24  }
 0x2c8   : > { %v1340_v57 = vpop.eup %1339 }
 0x2c9   : > { %v728_v55 = vpop.xlane.xlu1 %727  ;;  %v731_v60 = vmul.f32 %v1340_v57, %v1564_v12  ;;  %v1320_v57 = vld [vmem:[%s1649_s10] ss:$0 sm:$0xff] }
 0x2ca   : > { %1341 = vrcp.f32 %v728_v55 }
 0x2cf   : > { %929 = vadd.xlane.f32.xlu2 %v928_v58 }
 0x2d0   : > { %v1342_v59 = vpop.eup %1341 }
 0x2d1   : > { %v732_v61 = vmul.f32 %v1342_v59, %v1568_v17  ;;  %v860_v63 = vpop.xlane.xlu1 %859 }
 0x2d3   : > { %v733_v62 = vpack.c.bf16 %v732_v61, %v731_v60 }
 0x2d5   : > { %1241 = vmatmul.msk.bf16.vlgmr.msrb.gmra.mxu3 %vm689_vm3, %v733_v62 }
 0x301   : > { %v790_v0 = vpop.xlane.xlu2 %789 }
 0x302   : > { %1343 = vrcp.f32 %v790_v0 }
 0x308   : > { %v1344_v4 = vpop.eup %1343 }
 0x309   : > { %v793_v1 = vpop.xlane.xlu1 %792  ;;  %v803_v2 = vpop.permute.xlu2 %802  ;;  %v796_v8 = vmul.f32 %v1344_v4, %v1330_v34 }
 0x30a   : > { %1345 = vrcp.f32 %v793_v1  ;;  %v808_v3 = vsel %vm693_vm2, %v803_v2, 0  ;;  %v1391_v2 = vmov 32.0  }
 0x30b   : > { %817 = vmatpush.bf16.msrb.mxu1 %v808_v3 }
 0x310   : > { %v1346_v5 = vpop.eup %1345 }
 0x311   : > { %v797_v9 = vmul.f32 %v1346_v5, %v1332_v39  ;;  %v863_v11 = vpop.xlane.xlu1 %862  ;;  %v1268_v39 = vld [vmem:[%s1648_s9 + $0x8] sm:$0xff] }
 0x312   : > { %1347 = vrcp.f32 %v863_v11  ;;  %1020 = vmatpush.bf16.msra.mxu2 %v1268_v39 }
 0x313   : > { %v798_v10 = vpack.c.bf16 %v797_v9, %v796_v8  ;;  %1349 = vrcp.f32 %v860_v63 }
 0x315   : > { %1243 = vmatmul.msk.bf16.vlgmr.msrb.gmra.mxu1 %vm689_vm3, %v798_v10 }
 0x316   : > { %1021 = vmatpush.bf16.msra.mxu2 %v1267_v40 }
 0x318   : > { %v1348_v13 = vpop.eup %1347 }
 0x319   : > { %v927_v12 = vpop.xlane.xlu1 %926  ;;  %v1350_v14 = vpop.eup %1349  ;;  %v867_v15 = vmul.f32 %v1348_v13, %v1334_v44 }
 0x31a   : > { %v866_v17 = vmul.f32 %v1350_v14, %v1572_v20  ;;  %1351 = vrcp.f32 %v927_v12 }
 0x31c   : > { %v868_v19 = vpack.c.bf16 %v867_v15, %v866_v17 }
 0x320   : > { %v1352_v24 = vpop.eup %1351 }
 0x321   : > { %v933_v26 = vmul.f32 %v1352_v24, %v1336_v49 }
 0x331   : > { %v870_v16 = vpop.permute.xlu1 %869 }
 0x332   : > { %v875_v18 = vsel %vm693_vm2, %v870_v16, 0 }
 0x333   : > { %884 = vmatpush.bf16.msra.mxu3 %v875_v18 }
 0x336   : > { %1245 = vmatmul.msk.bf16.vlgmr.msra.gmra.mxu3 %vm689_vm3, %v868_v19 }
 0x339   : > { %v937_v21 = vpop.permute.xlu1 %936 }
 0x33a   : > { %v942_v22 = vsel %vm693_vm2, %v937_v21, 0 }
 0x33b   : > { %951 = vmatpush.bf16.msra.mxu1 %v942_v22 }
 0x342   : > { %v930_v23 = vpop.xlane.xlu2 %929 }
 0x343   : > { %1353 = vrcp.f32 %v930_v23 }
 0x344   : > { %1355 = vrcp.f32 %v1391_v2 }
 0x349   : > { %v1354_v25 = vpop.eup %1353 }
 0x34a   : > { %v934_v27 = vmul.f32 %v1354_v25, %v1338_v56  ;;  %v1356_v3 = vpop.eup %1355 }
 0x34b   : > { %v1039_v4 = vmul.f32 32.0, %v1356_v3  ;;  %vm1043_vm7 = vweird.f32 %v1356_v3 }
 0x34c   : > { %v935_v28 = vpack.c.bf16 %v934_v27, %v933_v26 }
 0x34d   : > { %v1040_v5 = vsub.f32 1.0, %v1039_v4 }
 0x34e   : > { %1247 = vmatmul.msk.bf16.vlgmr.msra.gmra.mxu1 %vm689_vm3, %v935_v28 }
 0x34f   : > { %v1041_v8 = vmul.f32 %v1356_v3, %v1040_v5 }
 0x351   : > { %v1042_v9 = vadd.f32 %v1356_v3, %v1041_v8 }
 0x353   : > { %v1044_v10 = vsel %vm1043_vm7, %v1356_v3, %v1042_v9 }
 0x358   : > { %v749_v31 = vpop.f32.mrf.mxu3 }
 0x360   : > { %v751_v32 = vpop.f32.mrf.mxu3 }
 0x392   : > { %v819_v20 = vpop.f32.mrf.mxu1 }
 0x39a   : > { %v821_v29 = vpop.f32.mrf.mxu1 }
 0x39b   : > { %v1301_v30 = vpack.i.bf16 %v821_v29, %v819_v20 }
 0x39d   : > { %1302 = vrot.lane.b32.xlu1 %v1301_v30, %s1388_s21 }
 0x3b9   : > { %v886_v33 = vpop.f32.mrf.mxu3 }
 0x3c1   : > { %v888_v34 = vpop.f32.mrf.mxu3 }
 0x3c2   : > { %v1306_v35 = vpack.i.bf16 %v888_v34, %v886_v33  ;;  %v1321_v33 = vld [vmem:[%s1650_s11] ss:$0 sm:$0xff] }
 0x3c4   : > { %1307 = vrot.lane.b32.xlu2 %v1306_v35, %s1389_s22 }
 0x3cb   : > { %v953_v36 = vpop.f32.mrf.mxu1 }
 0x3d3   : > { %v955_v37 = vpop.f32.mrf.mxu1 }
 0x3d4   : > { %v1311_v38 = vpack.i.bf16 %v955_v37, %v953_v36  ;;  %v1322_v36 = vld [vmem:[%s1651_s12] ss:$0 sm:$0xff] }
 0x3d6   : > { %1312 = vrot.lane.b32.xlu1 %v1311_v38, %s1390_s24 }
 0x40f   : > { %v1303_v41 = vpop.permute.xlu1 %1302 }
 0x410   : > { %v1305_v43 = vunpack.i.h.bf16 %v1303_v41  ;;  %v1304_v44 = vunpack.i.l.bf16 %v1303_v41 }
 0x412   : > { %v983_v48 = vsel %vm689_vm3, %v751_v32, %v1305_v43  ;;  %v982_v49 = vsel %vm689_vm3, %v749_v31, %v1304_v44 }
 0x41e   : > { %v1308_v42 = vpop.permute.xlu2 %1307 }
 0x41f   : > { %v1310_v45 = vunpack.i.h.bf16 %v1308_v42  ;;  %v1309_v46 = vunpack.i.l.bf16 %v1308_v42 }
 0x421   : > { %v986_v52 = vsel %vm984_vm5, %v983_v48, %v1310_v45  ;;  %v985_v53 = vsel %vm984_vm5, %v982_v49, %v1309_v46 }
 0x448   : > { %v1313_v47 = vpop.permute.xlu1 %1312 }
 0x449   : > { %v1315_v50 = vunpack.i.h.bf16 %v1313_v47  ;;  %v1314_v51 = vunpack.i.l.bf16 %v1313_v47 }
 0x44b   : > { %v988_v54 = vsel %vm987_vm6, %v985_v53, %v1314_v51  ;;  %v989_v55 = vsel %vm987_vm6, %v986_v52, %v1315_v50 }
 0x44c   : > { %v990_v56 = vpack.c.bf16 %v989_v55, %v988_v54 }
 0x44e   : > { %1256 = vmatmul.msk.bf16.vlgmr.msra.gmra.mxu2 %vm538_vm0, %v990_v56 }
 0x4d1   : > { %v1023_v58 = vpop.f32.mrf.mxu2 }
 0x4d2   : > { %v1024_v59 = vadd.f32 %v1320_v57, %v1023_v58 }
 0x4d4   : > { %v1028_v60 = vadd.f32 %v1024_v59, %v1510_v6 }
 0x4d6   : > { %v1032_v61 = vsel %vm538_vm0, %v1028_v60, 0.0 }
 0x4d7   : > { %1033 = vadd.xlane.f32.xlu0 %v1032_v61 }
 0x4d9   : > { %v1025_v62 = vpop.f32.mrf.mxu2 }
 0x4da   : > { %v1026_v63 = vadd.f32 %v1320_v57, %v1025_v62 }
 0x4dc   : > { %v1029_v0 = vadd.f32 %v1026_v63, %v1512_v7 }
 0x4de   : > { %v1035_v1 = vsel %vm538_vm0, %v1029_v0, 0.0 }
 0x4df   : > { %1036 = vadd.xlane.f32.xlu1 %v1035_v1 }
 0x54a   : > { %v1034_v6 = vpop.xlane.xlu0 %1033 }
 0x54b   : > { %v1045_v11 = vmul.f32 %v1044_v10, %v1034_v6 }
 0x54d   : > { %v1047_v12 = vsub.f32 %v1028_v60, %v1045_v11 }
 0x54f   : > { %v1049_v13 = vmul.f32 %v1047_v12, %v1047_v12 }
 0x551   : > { %v1051_v14 = vsel %vm538_vm0, %v1049_v13, 0.0 }
 0x552   : > { %v1037_v15 = vpop.xlane.xlu1 %1036  ;;  %1052 = vadd.xlane.f32.xlu2 %v1051_v14 }
 0x553   : > { %v1046_v7 = vmul.f32 %v1044_v10, %v1037_v15 }
 0x555   : > { %v1048_v16 = vsub.f32 %v1029_v0, %v1046_v7 }
 0x557   : > { %v1050_v17 = vmul.f32 %v1048_v16, %v1048_v16 }
 0x559   : > { %v1054_v18 = vsel %vm538_vm0, %v1050_v17, 0.0 }
 0x55a   : > { %1055 = vadd.xlane.f32.xlu0 %v1054_v18 }
 0x5c5   : > { %v1053_v19 = vpop.xlane.xlu2 %1052 }
 0x5c6   : > { %v1057_v21 = vmul.f32 %v1053_v19, %v1044_v10 }
 0x5c8   : > { %v1059_v22 = vadd.f32 1e-12, %v1057_v21 }
 0x5ca   : > { %1357 = vrsqrt.f32 %v1059_v22  ;;  %vm1067_vm9 = vweird.f32 %v1059_v22 }
 0x5cd   : > { %v1056_v23 = vpop.xlane.xlu0 %1055 }
 0x5ce   : > { %v1058_v24 = vmul.f32 %v1056_v23, %v1044_v10 }
 0x5d0   : > { %v1358_v25 = vpop.eup %1357  ;;  %v1060_v26 = vadd.f32 1e-12, %v1058_v24 }
 0x5d1   : > { %v1062_v27 = vmul.f32 %v1358_v25, %v1059_v22  ;;  %vm1068_vm8 = vweird.f32 %v1358_v25 }
 0x5d2   : > { %1359 = vrsqrt.f32 %v1060_v26  ;;  %vm1069_vm10 = vmor %vm1067_vm9, %vm1068_vm8  ;;  %vm1077_vm12 = vweird.f32 %v1060_v26 }
 0x5d3   : > { %v1063_v28 = vmul.f32 %v1358_v25, %v1062_v27 }
 0x5d5   : > { %v1064_v20 = vmul.f32 0.5, %v1063_v28 }
 0x5d7   : > { %v1065_v29 = vsub.f32 1.5, %v1064_v20 }
 0x5d8   : > { %v1360_v30 = vpop.eup %1359 }
 0x5d9   : > { %v1066_v31 = vmul.f32 %v1358_v25, %v1065_v29  ;;  %v1072_v32 = vmul.f32 %v1360_v30, %v1060_v26  ;;  %vm1078_vm11 = vweird.f32 %v1360_v30 }
 0x5da   : > { %vm1079_vm13 = vmor %vm1077_vm12, %vm1078_vm11 }
 0x5db   : > { %v1070_v34 = vsel %vm1069_vm10, %v1358_v25, %v1066_v31  ;;  %v1073_v35 = vmul.f32 %v1360_v30, %v1072_v32 }
 0x5dc   : > { %v1081_v37 = vmul.f32 %v1070_v34, %v1047_v12 }
 0x5dd   : > { %v1074_v38 = vmul.f32 0.5, %v1073_v35 }
 0x5de   : > { %v1086_v39 = vmul.f32 %v1321_v33, %v1081_v37 }
 0x5df   : > { %v1075_v40 = vsub.f32 1.5, %v1074_v38 }
 0x5e0   : > { %v1091_v41 = vadd.f32 %v1322_v36, %v1086_v39 }
 0x5e1   : > { %v1076_v42 = vmul.f32 %v1360_v30, %v1075_v40 }
 0x5e2   : > { %1093 = vst.msk [vmem:[%s509_s29] sm:$0xff] %vm538_vm0, %v1091_v41 }
 0x5e3   : > { %v1080_v43 = vsel %vm1079_vm13, %v1360_v30, %v1076_v42 }
 0x5e4   : > { %v1082_v44 = vmul.f32 %v1080_v43, %v1048_v16 }
 0x5e6   : > { %v1087_v45 = vmul.f32 %v1321_v33, %v1082_v44 }
 0x5e8   : > { %v1092_v46 = vadd.f32 %v1322_v36, %v1087_v45 }
 0x5ea   : > { %1094 = vst.msk [vmem:[%s509_s29 + $0x8] sm:$0xff] %vm538_vm0, %v1092_v46 }
 0x5eb PF: > { %s23_s27 = sadd.s32 1, %s1383_s27   ;;  %s1653_s25 = smov %s1379_s26 }
 0x5ec   : > { %p20_p5 = scmp.ge.s32.totalorder %s23_s27, 4   ;;  %s1654_s26 = smov %s1656_s28 }
 0x5ee   :  { %22 = sbr.rel (!%p20_p5) target bundleno = 2 (0x2), region = 112 }

// kernel: lxrt_x_layer.9
= control target key start
LH: loop header
LB: loop body
LE: loop exit
PB: predicated region body
PF: predicated region fallthrough
CT: control target
= control target key end

     0   :  { %s1472_s25 = smov 0   ;;  %s1474_s26 = smov 0   ;;  %s1635_s0 = inlined_call_operand.vmem [shape: f32[2,16,32], index: 0, kind: input, shape index: {}, may-alias: {0,1}]   ;;  %s1636_s1 = inlined_call_operand.vmem [shape: f32[2,16,32], index: 1, kind: input, shape index: {}, may-alias: {0,1}]   ;;  %s1637_s2 = inlined_call_operand.vmem [shape: f32[2,1,16], index: 2, kind: input, shape index: {}]   ;;  %s1638_s3 = inlined_call_operand.vmem [shape: bf16[32,32], index: 3, kind: input, shape index: {}]   ;;  %s1639_s4 = inlined_call_operand.vmem [shape: f32[1,32], index: 4, kind: input, shape index: {}]   ;;  %s1640_s5 = inlined_call_operand.vmem [shape: bf16[32,32], index: 5, kind: input, shape index: {}]   ;;  %s1641_s6 = inlined_call_operand.vmem [shape: f32[1,32], index: 6, kind: input, shape index: {}]   ;;  %s1642_s7 = inlined_call_operand.vmem [shape: bf16[32,32], index: 7, kind: input, shape index: {}]   ;;  %s1643_s8 = inlined_call_operand.vmem [shape: f32[1,32], index: 8, kind: input, shape index: {}]   ;;  %s1644_s9 = inlined_call_operand.vmem [shape: bf16[32,32], index: 9, kind: input, shape index: {}]   ;;  %s1645_s10 = inlined_call_operand.vmem [shape: f32[1,32], index: 10, kind: input, shape index: {}]   ;;  %s1646_s11 = inlined_call_operand.vmem [shape: f32[1,32], index: 11, kind: input, shape index: {}]   ;;  %s1647_s12 = inlined_call_operand.vmem [shape: f32[1,32], index: 12, kind: input, shape index: {}]   ;;  %s1648_s13 = inlined_call_operand.vmem [shape: f32[2,16,32], index: 13, kind: output, shape index: {}]  }
   0x1   :  { %s1476_s27 = smov 0  }
   0x2 LB: > { %s35_s28 = sadd.s32 1, %s1389_s26  ;;  %p1210_p0 = scmp.ge.s32.totalorder %s1393_s27, 1  ;;  %s1393_s27 = sphi %s1476_s27, %s23_s27   ;;  %s1389_s26 = sphi %s1474_s26, %s1650_s26   ;;  %s1385_s25 = sphi %s1472_s25, %s1649_s25  }
   0x3   : > { %p37_p1 = scmp.ge.s32.totalorder %s35_s28, 2  ;;  %p426_p2 = scmp.lt.s32.totalorder %s1393_s27, 3 }
   0x5   : > { %s1652_s28 = smov (%p37_p1, %s35_s28), 0  ;;  %p427_p3 = pnand %p1210_p0, %p426_p2 }
   0x6   : > { %p487_p4 = scmp.lt.s32.totalorder (!%p427_p3), %s1385_s25, 1  ;;  %s1395_s22 = smov (!%p427_p3), 120  }
   0x7   : > { %430 = sbr.rel (%p427_p3) target bundleno = 1449 (0x5a9), region = 72  ;;  %s1396_s24 = smov (!%p427_p3), 104  }
   0x8   : > { %s1397_s29 = smov (!%p427_p3), 112   ;;  %s1398_s19 = smov (!%p427_p3), 8  }
   0x9   : > { %s1399_s21 = smov (!%p427_p3), 16  }
   0xc   : > { %v1271_v0 = vld [vmem:[%s1640_s5 + $0x8] sm:$0xff]  ;;  %v1270_v2 = vld [vmem:[%s1640_s5] sm:$0xff]  ;;  %s1654_s25 = smov (!%p487_p4, %s1385_s25), 1  ;;  %vm542_vm0 = vcmask 261120   ;;  %vm630_vm1 = vcmask 125952   ;;  %vm702_vm2 = vcmask 1043456  }
   0xd   : > { %v1275_v1 = vld [vmem:[%s1638_s3 + $0x8] sm:$0xff]  ;;  %552 = vmatpush.bf16.msra.mxu0 %v1271_v0  ;;  %v1274_v3 = vld [vmem:[%s1638_s3] sm:$0xff]  ;;  %s1505_s20 = sshll.u32 %s1654_s25, 4  ;;  %s503_s23 = scalar_lea.vmem %s1637_s2, %s1654_s25  ;;  %vm698_vm3 = vcmask 64512   ;;  %vm720_vm4 = vcmask 130048   ;;  %vm637_vm5 = vcmask 257024  }
   0xe   : > { %673 = vmatpush.bf16.msra.mxu2 %v1275_v1  ;;  %s500_s30 = scalar_lea.vmem %s1636_s1, %s1505_s20  ;;  %s494_s16 = scalar_lea.vmem %s1635_s0, %s1505_s20  ;;  %v1327_v10 = vld [vmem:[%s1641_s6] ss:$0 sm:$0xff]  ;;  %v1273_v44 = vld [vmem:[%s1642_s7 + $0x8] sm:$0xff]  ;;  %vm990_vm6 = vcmask 195584  }
   0xf   : > { %v519_v4 = vld [vmem:[%s500_s30] sm:$0xff]  ;;  %v520_v5 = vld [vmem:[%s500_s30 + $0x8] sm:$0xff]  ;;  %586 = vmatpush.bf16.msra.mxu1 %v1273_v44 }
  0x10   : > { %v1519_v6 = vpack.c.bf16 %v520_v5, %v519_v4  ;;  %v1521_v7 = vld [vmem:[%s494_s16] sm:$0xff]  ;;  %v1523_v8 = vld [vmem:[%s494_s16 + $0x8] sm:$0xff] }
  0x11   : > { %553 = vmatpush.bf16.msra.mxu0 %v1270_v2  ;;  %v642_v9 = vpack.c.bf16 %v1523_v8, %v1521_v7  ;;  %v1328_v13 = vld [vmem:[%s1639_s4] ss:$0 sm:$0xff] }
  0x12   : > { %674 = vmatpush.bf16.msra.mxu2 %v1274_v3  ;;  %v1272_v45 = vld [vmem:[%s1642_s7] sm:$0xff] }
  0x13   : > { %587 = vmatpush.bf16.msra.mxu1 %v1272_v45  ;;  %v1326_v46 = vld [vmem:[%s503_s23] ss:$0 sm:$0xff] }
  0x14   : > { %1225 = vmatmul.msk.bf16.vlgmr.msra.gmra.mxu0 %vm542_vm0, %v1519_v6 }
  0x15   : > { %1243 = vmatmul.msk.bf16.vlgmr.msra.gmra.mxu2 %vm542_vm0, %v642_v9  ;;  %v1329_v9 = vld [vmem:[%s1643_s8] ss:$0 sm:$0xff] }
  0x16   : > { %1234 = vmatmul.msk.bf16.vlgmr.msra.gmra.mxu1 %vm542_vm0, %v1519_v6 }
  0x91   : > { %v555_v11 = vpop.f32.mrf.mxu0 }
  0x92   : > { %v556_v12 = vadd.f32 %v1327_v10, %v555_v11 }
  0x94   : > { %594 = vxpose.xlu0.b32.start [1/2] (short) (narrow) %v556_v12, 32 }
  0x98   : > { %v676_v14 = vpop.f32.mrf.mxu2 }
  0x99   : > { %v557_v15 = vpop.f32.mrf.mxu0  ;;  %v677_v17 = vadd.f32 %v1328_v13, %v676_v14 }
  0x9a   : > { %v558_v16 = vadd.f32 %v1327_v10, %v557_v15  ;;  %v589_v10 = vpop.f32.mrf.mxu1 }
  0x9b   : > { %v681_v18 = vpack.c.bf16 %v677_v17, %v677_v17  ;;  %v590_v11 = vadd.f32 %v1329_v9, %v589_v10 }
  0x9c   : > { %595 = vxpose.xlu0.b32.end [2/2] (short) (narrow) %v558_v16, 32 }
  0x9d   : > { %v695_v21 = vunpack.c.l.b16 %v681_v18  ;;  %v635_v12 = vpack.c.bf16 %v590_v11, %v590_v11 }
  0x9f   : > { %638 = vst.msk [vmem:[#allocation3] sm:$0xf] %vm637_vm5, %v635_v12 }
  0xa0   : > { %v678_v19 = vpop.f32.mrf.mxu2 }
  0xa1   : > { %v679_v20 = vadd.f32 %v1328_v13, %v678_v19 }
  0xa2   : > { %v591_v13 = vpop.f32.mrf.mxu1 }
  0xa3   : > { %v682_v22 = vpack.c.bf16 %v679_v20, %v679_v20  ;;  %v592_v15 = vadd.f32 %v1329_v9, %v591_v13 }
  0xa5   : > { %v696_v23 = vunpack.c.l.b16 %v682_v22  ;;  %v636_v18 = vpack.c.bf16 %v592_v15, %v592_v15 }
  0xa7   : > { %v697_v24 = vpack.c.b16 %v696_v23, %v695_v21  ;;  %639 = vst.msk [vmem:[#allocation3 + $0x4] sm:$0xf] %vm637_vm5, %v636_v18 }
  0xa9   : > { %767 = vrot.lane.b32.xlu1 %v697_v24, %s1395_s22  ;;  %897 = vrot.lane.b32.xlu2 %v697_v24, %s1396_s24 }
  0xb1   : > { %832 = vrot.lane.b32.xlu1 %v697_v24, %s1397_s29 }
 0x103   : > { %v898_v43 = vpop.permute.xlu2 %897 }
 0x11b   : > { %v768_v35 = vpop.permute.xlu1 %767 }
 0x123   : > { %v833_v40 = vpop.permute.xlu1 %832 }
 0x138   : > { %v610_v25 = vpop.trf.xlu0 }
 0x139   : > { %v626_v26 = vpack.c.bf16 %v610_v25, %v610_v25 }
 0x13b   : > { %631 = vst.msk [vmem:[#allocation2] sm:$0xf] %vm630_vm1, %v626_v26  ;;  %v1276_v26 = vld [vmem:[#allocation3] sm:$0xff] }
 0x140   : > { %v611_v27 = vpop.trf.xlu0 }
 0x141   : > { %v627_v28 = vpack.c.bf16 %v611_v27, %v611_v27 }
 0x142   : > { %v683_v29 = vld [vmem:[#allocation2] sm:$0xf] }
 0x143   : > { %632 = vst.msk [vmem:[#allocation2 + $0x4] sm:$0xf] %vm630_vm1, %v627_v28  ;;  %v704_v30 = vsel %vm702_vm2, %v683_v29, 0 }
 0x144   : > { %713 = vmatpush.bf16.msra.mxu3 %v704_v30 }
 0x147   : > { %1244 = vmatmul.msk.bf16.vlgmr.msra.gmra.mxu3 %vm698_vm3, %v697_v24 }
 0x148   : > { %v612_v31 = vpop.trf.xlu0  ;;  %760 = vmatpush.bf16.msrb.mxu3 %v1276_v26 }
 0x149   : > { %v628_v32 = vpack.c.bf16 %v612_v31, %v612_v31 }
 0x14a   : > { %v684_v33 = vld [vmem:[#allocation2 + $0x4] sm:$0xf] }
 0x14b   : > { %633 = vst.msk [vmem:[#allocation2 + $0x8] sm:$0xf] %vm630_vm1, %v628_v32  ;;  %v773_v34 = vsel %vm702_vm2, %v684_v33, 0 }
 0x14c   : > { %782 = vmatpush.bf16.msrb.mxu0 %v773_v34 }
 0x14f   : > { %1250 = vmatmul.msk.bf16.vlgmr.msrb.gmra.mxu0 %vm698_vm3, %v768_v35 }
 0x150   : > { %v613_v36 = vpop.trf.xlu0 }
 0x151   : > { %v629_v37 = vpack.c.bf16 %v613_v36, %v613_v36 }
 0x152   : > { %v685_v38 = vld [vmem:[#allocation2 + $0x8] sm:$0xf] }
 0x153   : > { %634 = vst.msk [vmem:[#allocation2 + $0xc] sm:$0xf] %vm630_vm1, %v629_v37  ;;  %v838_v39 = vsel %vm702_vm2, %v685_v38, 0 }
 0x154   : > { %847 = vmatpush.bf16.msrb.mxu2 %v838_v39 }
 0x157   : > { %1252 = vmatmul.msk.bf16.vlgmr.msrb.gmra.mxu2 %vm698_vm3, %v833_v40 }
 0x15a   : > { %v686_v41 = vld [vmem:[#allocation2 + $0xc] sm:$0xf] }
 0x15b   : > { %v903_v42 = vsel %vm702_vm2, %v686_v41, 0 }
 0x15c   : > { %912 = vmatpush.bf16.msra.mxu0 %v903_v42 }
 0x15f   : > { %1254 = vmatmul.msk.bf16.vlgmr.msra.gmra.mxu0 %vm698_vm3, %v898_v43 }
 0x1ca   : > { %v715_v47 = vpop.f32.mrf.mxu3 }
 0x1cb   : > { %v716_v48 = vadd.f32 %v1326_v46, %v715_v47 }
 0x1cc   : > { %v784_v49 = vpop.f32.mrf.mxu0 }
 0x1cd   : > { %v785_v50 = vadd.f32 %v1326_v46, %v784_v49  ;;  %v721_v51 = vsel %vm720_vm4, %v716_v48, -inf }
 0x1ce   : > { %722 = vmax.xlane.f32.xlu2 %v721_v51 }
 0x1cf   : > { %v789_v52 = vsel %vm720_vm4, %v785_v50, -inf }
 0x1d0   : > { %790 = vmax.xlane.f32.xlu1 %v789_v52 }
 0x1d2   : > { %v717_v53 = vpop.f32.mrf.mxu3 }
 0x1d3   : > { %v718_v54 = vadd.f32 %v1326_v46, %v717_v53 }
 0x1d4   : > { %v786_v55 = vpop.f32.mrf.mxu0 }
 0x1d5   : > { %v724_v56 = vsel %vm720_vm4, %v718_v54, -inf  ;;  %v787_v61 = vadd.f32 %v1326_v46, %v786_v55 }
 0x1d6   : > { %725 = vmax.xlane.f32.xlu0 %v724_v56 }
 0x1d7   : > { %v792_v1 = vsel %vm720_vm4, %v787_v61, -inf }
 0x1da   : > { %v849_v57 = vpop.f32.mrf.mxu2 }
 0x1db   : > { %v850_v58 = vadd.f32 %v1326_v46, %v849_v57 }
 0x1dc   : > { %v914_v59 = vpop.f32.mrf.mxu0 }
 0x1dd   : > { %v854_v60 = vsel %vm720_vm4, %v850_v58, -inf  ;;  %v915_v3 = vadd.f32 %v1326_v46, %v914_v59 }
 0x1de   : > { %855 = vmax.xlane.f32.xlu2 %v854_v60 }
 0x1df   : > { %v919_v6 = vsel %vm720_vm4, %v915_v3, -inf }
 0x1e2   : > { %v851_v62 = vpop.f32.mrf.mxu2 }
 0x1e3   : > { %v852_v63 = vadd.f32 %v1326_v46, %v851_v62 }
 0x1e4   : > { %v916_v2 = vpop.f32.mrf.mxu0 }
 0x1e5   : > { %v857_v0 = vsel %vm720_vm4, %v852_v63, -inf  ;;  %v1570_v4 = vadd.f32 %v1326_v46, %v916_v2 }
 0x1e6   : > { %858 = vmax.xlane.f32.xlu1 %v857_v0  ;;  %793 = vmax.xlane.f32.xlu2 %v792_v1 }
 0x1e7   : > { %v922_v5 = vsel %vm720_vm4, %v1570_v4, -inf }
 0x1ee   : > { %923 = vmax.xlane.f32.xlu1 %v922_v5  ;;  %920 = vmax.xlane.f32.xlu2 %v919_v6 }
 0x241   : > { %v723_v14 = vpop.xlane.xlu2 %722 }
 0x242   : > { %v727_v16 = vsub.f32 %v716_v48, %v723_v14 }
 0x243   : > { %v791_v17 = vpop.xlane.xlu1 %790 }
 0x244   : > { %v729_v19 = vmul.f32 1.442695, %v727_v16  ;;  %v795_v20 = vsub.f32 %v785_v50, %v791_v17 }
 0x246   : > { %1333 = vpow2.f32 %v729_v19  ;;  %v797_v21 = vmul.f32 1.442695, %v795_v20 }
 0x248   : > { %1335 = vpow2.f32 %v797_v21 }
 0x249   : > { %v726_v22 = vpop.xlane.xlu0 %725 }
 0x24a   : > { %v728_v23 = vsub.f32 %v718_v54, %v726_v22 }
 0x24c   : > { %v1334_v24 = vpop.eup %1333  ;;  %v731_v25 = vmul.f32 1.442695, %v728_v23 }
 0x24d   : > { %v733_v27 = vsel %vm720_vm4, %v1334_v24, 0.0 }
 0x24e   : > { %1337 = vpow2.f32 %v731_v25  ;;  %734 = vadd.xlane.f32.xlu2 %v733_v27  ;;  %v1336_v29 = vpop.eup %1335 }
 0x24f   : > { %v801_v34 = vsel %vm720_vm4, %v1336_v29, 0.0 }
 0x251   : > { %v856_v28 = vpop.xlane.xlu2 %855 }
 0x252   : > { %v860_v30 = vsub.f32 %v850_v58, %v856_v28 }
 0x254   : > { %v1338_v31 = vpop.eup %1337  ;;  %v862_v32 = vmul.f32 1.442695, %v860_v30 }
 0x255   : > { %v736_v33 = vsel %vm720_vm4, %v1338_v31, 0.0 }
 0x256   : > { %1339 = vpow2.f32 %v862_v32  ;;  %737 = vadd.xlane.f32.xlu1 %v736_v33  ;;  %802 = vadd.xlane.f32.xlu2 %v801_v34 }
 0x259   : > { %v794_v35 = vpop.xlane.xlu2 %793  ;;  %v859_v36 = vpop.xlane.xlu1 %858 }
 0x25a   : > { %v796_v37 = vsub.f32 %v787_v61, %v794_v35  ;;  %v861_v40 = vsub.f32 %v852_v63, %v859_v36 }
 0x25c   : > { %v1340_v38 = vpop.eup %1339  ;;  %v799_v39 = vmul.f32 1.442695, %v796_v37  ;;  %v864_v42 = vmul.f32 1.442695, %v861_v40  ;;  %v1278_v37 = vld [vmem:[%s1644_s9 + $0x8] sm:$0xff] }
 0x25d   : > { %v866_v41 = vsel %vm720_vm4, %v1340_v38, 0.0  ;;  %1023 = vmatpush.bf16.msra.mxu2 %v1278_v37 }
 0x25e   : > { %867 = vadd.xlane.f32.xlu1 %v866_v41  ;;  %1341 = vpow2.f32 %v799_v39 }
 0x25f   : > { %1343 = vpow2.f32 %v864_v42 }
 0x261   : > { %v921_v43 = vpop.xlane.xlu2 %920  ;;  %v924_v52 = vpop.xlane.xlu1 %923 }
 0x262   : > { %v925_v45 = vsub.f32 %v915_v3, %v921_v43  ;;  %v926_v53 = vsub.f32 %v1570_v4, %v924_v52 }
 0x264   : > { %v1342_v44 = vpop.eup %1341  ;;  %v927_v47 = vmul.f32 1.442695, %v925_v45  ;;  %v929_v54 = vmul.f32 1.442695, %v926_v53 }
 0x265   : > { %v804_v46 = vsel %vm720_vm4, %v1342_v44, 0.0  ;;  %v1344_v48 = vpop.eup %1343 }
 0x266   : > { %805 = vadd.xlane.f32.xlu1 %v804_v46  ;;  %1345 = vpow2.f32 %v927_v47  ;;  %v869_v49 = vsel %vm720_vm4, %v1344_v48, 0.0 }
 0x267   : > { %1347 = vpow2.f32 %v929_v54 }
 0x26c   : > { %v1346_v50 = vpop.eup %1345 }
 0x26d   : > { %v931_v51 = vsel %vm720_vm4, %v1346_v50, 0.0  ;;  %v1348_v55 = vpop.eup %1347 }
 0x26e   : > { %812 = vrot.lane.b32.xlu2 %v1276_v26, %s1395_s22  ;;  %870 = vadd.xlane.f32.xlu1 %v869_v49  ;;  %v934_v56 = vsel %vm720_vm4, %v1348_v55, 0.0  ;;  %s1400_s22 = smov 24  }
 0x276   : > { %932 = vadd.xlane.f32.xlu1 %v931_v51 }
 0x28f   : > { %877 = vrot.lane.b32.xlu1 %v1276_v26, %s1397_s29 }
 0x297   : > { %935 = vadd.xlane.f32.xlu2 %v934_v56  ;;  %942 = vrot.lane.b32.xlu1 %v1276_v26, %s1396_s24 }
 0x2c1   : > { %v735_v57 = vpop.xlane.xlu2 %734 }
 0x2c2   : > { %1349 = vrcp.f32 %v735_v57 }
 0x2c8   : > { %v1350_v60 = vpop.eup %1349 }
 0x2c9   : > { %v738_v58 = vpop.xlane.xlu1 %737  ;;  %v803_v59 = vpop.xlane.xlu2 %802  ;;  %v741_v62 = vmul.f32 %v1350_v60, %v1334_v24 }
 0x2ca   : > { %1351 = vrcp.f32 %v738_v58 }
 0x2cb   : > { %1353 = vrcp.f32 %v803_v59 }
 0x2d0   : > { %v1352_v61 = vpop.eup %1351 }
 0x2d1   : > { %v742_v63 = vmul.f32 %v1352_v61, %v1338_v31  ;;  %v868_v0 = vpop.xlane.xlu1 %867  ;;  %v813_v1 = vpop.permute.xlu2 %812 }
 0x2d2   : > { %825 = vmatpush.bf16.msrb.mxu1 %v813_v1  ;;  %v1354_v4 = vpop.eup %1353 }
 0x2d3   : > { %v743_v2 = vpack.c.bf16 %v742_v63, %v741_v62  ;;  %v809_v6 = vmul.f32 %v1354_v4, %v1336_v29 }
 0x2d5   : > { %1249 = vmatmul.msk.bf16.vlgmr.msrb.gmra.mxu3 %vm720_vm4, %v743_v2 }
 0x2d9   : > { %v806_v3 = vpop.xlane.xlu1 %805 }
 0x2da   : > { %1355 = vrcp.f32 %v806_v3 }
 0x2e0   : > { %v1356_v5 = vpop.eup %1355 }
 0x2e1   : > { %v810_v9 = vmul.f32 %v1356_v5, %v1342_v44  ;;  %v871_v11 = vpop.xlane.xlu1 %870 }
 0x2e2   : > { %1357 = vrcp.f32 %v871_v11 }
 0x2e3   : > { %v811_v10 = vpack.c.bf16 %v810_v9, %v809_v6  ;;  %1359 = vrcp.f32 %v868_v0  ;;  %v1401_v0 = vmov 32.0  }
 0x2e5   : > { %1251 = vmatmul.msk.bf16.vlgmr.msrb.gmra.mxu1 %vm720_vm4, %v811_v10 }
 0x2e8   : > { %v1358_v13 = vpop.eup %1357 }
 0x2e9   : > { %v933_v12 = vpop.xlane.xlu1 %932  ;;  %v1360_v14 = vpop.eup %1359  ;;  %v875_v15 = vmul.f32 %v1358_v13, %v1344_v48 }
 0x2ea   : > { %v874_v16 = vmul.f32 %v1360_v14, %v1340_v38  ;;  %1361 = vrcp.f32 %v933_v12  ;;  %v1277_v38 = vld [vmem:[%s1644_s9] sm:$0xff] }
 0x2eb   : > { %1024 = vmatpush.bf16.msra.mxu2 %v1277_v38 }
 0x2ec   : > { %v876_v18 = vpack.c.bf16 %v875_v15, %v874_v16 }
 0x2f0   : > { %v1362_v21 = vpop.eup %1361 }
 0x2f1   : > { %v939_v23 = vmul.f32 %v1362_v21, %v1346_v50 }
 0x301   : > { %v878_v17 = vpop.permute.xlu1 %877 }
 0x302   : > { %890 = vmatpush.bf16.msra.mxu3 %v878_v17 }
 0x305   : > { %1253 = vmatmul.msk.bf16.vlgmr.msra.gmra.mxu3 %vm720_vm4, %v876_v18 }
 0x309   : > { %v943_v19 = vpop.permute.xlu1 %942 }
 0x30a   : > { %v936_v20 = vpop.xlane.xlu2 %935  ;;  %955 = vmatpush.bf16.msra.mxu1 %v943_v19 }
 0x30b   : > { %1363 = vrcp.f32 %v936_v20 }
 0x30c   : > { %1365 = vrcp.f32 %v1401_v0 }
 0x311   : > { %v1364_v22 = vpop.eup %1363 }
 0x312   : > { %v940_v24 = vmul.f32 %v1364_v22, %v1348_v55  ;;  %v1330_v55 = vld [vmem:[%s1645_s10] ss:$0 sm:$0xff]  ;;  %v1366_v1 = vpop.eup %1365 }
 0x313   : > { %v1042_v2 = vmul.f32 32.0, %v1366_v1  ;;  %vm1046_vm7 = vweird.f32 %v1366_v1 }
 0x314   : > { %v941_v25 = vpack.c.bf16 %v940_v24, %v939_v23 }
 0x315   : > { %v1043_v3 = vsub.f32 1.0, %v1042_v2 }
 0x316   : > { %1255 = vmatmul.msk.bf16.vlgmr.msra.gmra.mxu1 %vm720_vm4, %v941_v25 }
 0x317   : > { %v1044_v4 = vmul.f32 %v1366_v1, %v1043_v3 }
 0x319   : > { %v1045_v5 = vadd.f32 %v1366_v1, %v1044_v4 }
 0x31b   : > { %v1047_v6 = vsel %vm1046_vm7, %v1366_v1, %v1045_v5 }
 0x358   : > { %v762_v29 = vpop.f32.mrf.mxu3 }
 0x360   : > { %v764_v30 = vpop.f32.mrf.mxu3 }
 0x362   : > { %v827_v26 = vpop.f32.mrf.mxu1 }
 0x36a   : > { %v829_v27 = vpop.f32.mrf.mxu1 }
 0x36b   : > { %v1311_v28 = vpack.i.bf16 %v829_v27, %v827_v26 }
 0x36d   : > { %1312 = vrot.lane.b32.xlu0 %v1311_v28, %s1398_s19 }
 0x388   : > { %v892_v31 = vpop.f32.mrf.mxu3 }
 0x390   : > { %v894_v32 = vpop.f32.mrf.mxu3 }
 0x391   : > { %v1316_v33 = vpack.i.bf16 %v894_v32, %v892_v31  ;;  %v1331_v31 = vld [vmem:[%s1646_s11] ss:$0 sm:$0xff] }
 0x393   : > { %v957_v34 = vpop.f32.mrf.mxu1  ;;  %1317 = vrot.lane.b32.xlu1 %v1316_v33, %s1399_s21 }
 0x39b   : > { %v959_v35 = vpop.f32.mrf.mxu1 }
 0x39c   : > { %v1321_v36 = vpack.i.bf16 %v959_v35, %v957_v34  ;;  %v1332_v34 = vld [vmem:[%s1647_s12] ss:$0 sm:$0xff] }
 0x39e   : > { %1322 = vrot.lane.b32.xlu2 %v1321_v36, %s1400_s22  ;;  %s512_s22 = scalar_lea.vmem %s1648_s13, %s1505_s20 }
 0x3df   : > { %v1313_v39 = vpop.permute.xlu0 %1312 }
 0x3e0   : > { %v1315_v40 = vunpack.i.h.bf16 %v1313_v39  ;;  %v1314_v41 = vunpack.i.l.bf16 %v1313_v39 }
 0x3e2   : > { %v987_v46 = vsel %vm698_vm3, %v764_v30, %v1315_v40  ;;  %v986_v47 = vsel %vm698_vm3, %v762_v29, %v1314_v41 }
 0x3f8   : > { %v1323_v42 = vpop.permute.xlu2 %1322 }
 0x3f9   : > { %v1325_v48 = vunpack.i.h.bf16 %v1323_v42  ;;  %v1324_v49 = vunpack.i.l.bf16 %v1323_v42 }
 0x405   : > { %v1318_v43 = vpop.permute.xlu1 %1317 }
 0x406   : > { %v1320_v44 = vunpack.i.h.bf16 %v1318_v43  ;;  %v1319_v45 = vunpack.i.l.bf16 %v1318_v43 }
 0x408   : > { %v988_v50 = vsel %vm720_vm4, %v986_v47, %v1319_v45  ;;  %v989_v51 = vsel %vm720_vm4, %v987_v46, %v1320_v44 }
 0x409   : > { %v991_v52 = vsel %vm990_vm6, %v988_v50, %v1324_v49  ;;  %v992_v53 = vsel %vm990_vm6, %v989_v51, %v1325_v48 }
 0x40a   : > { %v993_v54 = vpack.c.bf16 %v992_v53, %v991_v52 }
 0x40c   : > { %1264 = vmatmul.msk.bf16.vlgmr.msra.gmra.mxu2 %vm542_vm0, %v993_v54 }
 0x48f   : > { %v1026_v56 = vpop.f32.mrf.mxu2 }
 0x490   : > { %v1027_v57 = vadd.f32 %v1330_v55, %v1026_v56 }
 0x492   : > { %v1031_v58 = vadd.f32 %v1027_v57, %v1521_v7 }
 0x494   : > { %v1035_v59 = vsel %vm542_vm0, %v1031_v58, 0.0 }
 0x495   : > { %1036 = vadd.xlane.f32.xlu1 %v1035_v59 }
 0x497   : > { %v1028_v60 = vpop.f32.mrf.mxu2 }
 0x498   : > { %v1029_v61 = vadd.f32 %v1330_v55, %v1028_v60 }
 0x49a   : > { %v1032_v62 = vadd.f32 %v1029_v61, %v1523_v8 }
 0x49c   : > { %v1038_v63 = vsel %vm542_vm0, %v1032_v62, 0.0 }
 0x49d   : > { %1039 = vadd.xlane.f32.xlu0 %v1038_v63 }
 0x508   : > { %v1037_v7 = vpop.xlane.xlu1 %1036 }
 0x509   : > { %v1048_v9 = vmul.f32 %v1047_v6, %v1037_v7 }
 0x50b   : > { %v1050_v10 = vsub.f32 %v1031_v58, %v1048_v9 }
 0x50d   : > { %v1052_v11 = vmul.f32 %v1050_v10, %v1050_v10 }
 0x50f   : > { %v1054_v12 = vsel %vm542_vm0, %v1052_v11, 0.0 }
 0x510   : > { %v1040_v13 = vpop.xlane.xlu0 %1039  ;;  %1055 = vadd.xlane.f32.xlu2 %v1054_v12 }
 0x511   : > { %v1049_v8 = vmul.f32 %v1047_v6, %v1040_v13 }
 0x513   : > { %v1051_v14 = vsub.f32 %v1032_v62, %v1049_v8 }
 0x515   : > { %v1053_v15 = vmul.f32 %v1051_v14, %v1051_v14 }
 0x517   : > { %v1057_v16 = vsel %vm542_vm0, %v1053_v15, 0.0 }
 0x518   : > { %1058 = vadd.xlane.f32.xlu1 %v1057_v16 }
 0x583   : > { %v1056_v17 = vpop.xlane.xlu2 %1055 }
 0x584   : > { %v1060_v18 = vmul.f32 %v1056_v17, %v1047_v6 }
 0x586   : > { %v1062_v19 = vadd.f32 1e-12, %v1060_v18 }
 0x588   : > { %1367 = vrsqrt.f32 %v1062_v19  ;;  %vm1070_vm9 = vweird.f32 %v1062_v19 }
 0x58b   : > { %v1059_v20 = vpop.xlane.xlu1 %1058 }
 0x58c   : > { %v1061_v21 = vmul.f32 %v1059_v20, %v1047_v6 }
 0x58e   : > { %v1368_v22 = vpop.eup %1367  ;;  %v1063_v23 = vadd.f32 1e-12, %v1061_v21 }
 0x58f   : > { %v1065_v24 = vmul.f32 %v1368_v22, %v1062_v19  ;;  %vm1071_vm8 = vweird.f32 %v1368_v22 }
 0x590   : > { %1369 = vrsqrt.f32 %v1063_v23  ;;  %vm1072_vm10 = vmor %vm1070_vm9, %vm1071_vm8  ;;  %vm1080_vm12 = vweird.f32 %v1063_v23 }
 0x591   : > { %v1066_v25 = vmul.f32 %v1368_v22, %v1065_v24 }
 0x593   : > { %v1067_v26 = vmul.f32 0.5, %v1066_v25 }
 0x595   : > { %v1068_v27 = vsub.f32 1.5, %v1067_v26 }
 0x596   : > { %v1370_v28 = vpop.eup %1369 }
 0x597   : > { %v1069_v29 = vmul.f32 %v1368_v22, %v1068_v27  ;;  %v1075_v30 = vmul.f32 %v1370_v28, %v1063_v23  ;;  %vm1081_vm11 = vweird.f32 %v1370_v28 }
 0x598   : > { %vm1082_vm13 = vmor %vm1080_vm12, %vm1081_vm11 }
 0x599   : > { %v1073_v32 = vsel %vm1072_vm10, %v1368_v22, %v1069_v29  ;;  %v1076_v33 = vmul.f32 %v1370_v28, %v1075_v30 }
 0x59a   : > { %v1084_v35 = vmul.f32 %v1073_v32, %v1050_v10 }
 0x59b   : > { %v1077_v36 = vmul.f32 0.5, %v1076_v33 }
 0x59c   : > { %v1089_v37 = vmul.f32 %v1331_v31, %v1084_v35 }
 0x59d   : > { %v1078_v38 = vsub.f32 1.5, %v1077_v36 }
 0x59e   : > { %v1094_v39 = vadd.f32 %v1332_v34, %v1089_v37 }
 0x59f   : > { %v1079_v40 = vmul.f32 %v1370_v28, %v1078_v38 }
 0x5a0   : > { %1096 = vst.msk [vmem:[%s512_s22] sm:$0xff] %vm542_vm0, %v1094_v39 }
 0x5a1   : > { %v1083_v41 = vsel %vm1082_vm13, %v1370_v28, %v1079_v40 }
 0x5a2   : > { %v1085_v42 = vmul.f32 %v1083_v41, %v1051_v14 }
 0x5a4   : > { %v1090_v43 = vmul.f32 %v1331_v31, %v1085_v42 }
 0x5a6   : > { %v1095_v44 = vadd.f32 %v1332_v34, %v1090_v43 }
 0x5a8   : > { %1097 = vst.msk [vmem:[%s512_s22 + $0x8] sm:$0xff] %vm542_vm0, %v1095_v44 }
 0x5a9 PF: > { %s23_s27 = sadd.s32 1, %s1393_s27   ;;  %s1649_s25 = smov %s1389_s26 }
 0x5aa   : > { %p20_p5 = scmp.ge.s32.totalorder %s23_s27, 4   ;;  %s1650_s26 = smov %s1652_s28 }
 0x5ac   :  { %22 = sbr.rel (!%p20_p5) target bundleno = 2 (0x2), region = 112 }

// kernel: lxrt_x_layer.11
= control target key start
LH: loop header
LB: loop body
LE: loop exit
PB: predicated region body
PF: predicated region fallthrough
CT: control target
= control target key end

     0   :  { %s543_s0 = inlined_call_operand.vmem [shape: f32[32,32], index: 0, kind: input, shape index: {}]   ;;  %s544_s1 = inlined_call_operand.vmem [shape: bf16[32,64], index: 1, kind: input, shape index: {}]   ;;  %s545_s2 = inlined_call_operand.vmem [shape: f32[1,64], index: 2, kind: input, shape index: {}]   ;;  %s546_s3 = inlined_call_operand.vmem [shape: bf16[64,32], index: 3, kind: input, shape index: {}]   ;;  %s547_s4 = inlined_call_operand.vmem [shape: f32[1,32], index: 4, kind: input, shape index: {}]   ;;  %s548_s5 = inlined_call_operand.vmem [shape: f32[1,32], index: 5, kind: input, shape index: {}]   ;;  %s549_s6 = inlined_call_operand.vmem [shape: f32[1,32], index: 6, kind: input, shape index: {}]   ;;  %s550_s7 = inlined_call_operand.hbm [shape: f32[32,32], index: 7, kind: output, shape index: {}]  }
   0x1   :  { %v346_v0 = vld [vmem:[%s544_s1 + $0x8] sm:$0xff]  ;;  %v345_v1 = vld [vmem:[%s544_s1] sm:$0xff]  ;;  %v472_v4 = vld [vmem:[%s543_s0 + $0x10] sm:$0xff] }
   0x2   :  { %v462_v2 = vld [vmem:[%s543_s0] sm:$0xff]  ;;  %v467_v3 = vld [vmem:[%s543_s0 + $0x8] sm:$0xff]  ;;  %67 = vmatpush.bf16.msra.mxu0 %v346_v0  ;;  %351 = vmatpush.bf16.msra.mxu3 %v346_v0  ;;  %v477_v5 = vld [vmem:[%s543_s0 + $0x18] sm:$0xff] }
   0x3   :  { %12 = vsyncpa [#allocation3], 0  ;;  %v32_v6 = vpack.c.bf16 %v467_v3, %v462_v2  ;;  %v33_v7 = vpack.c.bf16 %v477_v5, %v472_v4  ;;  %vm54_vm0 = vcmask 261120   ;;  %v350_v8 = vld [vmem:[%s546_s3 + $0x18] sm:$0xff]  ;;  %v349_v9 = vld [vmem:[%s546_s3 + $0x10] sm:$0xff]  ;;  %vm154_vm1 = vcmask 523264  }
   0x4   :  { %165 = vmatpush.bf16.msra.mxu1 %v350_v8  ;;  %353 = vmatpush.bf16.msra.mxu2 %v350_v8  ;;  %v348_v10 = vld [vmem:[%s546_s3 + $0x8] sm:$0xff]  ;;  %v347_v11 = vld [vmem:[%s546_s3] sm:$0xff]  ;;  %s305_s26 = sshll.u32 %s550_s7, 4  ;;  %s411_s27 = smov 128   ;;  %s306_s26 = int_to_ptr.hbm [resolvable:$true] %s305_s26 }
   0x5   :  { %v361_v12 = vld [vmem:[%s545_s2] ss:$0 sm:$0xff]  ;;  %s412_s28 = smov 8  }
   0x6   :  { %68 = vmatpush.bf16.msra.mxu0 %v345_v1  ;;  %352 = vmatpush.bf16.msra.mxu3 %v345_v1  ;;  %v362_v59 = vld [vmem:[%s547_s4] ss:$0 sm:$0xff] }
   0x8   :  { %166 = vmatpush.bf16.msra.mxu1 %v349_v9  ;;  %354 = vmatpush.bf16.msra.mxu2 %v349_v9 }
   0x9   :  { %325 = vmatmul.msk.bf16.vlgmr.msra.gmra.mxu0 %vm54_vm0, %v32_v6  ;;  %326 = vmatmul.msk.bf16.vlgmr.msra.gmra.mxu3 %vm54_vm0, %v33_v7 }
   0xc   :  { %167 = vmatpush.bf16.msra.mxu1 %v348_v10  ;;  %355 = vmatpush.bf16.msra.mxu2 %v348_v10 }
  0x10   :  { %168 = vmatpush.bf16.msra.mxu1 %v347_v11  ;;  %356 = vmatpush.bf16.msra.mxu2 %v347_v11 }
  0x86   :  { %v70_v13 = vpop.f32.mrf.mxu0 }
  0x87   :  { %v71_v14 = vadd.f32 %v361_v12, %v70_v13 }
  0x89   :  { %v84_v15 = vmul.f32 0.044715, %v71_v14  ;;  %v80_v44 = vmul.f32 0.5, %v71_v14 }
  0x8b   :  { %v88_v16 = vmul.f32 %v84_v15, %v71_v14  ;;  %v409_v15 = vmov 32.0  }
  0x8c   :  { %v75_v17 = vpop.f32.mrf.mxu3 }
  0x8d   :  { %v76_v18 = vadd.f32 %v361_v12, %v75_v17  ;;  %v92_v19 = vmul.f32 %v88_v16, %v71_v14 }
  0x8e   :  { %v72_v20 = vpop.f32.mrf.mxu0 }
  0x8f   :  { %v86_v21 = vmul.f32 0.044715, %v76_v18  ;;  %v73_v22 = vadd.f32 %v361_v12, %v72_v20  ;;  %v96_v23 = vadd.f32 %v92_v19, %v71_v14  ;;  %v82_v53 = vmul.f32 0.5, %v76_v18 }
  0x91   :  { %v90_v24 = vmul.f32 %v86_v21, %v76_v18  ;;  %v85_v25 = vmul.f32 0.044715, %v73_v22  ;;  %v100_v27 = vmul.f32 0.7978846, %v96_v23  ;;  %v81_v45 = vmul.f32 0.5, %v73_v22 }
  0x93   :  { %v89_v26 = vmul.f32 %v85_v25, %v73_v22  ;;  %v94_v28 = vmul.f32 %v90_v24, %v76_v18  ;;  %365 = vtanh.f32 %v100_v27 }
  0x94   :  { %v77_v29 = vpop.f32.mrf.mxu3 }
  0x95   :  { %v78_v30 = vadd.f32 %v361_v12, %v77_v29  ;;  %v93_v31 = vmul.f32 %v89_v26, %v73_v22  ;;  %v98_v32 = vadd.f32 %v94_v28, %v76_v18 }
  0x97   :  { %v87_v33 = vmul.f32 0.044715, %v78_v30  ;;  %v97_v34 = vadd.f32 %v93_v31, %v73_v22  ;;  %v102_v37 = vmul.f32 0.7978846, %v98_v32  ;;  %v83_v54 = vmul.f32 0.5, %v78_v30 }
  0x99   :  { %v91_v35 = vmul.f32 %v87_v33, %v78_v30  ;;  %v101_v36 = vmul.f32 0.7978846, %v97_v34  ;;  %v366_v39 = vpop.eup %365 }
  0x9a   :  { %v108_v42 = vadd.f32 1.0, %v366_v39 }
  0x9b   :  { %367 = vtanh.f32 %v101_v36  ;;  %v95_v38 = vmul.f32 %v91_v35, %v78_v30 }
  0x9c   :  { %369 = vtanh.f32 %v102_v37  ;;  %v112_v48 = vmul.f32 %v108_v42, %v80_v44 }
  0x9d   :  { %v99_v40 = vadd.f32 %v95_v38, %v78_v30 }
  0x9f   :  { %v103_v41 = vmul.f32 0.7978846, %v99_v40 }
  0xa1   :  { %v368_v43 = vpop.eup %367  ;;  %371 = vtanh.f32 %v103_v41 }
  0xa2   :  { %v109_v46 = vadd.f32 1.0, %v368_v43  ;;  %v370_v47 = vpop.eup %369  ;;  %373 = vrcp.f32 %v409_v15 }
  0xa3   :  { %v110_v51 = vadd.f32 1.0, %v370_v47 }
  0xa4   :  { %v113_v49 = vmul.f32 %v109_v46, %v81_v45 }
  0xa5   :  { %v114_v56 = vmul.f32 %v110_v51, %v82_v53 }
  0xa6   :  { %v116_v50 = vpack.c.bf16 %v113_v49, %v112_v48 }
  0xa7   :  { %v372_v52 = vpop.eup %371 }
  0xa8   :  { %343 = vmatmul.msk.bf16.vlgmr.msra.gmra.mxu1 %vm154_vm1, %v116_v50  ;;  %v111_v55 = vadd.f32 1.0, %v372_v52 }
  0xaa   :  { %v115_v57 = vmul.f32 %v111_v55, %v83_v54 }
  0xac   :  { %v117_v58 = vpack.c.bf16 %v115_v57, %v114_v56  ;;  %v363_v57 = vld [vmem:[%s548_s5] ss:$0 sm:$0xff]  ;;  %s410_s5 = smov [#allocation2]  }
  0xae   :  { %344 = vmatmul.msk.bf16.vlgmr.msra.gmra.mxu2 %vm154_vm1, %v117_v58 }
 0x125   :  { %v170_v60 = vpop.f32.mrf.mxu1 }
 0x126   :  { %v171_v61 = vadd.f32 %v362_v59, %v170_v60 }
 0x128   :  { %v180_v62 = vadd.f32 %v171_v61, %v462_v2 }
 0x12a   :  { %v186_v63 = vsel %vm54_vm0, %v180_v62, 0.0 }
 0x12b   :  { %187 = vadd.xlane.f32.xlu0 %v186_v63 }
 0x12d   :  { %v172_v0 = vpop.f32.mrf.mxu1 }
 0x12e   :  { %v173_v1 = vadd.f32 %v362_v59, %v172_v0 }
 0x130   :  { %v181_v6 = vadd.f32 %v173_v1, %v467_v3  ;;  %v374_v3 = vpop.eup %373 }
 0x131   :  { %v175_v7 = vpop.f32.mrf.mxu2  ;;  %v199_v16 = vmul.f32 32.0, %v374_v3  ;;  %vm203_vm2 = vweird.f32 %v374_v3 }
 0x132   :  { %v176_v8 = vadd.f32 %v362_v59, %v175_v7  ;;  %v189_v9 = vsel %vm54_vm0, %v181_v6, 0.0 }
 0x133   :  { %190 = vadd.xlane.f32.xlu0 %v189_v9  ;;  %v200_v17 = vsub.f32 1.0, %v199_v16 }
 0x134   :  { %v182_v10 = vadd.f32 %v176_v8, %v472_v4 }
 0x135   :  { %v201_v18 = vmul.f32 %v374_v3, %v200_v17 }
 0x136   :  { %v192_v11 = vsel %vm54_vm0, %v182_v10, 0.0 }
 0x137   :  { %193 = vadd.xlane.f32.xlu1 %v192_v11  ;;  %v202_v19 = vadd.f32 %v374_v3, %v201_v18 }
 0x139   :  { %v177_v12 = vpop.f32.mrf.mxu2  ;;  %v204_v20 = vsel %vm203_vm2, %v374_v3, %v202_v19 }
 0x13a   :  { %v178_v13 = vadd.f32 %v362_v59, %v177_v12 }
 0x13c   :  { %v183_v2 = vadd.f32 %v178_v13, %v477_v5 }
 0x13e   :  { %v195_v14 = vsel %vm54_vm0, %v183_v2, 0.0 }
 0x13f   :  { %196 = vadd.xlane.f32.xlu1 %v195_v14 }
 0x19e   :  { %v188_v4 = vpop.xlane.xlu0 %187 }
 0x19f   :  { %v205_v21 = vmul.f32 %v204_v20, %v188_v4 }
 0x1a1   :  { %v209_v22 = vsub.f32 %v180_v62, %v205_v21  ;;  %v364_v62 = vld [vmem:[%s549_s6] ss:$0 sm:$0xff]  ;;  %s303_s6 = sshll.u32 %s410_s5, 4  ;;  %s304_s6 = int_to_ptr.vmem [resolvable:$true] %s303_s6 }
 0x1a3   :  { %v213_v23 = vmul.f32 %v209_v22, %v209_v22 }
 0x1a5   :  { %v217_v24 = vsel %vm54_vm0, %v213_v23, 0.0 }
 0x1a6   :  { %218 = vadd.xlane.f32.xlu2 %v217_v24  ;;  %v191_v5 = vpop.xlane.xlu0 %190 }
 0x1a7   :  { %v206_v25 = vmul.f32 %v204_v20, %v191_v5 }
 0x1a9   :  { %v512_v26 = vsub.f32 %v181_v6, %v206_v25 }
 0x1aa   :  { %v194_v27 = vpop.xlane.xlu1 %193 }
 0x1ab   :  { %v207_v28 = vmul.f32 %v204_v20, %v194_v27  ;;  %v214_v29 = vmul.f32 %v512_v26, %v512_v26 }
 0x1ad   :  { %v516_v30 = vsub.f32 %v182_v10, %v207_v28  ;;  %v220_v31 = vsel %vm54_vm0, %v214_v29, 0.0 }
 0x1ae   :  { %221 = vadd.xlane.f32.xlu2 %v220_v31 }
 0x1af   :  { %v215_v32 = vmul.f32 %v516_v30, %v516_v30 }
 0x1b1   :  { %v223_v33 = vsel %vm54_vm0, %v215_v32, 0.0 }
 0x1b2   :  { %v197_v34 = vpop.xlane.xlu1 %196  ;;  %224 = vadd.xlane.f32.xlu0 %v223_v33 }
 0x1b3   :  { %v208_v35 = vmul.f32 %v204_v20, %v197_v34 }
 0x1b5   :  { %v522_v36 = vsub.f32 %v183_v2, %v208_v35 }
 0x1b7   :  { %v216_v37 = vmul.f32 %v522_v36, %v522_v36 }
 0x1b9   :  { %v226_v38 = vsel %vm54_vm0, %v216_v37, 0.0 }
 0x1ba   :  { %227 = vadd.xlane.f32.xlu1 %v226_v38 }
 0x219   :  { %v219_v39 = vpop.xlane.xlu2 %218 }
 0x21a   :  { %v229_v40 = vmul.f32 %v219_v39, %v204_v20 }
 0x21c   :  { %v233_v41 = vadd.f32 1e-12, %v229_v40 }
 0x21e   :  { %375 = vrsqrt.f32 %v233_v41  ;;  %vm243_vm4 = vweird.f32 %v233_v41 }
 0x221   :  { %v222_v42 = vpop.xlane.xlu2 %221 }
 0x222   :  { %v230_v43 = vmul.f32 %v222_v42, %v204_v20 }
 0x224   :  { %v376_v44 = vpop.eup %375  ;;  %v234_v45 = vadd.f32 1e-12, %v230_v43 }
 0x225   :  { %v238_v46 = vmul.f32 %v376_v44, %v233_v41  ;;  %v225_v47 = vpop.xlane.xlu0 %224  ;;  %vm244_vm3 = vweird.f32 %v376_v44 }
 0x226   :  { %377 = vrsqrt.f32 %v234_v45  ;;  %v231_v48 = vmul.f32 %v225_v47, %v204_v20  ;;  %vm245_vm5 = vmor %vm243_vm4, %vm244_vm3  ;;  %vm253_vm7 = vweird.f32 %v234_v45 }
 0x227   :  { %v239_v49 = vmul.f32 %v376_v44, %v238_v46 }
 0x228   :  { %v235_v50 = vadd.f32 1e-12, %v231_v48 }
 0x229   :  { %v240_v51 = vmul.f32 0.5, %v239_v49 }
 0x22a   :  { %379 = vrsqrt.f32 %v235_v50  ;;  %vm263_vm10 = vweird.f32 %v235_v50 }
 0x22b   :  { %v241_v52 = vsub.f32 1.5, %v240_v51 }
 0x22c   :  { %v378_v53 = vpop.eup %377 }
 0x22d   :  { %v242_v54 = vmul.f32 %v376_v44, %v241_v52  ;;  %v248_v55 = vmul.f32 %v378_v53, %v234_v45  ;;  %v228_v56 = vpop.xlane.xlu1 %227  ;;  %vm254_vm6 = vweird.f32 %v378_v53 }
 0x22e   :  { %v232_v58 = vmul.f32 %v228_v56, %v204_v20  ;;  %vm255_vm8 = vmor %vm253_vm7, %vm254_vm6 }
 0x22f   :  { %v246_v59 = vsel %vm245_vm5, %v376_v44, %v242_v54  ;;  %v249_v60 = vmul.f32 %v378_v53, %v248_v55 }
 0x230   :  { %v380_v61 = vpop.eup %379  ;;  %v277_v63 = vmul.f32 %v246_v59, %v209_v22  ;;  %v236_v0 = vadd.f32 1e-12, %v232_v58 }
 0x231   :  { %v250_v1 = vmul.f32 0.5, %v249_v60  ;;  %v258_v6 = vmul.f32 %v380_v61, %v235_v50  ;;  %vm264_vm9 = vweird.f32 %v380_v61 }
 0x232   :  { %v284_v7 = vmul.f32 %v363_v57, %v277_v63  ;;  %381 = vrsqrt.f32 %v236_v0  ;;  %vm265_vm11 = vmor %vm263_vm10, %vm264_vm9  ;;  %vm273_vm13 = vweird.f32 %v236_v0 }
 0x233   :  { %v251_v8 = vsub.f32 1.5, %v250_v1  ;;  %v259_v9 = vmul.f32 %v380_v61, %v258_v6 }
 0x234   :  { %v291_v10 = vadd.f32 %v364_v62, %v284_v7 }
 0x235   :  { %v252_v11 = vmul.f32 %v378_v53, %v251_v8  ;;  %v260_v12 = vmul.f32 0.5, %v259_v9 }
 0x236   :  { %295 = vst.msk [vmem:[#allocation2] sm:$0xff] %vm54_vm0, %v291_v10 }
 0x237   :  { %v256_v13 = vsel %vm255_vm8, %v378_v53, %v252_v11  ;;  %v261_v2 = vsub.f32 1.5, %v260_v12 }
 0x238   :  { %v382_v14 = vpop.eup %381  ;;  %v278_v15 = vmul.f32 %v256_v13, %v512_v26 }
 0x239   :  { %v262_v3 = vmul.f32 %v380_v61, %v261_v2  ;;  %v268_v16 = vmul.f32 %v382_v14, %v236_v0  ;;  %vm274_vm12 = vweird.f32 %v382_v14 }
 0x23a   :  { %v285_v17 = vmul.f32 %v363_v57, %v278_v15  ;;  %vm275_vm14 = vmor %vm273_vm13, %vm274_vm12 }
 0x23b   :  { %v266_v18 = vsel %vm265_vm11, %v380_v61, %v262_v3  ;;  %v269_v19 = vmul.f32 %v382_v14, %v268_v16 }
 0x23c   :  { %v292_v20 = vadd.f32 %v364_v62, %v285_v17  ;;  %v279_v4 = vmul.f32 %v266_v18, %v516_v30 }
 0x23d   :  { %v270_v21 = vmul.f32 0.5, %v269_v19 }
 0x23e   :  { %296 = vst.msk [vmem:[#allocation2 + $0x8] sm:$0xff] %vm54_vm0, %v292_v20  ;;  %v286_v22 = vmul.f32 %v363_v57, %v279_v4 }
 0x23f   :  { %v271_v23 = vsub.f32 1.5, %v270_v21 }
 0x240   :  { %v293_v24 = vadd.f32 %v364_v62, %v286_v22 }
 0x241   :  { %v272_v5 = vmul.f32 %v382_v14, %v271_v23 }
 0x242   :  { %297 = vst.msk [vmem:[#allocation2 + $0x10] sm:$0xff] %vm54_vm0, %v293_v24 }
 0x243   :  { %v276_v25 = vsel %vm275_vm14, %v382_v14, %v272_v5 }
 0x244   :  { %v280_v26 = vmul.f32 %v276_v25, %v522_v36 }
 0x246   :  { %v287_v27 = vmul.f32 %v363_v57, %v280_v26 }
 0x248   :  { %v294_v28 = vadd.f32 %v364_v62, %v287_v27 }
 0x24a   :  { %298 = vst.msk [vmem:[#allocation2 + $0x18] sm:$0xff] %vm54_vm0, %v294_v28 }
 0x24b   :  { %311 = dma.vmem_to_hbm [thread:$0]  %s304_s6, 512, %s306_s26, [#allocation3], %s411_s27, %s411_s27, %s412_s28  }
 0x24c   :  { %407 = dma.done.wait [#allocation3], 512  }
 0x24d   :  { %408 = vsyncadd [#allocation3], 4294966784 }
 0x24e   :  { %316 = vsyncpa [#allocation3], 1 }

</bundles_post_ra>
